<compile_context>
chip_gen: v7x
topology: tpu7x:2x2x1
jax: 0.10.0
libtpu: 0.0.40
codegen_flags: <defaults>
</compile_context>

<pallas_src>
import functools

import jax
import jax.numpy as jnp
from jax.experimental import pallas as pl
from jax.experimental.pallas import tpu as pltpu


def _round_up(x, m):
    return ((x + m - 1) // m) * m


# ---------------------------------------------------------------------------
# Fused MeshGraphMLP kernel factory:
#   y = LN( SiLU( sum_i x_i @ W1_i + b1 ) @ W2 + b2 ) * gamma + beta  [+ x_res]
# ---------------------------------------------------------------------------
def _make_fused_mlp_kernel(n_inputs, residual_idx):
    def kernel(*refs):
        x_refs = refs[:n_inputs]
        w1_refs = refs[n_inputs:2 * n_inputs]
        b1_ref, w2_ref, b2_ref, gamma_ref, beta_ref, out_ref = refs[2 * n_inputs:]

        # Hidden layer: split matmuls (bf16 operands -> MXU, f32 accumulate).
        h = jnp.dot(x_refs[0][...].astype(jnp.bfloat16), w1_refs[0][...],
                    preferred_element_type=jnp.float32)
        for xr, wr in zip(x_refs[1:], w1_refs[1:]):
            h = h + jnp.dot(xr[...].astype(jnp.bfloat16), wr[...],
                            preferred_element_type=jnp.float32)
        h = h + b1_ref[...]
        h = h * jax.nn.sigmoid(h)                       # SiLU (f32; sigmoid on EUP)

        # Output layer.
        y = jnp.dot(h.astype(jnp.bfloat16), w2_ref[...],
                    preferred_element_type=jnp.float32) + b2_ref[...]

        # LayerNorm over features (torch defaults: biased var, eps=1e-5, affine).
        mean = jnp.mean(y, axis=-1, keepdims=True)
        var = jnp.mean(jnp.square(y - mean), axis=-1, keepdims=True)
        y = (y - mean) * jax.lax.rsqrt(var + 1e-5)
        y = y * gamma_ref[...] + beta_ref[...]

        # Residual: reuse an input tile already resident in VMEM (no extra DMA).
        if residual_idx is not None:
            y = y + x_refs[residual_idx][...].astype(jnp.float32)

        out_ref[...] = y.astype(out_ref.dtype)

    return kernel


def _choose_tile_m(rows, dins, hid, dout, tile_m_max, vmem_budget):
    """Largest multiple-of-8 row tile whose double-buffered working set fits."""
    tile_m = min(tile_m_max, _round_up(rows, 8))
    tile_m = _round_up(tile_m, 8)

    def est(tm):
        tiles = (sum(tm * d * 4 for d in dins) + tm * dout * 4) * 2  # dbl-buffered
        weights = (sum(d * hid for d in dins) + hid * dout) * 2      # bf16, resident
        temps = tm * (hid + dout) * 4 * 2                            # h, y live values
        small = (hid + 3 * dout) * 4 * 2
        return tiles + weights + temps + small

    while tile_m > 8 and est(tile_m) > vmem_budget:
        tile_m = max(8, (tile_m // 2) // 8 * 8)
    return tile_m, est(tile_m)


def fused_mesh_graph_mlp(x_parts, mlp_params, residual_idx=None, tile_m_max=512):
    """Fused MeshGraphMLP(hidden_layers=1) on concat(x_parts) without the concat."""
    rows = x_parts[0].shape[0]
    dins = [x.shape[-1] for x in x_parts]
    w1, b1 = mlp_params["w1"], mlp_params["b1"]
    w2, b2 = mlp_params["w2"], mlp_params["b2"]
    gamma, beta = mlp_params["gamma"], mlp_params["beta"]
    hid = w1.shape[1]
    dout = w2.shape[1]
    assert w1.shape[0] == sum(dins)
    if residual_idx is not None:
        assert dins[residual_idx] == dout

    # Split W1 row-wise (equivalent to concatenating the inputs), cast to bf16.
    w1_splits = []
    off = 0
    for d in dins:
        w1_splits.append(w1[off:off + d, :].astype(jnp.bfloat16))
        off += d
    w2_bf = w2.astype(jnp.bfloat16)

    # Row tiling: largest tile (<= tile_m_max, multiple of 8) that fits a
    # conservative VMEM budget; pad rows up to a multiple of the tile.
    tile_m, est = _choose_tile_m(rows, dins, hid, dout, tile_m_max,
                                 vmem_budget=48 * 1024 * 1024)
    padded_rows = _round_up(rows, tile_m)
    if padded_rows != rows:
        pad = padded_rows - rows
        x_parts = [jnp.pad(x, ((0, pad), (0, 0))) for x in x_parts]
    grid = (padded_rows // tile_m,)
    out_dtype = x_parts[0].dtype

    b1_2d = b1.reshape(1, hid).astype(jnp.float32)
    b2_2d = b2.reshape(1, dout).astype(jnp.float32)
    gamma_2d = gamma.reshape(1, dout).astype(jnp.float32)
    beta_2d = beta.reshape(1, dout).astype(jnp.float32)

    x_specs = [pl.BlockSpec((tile_m, d), lambda i: (i, 0)) for d in dins]
    w1_specs = [pl.BlockSpec((d, hid), lambda i: (0, 0)) for d in dins]
    tail_specs = [
        pl.BlockSpec((1, hid), lambda i: (0, 0)),      # b1
        pl.BlockSpec((hid, dout), lambda i: (0, 0)),   # W2 (resident)
        pl.BlockSpec((1, dout), lambda i: (0, 0)),     # b2
        pl.BlockSpec((1, dout), lambda i: (0, 0)),     # LN gamma
        pl.BlockSpec((1, dout), lambda i: (0, 0)),     # LN beta
    ]

    vmem_limit = int(min(max(2 * est, 32 * 1024 * 1024), 64 * 1024 * 1024))

    cost = pl.CostEstimate(
        flops=2 * padded_rows * (sum(dins) * hid + hid * dout),
        transcendentals=padded_rows * (hid + 1),
        bytes_accessed=(4 * padded_rows * (sum(dins) + dout)
                        + 2 * (sum(dins) * hid + hid * dout)),
    )

    kernel = _make_fused_mlp_kernel(len(x_parts), residual_idx)
    out = pl.pallas_call(
        kernel,
        out_shape=jax.ShapeDtypeStruct((padded_rows, dout), out_dtype),
        grid=grid,
        in_specs=x_specs + w1_specs + tail_specs,
        out_specs=pl.BlockSpec((tile_m, dout), lambda i: (i, 0)),
        compiler_params=pltpu.CompilerParams(
            dimension_semantics=("parallel",),
            vmem_limit_bytes=vmem_limit),
        cost_estimate=cost,
    )(*x_parts, *w1_splits, b1_2d, w2_bf, b2_2d, gamma_2d, beta_2d)

    return out[:rows] if padded_rows != rows else out


# ---------------------------------------------------------------------------
# MeshProcessorBlock forward
# ---------------------------------------------------------------------------
def mesh_processor_block_forward(efeat, nfeat, src, dst, params,
                                 aggregation="sum"):
    """efeat: [E, Ce], nfeat: [N, Cn], src/dst: [E] int32 (edge e: src[e]->dst[e])."""
    num_nodes = nfeat.shape[0]
    edge_mlp = params["edge_mlp"]
    node_mlp = params["node_mlp"]
    out_dim_edges = edge_mlp["w2"].shape[1]   # static (from shape, not a traced leaf)
    out_dim_nodes = node_mlp["w2"].shape[1]

    # concat_efeat without materializing the concat: W1 is split inside the MLP.
    # TODO(synk): fold the src/dst gathers into the Pallas kernel (scalar-prefetch
    # driven DMA gather) so nfeat[src]/nfeat[dst] never round-trip through HBM.
    src_feat = jnp.take(nfeat, src, axis=0)
    dst_feat = jnp.take(nfeat, dst, axis=0)

    edge_res_idx = 0 if efeat.shape[-1] == out_dim_edges else None
    efeat_new = fused_mesh_graph_mlp([efeat, src_feat, dst_feat], edge_mlp,
                                     residual_idx=edge_res_idx)

    # aggregate_and_concat: scatter-add edge features onto destination nodes.
    # TODO(synk): move the segment-sum scatter into a Pallas kernel (dst-sorted
    # edges + scalar-prefetch offsets) for large graphs.
    agg = jax.ops.segment_sum(efeat_new, dst, num_segments=num_nodes)
    if aggregation == "mean":
        counts = jax.ops.segment_sum(jnp.ones((dst.shape[0],), efeat_new.dtype),
                                     dst, num_segments=num_nodes)
        agg = agg / jnp.maximum(counts, 1.0)[:, None]

    node_res_idx = 1 if nfeat.shape[-1] == out_dim_nodes else None
    nfeat_new = fused_mesh_graph_mlp([agg, nfeat], node_mlp,
                                     residual_idx=node_res_idx)

    return efeat_new, nfeat_new


# ---------------------------------------------------------------------------
# Pure-JAX reference (f32) and deterministic parameter init
# ---------------------------------------------------------------------------
def _mlp_reference(x, p):
    h = x @ p["w1"] + p["b1"]
    h = h * jax.nn.sigmoid(h)
    y = h @ p["w2"] + p["b2"]
    mean = y.mean(-1, keepdims=True)
    var = ((y - mean) ** 2).mean(-1, keepdims=True)
    y = (y - mean) / jnp.sqrt(var + 1e-5)
    return y * p["gamma"] + p["beta"]


def _forward_reference(efeat, nfeat, src, dst, params, aggregation="sum"):
    cat_e = jnp.concatenate([efeat, nfeat[src], nfeat[dst]], axis=-1)
    e_new = _mlp_reference(cat_e, params["edge_mlp"])
    if efeat.shape[-1] == params["edge_mlp"]["w2"].shape[1]:
        e_new = e_new + efeat
    agg = jax.ops.segment_sum(e_new, dst, num_segments=nfeat.shape[0])
    if aggregation == "mean":
        counts = jax.ops.segment_sum(jnp.ones((dst.shape[0],), e_new.dtype),
                                     dst, num_segments=nfeat.shape[0])
        agg = agg / jnp.maximum(counts, 1.0)[:, None]
    cat_n = jnp.concatenate([agg, nfeat], axis=-1)
    n_new = _mlp_reference(cat_n, params["node_mlp"])
    if nfeat.shape[-1] == params["node_mlp"]["w2"].shape[1]:
        n_new = n_new + nfeat
    return e_new, n_new


def init_mlp_params(key, input_dim, hidden_dim, output_dim, dtype=jnp.float32):
    k1, k2, k3, k4 = jax.random.split(key, 4)
    s1 = 1.0 / jnp.sqrt(input_dim)
    s2 = 1.0 / jnp.sqrt(hidden_dim)
    return {
        "w1": (jax.random.normal(k1, (input_dim, hidden_dim)) * s1).astype(dtype),
        "b1": (jax.random.normal(k2, (hidden_dim,)) * s1).astype(dtype),
        "w2": (jax.random.normal(k3, (hidden_dim, output_dim)) * s2).astype(dtype),
        "b2": (jax.random.normal(k4, (output_dim,)) * s2).astype(dtype),
        "gamma": jnp.ones((output_dim,), dtype),
        "beta": jnp.zeros((output_dim,), dtype),
    }


if __name__ == "__main__":
    # Small synthetic config (module defaults are 512 everywhere; scaled down).
    input_dim_nodes = 32
    input_dim_edges = 32
    output_dim_nodes = 32
    output_dim_edges = 32
    hidden_dim = 64

    num_nodes = 50        # not a tile multiple -> exercises row padding
    num_edges = 300       # -> exercises multi-tile grid

    key = jax.random.PRNGKey(0)
    k_ef, k_nf, k_src, k_dst, k_e, k_n = jax.random.split(key, 6)

    efeat = jax.random.normal(k_ef, (num_edges, input_dim_edges), jnp.float32)
    nfeat = jax.random.normal(k_nf, (num_nodes, input_dim_nodes), jnp.float32)
    src = jax.random.randint(k_src, (num_edges,), 0, num_nodes, jnp.int32)
    dst = jax.random.randint(k_dst, (num_edges,), 0, num_nodes, jnp.int32)

    params = {
        "edge_mlp": init_mlp_params(
            k_e, input_dim_nodes + input_dim_nodes + input_dim_edges,
            hidden_dim, output_dim_edges),
        "node_mlp": init_mlp_params(
            k_n, input_dim_nodes + output_dim_edges,
            hidden_dim, output_dim_nodes),
    }

    fwd = jax.jit(functools.partial(mesh_processor_block_forward,
                                    aggregation="sum"))
    efeat_new, nfeat_new = fwd(efeat, nfeat, src, dst, params)
    jax.block_until_ready((efeat_new, nfeat_new))

    assert efeat_new.shape == (num_edges, output_dim_edges)
    assert nfeat_new.shape == (num_nodes, output_dim_nodes)
    assert bool(jnp.all(jnp.isfinite(efeat_new)))
    assert bool(jnp.all(jnp.isfinite(nfeat_new)))

    # Numerical sanity vs. f32 reference (kernel uses bf16 MXU operands, so a
    # loose tolerance is expected/acceptable).
    e_ref, n_ref = _forward_reference(efeat, nfeat, src, dst, params, "sum")
    err_e = float(jnp.max(jnp.abs(efeat_new - e_ref)))
    err_n = float(jnp.max(jnp.abs(nfeat_new - n_ref)))
    assert err_e < 0.25 and err_n < 0.25, (err_e, err_n)

    print("KERNEL_OK")
</pallas_src>

<mosaic_0001>
module attributes {stable_mosaic.version = 11 : i64} {
  func.func @kernel(%arg0: i32, %arg1: memref<304x32xf32, #tpu.memory_space<vmem>>, %arg2: memref<304x32xf32, #tpu.memory_space<vmem>>, %arg3: memref<304x32xf32, #tpu.memory_space<vmem>>, %arg4: memref<32x64xbf16, #tpu.memory_space<vmem>>, %arg5: memref<32x64xbf16, #tpu.memory_space<vmem>>, %arg6: memref<32x64xbf16, #tpu.memory_space<vmem>>, %arg7: memref<1x64xf32, #tpu.memory_space<vmem>>, %arg8: memref<64x32xbf16, #tpu.memory_space<vmem>>, %arg9: memref<1x32xf32, #tpu.memory_space<vmem>>, %arg10: memref<1x32xf32, #tpu.memory_space<vmem>>, %arg11: memref<1x32xf32, #tpu.memory_space<vmem>>, %arg12: memref<304x32xf32, #tpu.memory_space<vmem>>) attributes {dimension_semantics = [#tpu.dimension_semantics<parallel>], iteration_bounds = array<i64: 1>, scalar_prefetch = 0 : i64, scratch_operands = 0 : i64, tpu.core_type = #tpu.core_type<tc>, window_params = [{transform_indices = @transform_0, window_bounds = array<i64: 304, 32>}, {transform_indices = @transform_1, window_bounds = array<i64: 304, 32>}, {transform_indices = @transform_2, window_bounds = array<i64: 304, 32>}, {pipeline_mode = #tpu.pipeline_mode<synchronous>, transform_indices = @transform_3, window_bounds = array<i64: 32, 64>}, {pipeline_mode = #tpu.pipeline_mode<synchronous>, transform_indices = @transform_4, window_bounds = array<i64: 32, 64>}, {pipeline_mode = #tpu.pipeline_mode<synchronous>, transform_indices = @transform_5, window_bounds = array<i64: 32, 64>}, {pipeline_mode = #tpu.pipeline_mode<synchronous>, transform_indices = @transform_6, window_bounds = array<i64: 1, 64>}, {pipeline_mode = #tpu.pipeline_mode<synchronous>, transform_indices = @transform_7, window_bounds = array<i64: 64, 32>}, {pipeline_mode = #tpu.pipeline_mode<synchronous>, transform_indices = @transform_8, window_bounds = array<i64: 1, 32>}, {pipeline_mode = #tpu.pipeline_mode<synchronous>, transform_indices = @transform_9, window_bounds = array<i64: 1, 32>}, {pipeline_mode = #tpu.pipeline_mode<synchronous>, transform_indices = @transform_10, window_bounds = array<i64: 1, 32>}, {transform_indices = @transform_11, window_bounds = array<i64: 304, 32>}]} {
    %c0 = arith.constant 0 : index
    %c0_0 = arith.constant 0 : index
    %0 = vector.load %arg1[%c0, %c0_0] : memref<304x32xf32, #tpu.memory_space<vmem>>, vector<304x32xf32>
    %1 = arith.truncf %0 : vector<304x32xf32> to vector<304x32xbf16>
    %c0_1 = arith.constant 0 : index
    %c0_2 = arith.constant 0 : index
    %2 = vector.load %arg4[%c0_1, %c0_2] : memref<32x64xbf16, #tpu.memory_space<vmem>>, vector<32x64xbf16>
    %cst = arith.constant dense<0.000000e+00> : vector<304x64xf32>
    %3 = tpu.matmul %1, %2, %cst {dimension_numbers = #tpu.dot_dimension_numbers<[1], [0], [0], [1], [0, 0, 1, 1], [], []>} : vector<304x32xbf16>, vector<32x64xbf16>, vector<304x64xf32> -> vector<304x64xf32>
    %c0_3 = arith.constant 0 : index
    %c0_4 = arith.constant 0 : index
    %4 = vector.load %arg2[%c0_3, %c0_4] : memref<304x32xf32, #tpu.memory_space<vmem>>, vector<304x32xf32>
    %5 = arith.truncf %4 : vector<304x32xf32> to vector<304x32xbf16>
    %c0_5 = arith.constant 0 : index
    %c0_6 = arith.constant 0 : index
    %6 = vector.load %arg5[%c0_5, %c0_6] : memref<32x64xbf16, #tpu.memory_space<vmem>>, vector<32x64xbf16>
    %cst_7 = arith.constant dense<0.000000e+00> : vector<304x64xf32>
    %7 = tpu.matmul %5, %6, %cst_7 {dimension_numbers = #tpu.dot_dimension_numbers<[1], [0], [0], [1], [0, 0, 1, 1], [], []>} : vector<304x32xbf16>, vector<32x64xbf16>, vector<304x64xf32> -> vector<304x64xf32>
    %8 = arith.addf %3, %7 : vector<304x64xf32>
    %c0_8 = arith.constant 0 : index
    %c0_9 = arith.constant 0 : index
    %9 = vector.load %arg3[%c0_8, %c0_9] : memref<304x32xf32, #tpu.memory_space<vmem>>, vector<304x32xf32>
    %10 = arith.truncf %9 : vector<304x32xf32> to vector<304x32xbf16>
    %c0_10 = arith.constant 0 : index
    %c0_11 = arith.constant 0 : index
    %11 = vector.load %arg6[%c0_10, %c0_11] : memref<32x64xbf16, #tpu.memory_space<vmem>>, vector<32x64xbf16>
    %cst_12 = arith.constant dense<0.000000e+00> : vector<304x64xf32>
    %12 = tpu.matmul %10, %11, %cst_12 {dimension_numbers = #tpu.dot_dimension_numbers<[1], [0], [0], [1], [0, 0, 1, 1], [], []>} : vector<304x32xbf16>, vector<32x64xbf16>, vector<304x64xf32> -> vector<304x64xf32>
    %13 = arith.addf %8, %12 : vector<304x64xf32>
    %c0_13 = arith.constant 0 : index
    %c0_14 = arith.constant 0 : index
    %14 = vector.load %arg7[%c0_13, %c0_14] : memref<1x64xf32, #tpu.memory_space<vmem>>, vector<1x64xf32>
    %15 = vector.broadcast %14 : vector<1x64xf32> to vector<304x64xf32>
    %16 = arith.addf %13, %15 : vector<304x64xf32>
    %17 = arith.negf %16 : vector<304x64xf32>
    %18 = math.exp %17 : vector<304x64xf32>
    %cst_15 = arith.constant 1.000000e+00 : f32
    %19 = vector.broadcast %cst_15 : f32 to vector<304x64xf32>
    %20 = arith.addf %19, %18 : vector<304x64xf32>
    %21 = arith.divf %19, %20 : vector<304x64xf32>
    %22 = arith.mulf %16, %21 : vector<304x64xf32>
    %23 = arith.truncf %22 : vector<304x64xf32> to vector<304x64xbf16>
    %c0_16 = arith.constant 0 : index
    %c0_17 = arith.constant 0 : index
    %24 = vector.load %arg8[%c0_16, %c0_17] : memref<64x32xbf16, #tpu.memory_space<vmem>>, vector<64x32xbf16>
    %cst_18 = arith.constant dense<0.000000e+00> : vector<304x32xf32>
    %25 = tpu.matmul %23, %24, %cst_18 {dimension_numbers = #tpu.dot_dimension_numbers<[1], [0], [0], [1], [0, 0, 1, 1], [], []>} : vector<304x64xbf16>, vector<64x32xbf16>, vector<304x32xf32> -> vector<304x32xf32>
    %c0_19 = arith.constant 0 : index
    %c0_20 = arith.constant 0 : index
    %26 = vector.load %arg9[%c0_19, %c0_20] : memref<1x32xf32, #tpu.memory_space<vmem>>, vector<1x32xf32>
    %27 = vector.broadcast %26 : vector<1x32xf32> to vector<304x32xf32>
    %28 = arith.addf %25, %27 : vector<304x32xf32>
    %cst_21 = arith.constant dense<0.000000e+00> : vector<304xf32>
    %29 = vector.multi_reduction <add>, %28, %cst_21 [1] : vector<304x32xf32> to vector<304xf32>
    %30 = vector.shape_cast %29 : vector<304xf32> to vector<304x1xf32>
    %cst_22 = arith.constant 3.200000e+01 : f32
    %31 = vector.broadcast %cst_22 : f32 to vector<304x1xf32>
    %32 = arith.divf %30, %31 : vector<304x1xf32>
    %33 = vector.broadcast %32 : vector<304x1xf32> to vector<304x32xf32>
    %34 = arith.subf %28, %33 : vector<304x32xf32>
    %35 = arith.mulf %34, %34 : vector<304x32xf32>
    %cst_23 = arith.constant dense<0.000000e+00> : vector<304xf32>
    %36 = vector.multi_reduction <add>, %35, %cst_23 [1] : vector<304x32xf32> to vector<304xf32>
    %37 = vector.shape_cast %36 : vector<304xf32> to vector<304x1xf32>
    %cst_24 = arith.constant 3.200000e+01 : f32
    %38 = vector.broadcast %cst_24 : f32 to vector<304x1xf32>
    %39 = arith.divf %37, %38 : vector<304x1xf32>
    %40 = vector.broadcast %32 : vector<304x1xf32> to vector<304x32xf32>
    %41 = arith.subf %28, %40 : vector<304x32xf32>
    %cst_25 = arith.constant 9.99999974E-6 : f32
    %42 = vector.broadcast %cst_25 : f32 to vector<304x1xf32>
    %43 = arith.addf %39, %42 : vector<304x1xf32>
    %44 = math.rsqrt %43 : vector<304x1xf32>
    %45 = vector.broadcast %44 : vector<304x1xf32> to vector<304x32xf32>
    %46 = arith.mulf %41, %45 : vector<304x32xf32>
    %c0_26 = arith.constant 0 : index
    %c0_27 = arith.constant 0 : index
    %47 = vector.load %arg10[%c0_26, %c0_27] : memref<1x32xf32, #tpu.memory_space<vmem>>, vector<1x32xf32>
    %48 = vector.broadcast %47 : vector<1x32xf32> to vector<304x32xf32>
    %49 = arith.mulf %46, %48 : vector<304x32xf32>
    %c0_28 = arith.constant 0 : index
    %c0_29 = arith.constant 0 : index
    %50 = vector.load %arg11[%c0_28, %c0_29] : memref<1x32xf32, #tpu.memory_space<vmem>>, vector<1x32xf32>
    %51 = vector.broadcast %50 : vector<1x32xf32> to vector<304x32xf32>
    %52 = arith.addf %49, %51 : vector<304x32xf32>
    %c0_30 = arith.constant 0 : index
    %c0_31 = arith.constant 0 : index
    %53 = vector.load %arg1[%c0_30, %c0_31] : memref<304x32xf32, #tpu.memory_space<vmem>>, vector<304x32xf32>
    %54 = arith.addf %52, %53 : vector<304x32xf32>
    %c0_32 = arith.constant 0 : index
    %c0_33 = arith.constant 0 : index
    %55 = vector.load %arg12[%c0_32, %c0_33] : memref<304x32xf32, #tpu.memory_space<vmem>>, vector<304x32xf32>
    tpu.vector_store %arg12[%c0_32, %c0_33], %54 {strides = array<i32>} : memref<304x32xf32, #tpu.memory_space<vmem>>, vector<304x32xf32>,
    return
  }
  func.func @transform_0(%arg0: i32) -> (i32, i32) {
    %c0_i32 = arith.constant 0 : i32
    %c0_i32_0 = arith.constant 0 : i32
    return %arg0, %c0_i32 : i32, i32
  }
  func.func @transform_1(%arg0: i32) -> (i32, i32) {
    %c0_i32 = arith.constant 0 : i32
    %c0_i32_0 = arith.constant 0 : i32
    return %arg0, %c0_i32 : i32, i32
  }
  func.func @transform_2(%arg0: i32) -> (i32, i32) {
    %c0_i32 = arith.constant 0 : i32
    %c0_i32_0 = arith.constant 0 : i32
    return %arg0, %c0_i32 : i32, i32
  }
  func.func @transform_3(%arg0: i32) -> (i32, i32) {
    %c0_i32 = arith.constant 0 : i32
    %c0_i32_0 = arith.constant 0 : i32
    %c0_i32_1 = arith.constant 0 : i32
    return %c0_i32, %c0_i32_0 : i32, i32
  }
  func.func @transform_4(%arg0: i32) -> (i32, i32) {
    %c0_i32 = arith.constant 0 : i32
    %c0_i32_0 = arith.constant 0 : i32
    %c0_i32_1 = arith.constant 0 : i32
    return %c0_i32, %c0_i32_0 : i32, i32
  }
  func.func @transform_5(%arg0: i32) -> (i32, i32) {
    %c0_i32 = arith.constant 0 : i32
    %c0_i32_0 = arith.constant 0 : i32
    %c0_i32_1 = arith.constant 0 : i32
    return %c0_i32, %c0_i32_0 : i32, i32
  }
  func.func @transform_6(%arg0: i32) -> (i32, i32) {
    %c0_i32 = arith.constant 0 : i32
    %c0_i32_0 = arith.constant 0 : i32
    %c0_i32_1 = arith.constant 0 : i32
    return %c0_i32, %c0_i32_0 : i32, i32
  }
  func.func @transform_7(%arg0: i32) -> (i32, i32) {
    %c0_i32 = arith.constant 0 : i32
    %c0_i32_0 = arith.constant 0 : i32
    %c0_i32_1 = arith.constant 0 : i32
    return %c0_i32, %c0_i32_0 : i32, i32
  }
  func.func @transform_8(%arg0: i32) -> (i32, i32) {
    %c0_i32 = arith.constant 0 : i32
    %c0_i32_0 = arith.constant 0 : i32
    %c0_i32_1 = arith.constant 0 : i32
    return %c0_i32, %c0_i32_0 : i32, i32
  }
  func.func @transform_9(%arg0: i32) -> (i32, i32) {
    %c0_i32 = arith.constant 0 : i32
    %c0_i32_0 = arith.constant 0 : i32
    %c0_i32_1 = arith.constant 0 : i32
    return %c0_i32, %c0_i32_0 : i32, i32
  }
  func.func @transform_10(%arg0: i32) -> (i32, i32) {
    %c0_i32 = arith.constant 0 : i32
    %c0_i32_0 = arith.constant 0 : i32
    %c0_i32_1 = arith.constant 0 : i32
    return %c0_i32, %c0_i32_0 : i32, i32
  }
  func.func @transform_11(%arg0: i32) -> (i32, i32) {
    %c0_i32 = arith.constant 0 : i32
    %c0_i32_0 = arith.constant 0 : i32
    return %arg0, %c0_i32 : i32, i32
  }
}

module attributes {stable_mosaic.version = 11 : i64} {
  func.func @kernel(%arg0: i32, %arg1: memref<56x32xf32, #tpu.memory_space<vmem>>, %arg2: memref<56x32xf32, #tpu.memory_space<vmem>>, %arg3: memref<32x64xbf16, #tpu.memory_space<vmem>>, %arg4: memref<32x64xbf16, #tpu.memory_space<vmem>>, %arg5: memref<1x64xf32, #tpu.memory_space<vmem>>, %arg6: memref<64x32xbf16, #tpu.memory_space<vmem>>, %arg7: memref<1x32xf32, #tpu.memory_space<vmem>>, %arg8: memref<1x32xf32, #tpu.memory_space<vmem>>, %arg9: memref<1x32xf32, #tpu.memory_space<vmem>>, %arg10: memref<56x32xf32, #tpu.memory_space<vmem>>) attributes {dimension_semantics = [#tpu.dimension_semantics<parallel>], iteration_bounds = array<i64: 1>, scalar_prefetch = 0 : i64, scratch_operands = 0 : i64, tpu.core_type = #tpu.core_type<tc>, window_params = [{transform_indices = @transform_0, window_bounds = array<i64: 56, 32>}, {transform_indices = @transform_1, window_bounds = array<i64: 56, 32>}, {pipeline_mode = #tpu.pipeline_mode<synchronous>, transform_indices = @transform_2, window_bounds = array<i64: 32, 64>}, {pipeline_mode = #tpu.pipeline_mode<synchronous>, transform_indices = @transform_3, window_bounds = array<i64: 32, 64>}, {pipeline_mode = #tpu.pipeline_mode<synchronous>, transform_indices = @transform_4, window_bounds = array<i64: 1, 64>}, {pipeline_mode = #tpu.pipeline_mode<synchronous>, transform_indices = @transform_5, window_bounds = array<i64: 64, 32>}, {pipeline_mode = #tpu.pipeline_mode<synchronous>, transform_indices = @transform_6, window_bounds = array<i64: 1, 32>}, {pipeline_mode = #tpu.pipeline_mode<synchronous>, transform_indices = @transform_7, window_bounds = array<i64: 1, 32>}, {pipeline_mode = #tpu.pipeline_mode<synchronous>, transform_indices = @transform_8, window_bounds = array<i64: 1, 32>}, {transform_indices = @transform_9, window_bounds = array<i64: 56, 32>}]} {
    %c0 = arith.constant 0 : index
    %c0_0 = arith.constant 0 : index
    %0 = vector.load %arg1[%c0, %c0_0] : memref<56x32xf32, #tpu.memory_space<vmem>>, vector<56x32xf32>
    %1 = arith.truncf %0 : vector<56x32xf32> to vector<56x32xbf16>
    %c0_1 = arith.constant 0 : index
    %c0_2 = arith.constant 0 : index
    %2 = vector.load %arg3[%c0_1, %c0_2] : memref<32x64xbf16, #tpu.memory_space<vmem>>, vector<32x64xbf16>
    %cst = arith.constant dense<0.000000e+00> : vector<56x64xf32>
    %3 = tpu.matmul %1, %2, %cst {dimension_numbers = #tpu.dot_dimension_numbers<[1], [0], [0], [1], [0, 0, 1, 1], [], []>} : vector<56x32xbf16>, vector<32x64xbf16>, vector<56x64xf32> -> vector<56x64xf32>
    %c0_3 = arith.constant 0 : index
    %c0_4 = arith.constant 0 : index
    %4 = vector.load %arg2[%c0_3, %c0_4] : memref<56x32xf32, #tpu.memory_space<vmem>>, vector<56x32xf32>
    %5 = arith.truncf %4 : vector<56x32xf32> to vector<56x32xbf16>
    %c0_5 = arith.constant 0 : index
    %c0_6 = arith.constant 0 : index
    %6 = vector.load %arg4[%c0_5, %c0_6] : memref<32x64xbf16, #tpu.memory_space<vmem>>, vector<32x64xbf16>
    %cst_7 = arith.constant dense<0.000000e+00> : vector<56x64xf32>
    %7 = tpu.matmul %5, %6, %cst_7 {dimension_numbers = #tpu.dot_dimension_numbers<[1], [0], [0], [1], [0, 0, 1, 1], [], []>} : vector<56x32xbf16>, vector<32x64xbf16>, vector<56x64xf32> -> vector<56x64xf32>
    %8 = arith.addf %3, %7 : vector<56x64xf32>
    %c0_8 = arith.constant 0 : index
    %c0_9 = arith.constant 0 : index
    %9 = vector.load %arg5[%c0_8, %c0_9] : memref<1x64xf32, #tpu.memory_space<vmem>>, vector<1x64xf32>
    %10 = vector.broadcast %9 : vector<1x64xf32> to vector<56x64xf32>
    %11 = arith.addf %8, %10 : vector<56x64xf32>
    %12 = arith.negf %11 : vector<56x64xf32>
    %13 = math.exp %12 : vector<56x64xf32>
    %cst_10 = arith.constant 1.000000e+00 : f32
    %14 = vector.broadcast %cst_10 : f32 to vector<56x64xf32>
    %15 = arith.addf %14, %13 : vector<56x64xf32>
    %16 = arith.divf %14, %15 : vector<56x64xf32>
    %17 = arith.mulf %11, %16 : vector<56x64xf32>
    %18 = arith.truncf %17 : vector<56x64xf32> to vector<56x64xbf16>
    %c0_11 = arith.constant 0 : index
    %c0_12 = arith.constant 0 : index
    %19 = vector.load %arg6[%c0_11, %c0_12] : memref<64x32xbf16, #tpu.memory_space<vmem>>, vector<64x32xbf16>
    %cst_13 = arith.constant dense<0.000000e+00> : vector<56x32xf32>
    %20 = tpu.matmul %18, %19, %cst_13 {dimension_numbers = #tpu.dot_dimension_numbers<[1], [0], [0], [1], [0, 0, 1, 1], [], []>} : vector<56x64xbf16>, vector<64x32xbf16>, vector<56x32xf32> -> vector<56x32xf32>
    %c0_14 = arith.constant 0 : index
    %c0_15 = arith.constant 0 : index
    %21 = vector.load %arg7[%c0_14, %c0_15] : memref<1x32xf32, #tpu.memory_space<vmem>>, vector<1x32xf32>
    %22 = vector.broadcast %21 : vector<1x32xf32> to vector<56x32xf32>
    %23 = arith.addf %20, %22 : vector<56x32xf32>
    %cst_16 = arith.constant dense<0.000000e+00> : vector<56xf32>
    %24 = vector.multi_reduction <add>, %23, %cst_16 [1] : vector<56x32xf32> to vector<56xf32>
    %25 = vector.shape_cast %24 : vector<56xf32> to vector<56x1xf32>
    %cst_17 = arith.constant 3.200000e+01 : f32
    %26 = vector.broadcast %cst_17 : f32 to vector<56x1xf32>
    %27 = arith.divf %25, %26 : vector<56x1xf32>
    %28 = vector.broadcast %27 : vector<56x1xf32> to vector<56x32xf32>
    %29 = arith.subf %23, %28 : vector<56x32xf32>
    %30 = arith.mulf %29, %29 : vector<56x32xf32>
    %cst_18 = arith.constant dense<0.000000e+00> : vector<56xf32>
    %31 = vector.multi_reduction <add>, %30, %cst_18 [1] : vector<56x32xf32> to vector<56xf32>
    %32 = vector.shape_cast %31 : vector<56xf32> to vector<56x1xf32>
    %cst_19 = arith.constant 3.200000e+01 : f32
    %33 = vector.broadcast %cst_19 : f32 to vector<56x1xf32>
    %34 = arith.divf %32, %33 : vector<56x1xf32>
    %35 = vector.broadcast %27 : vector<56x1xf32> to vector<56x32xf32>
    %36 = arith.subf %23, %35 : vector<56x32xf32>
    %cst_20 = arith.constant 9.99999974E-6 : f32
    %37 = vector.broadcast %cst_20 : f32 to vector<56x1xf32>
    %38 = arith.addf %34, %37 : vector<56x1xf32>
    %39 = math.rsqrt %38 : vector<56x1xf32>
    %40 = vector.broadcast %39 : vector<56x1xf32> to vector<56x32xf32>
    %41 = arith.mulf %36, %40 : vector<56x32xf32>
    %c0_21 = arith.constant 0 : index
    %c0_22 = arith.constant 0 : index
    %42 = vector.load %arg8[%c0_21, %c0_22] : memref<1x32xf32, #tpu.memory_space<vmem>>, vector<1x32xf32>
    %43 = vector.broadcast %42 : vector<1x32xf32> to vector<56x32xf32>
    %44 = arith.mulf %41, %43 : vector<56x32xf32>
    %c0_23 = arith.constant 0 : index
    %c0_24 = arith.constant 0 : index
    %45 = vector.load %arg9[%c0_23, %c0_24] : memref<1x32xf32, #tpu.memory_space<vmem>>, vector<1x32xf32>
    %46 = vector.broadcast %45 : vector<1x32xf32> to vector<56x32xf32>
    %47 = arith.addf %44, %46 : vector<56x32xf32>
    %c0_25 = arith.constant 0 : index
    %c0_26 = arith.constant 0 : index
    %48 = vector.load %arg2[%c0_25, %c0_26] : memref<56x32xf32, #tpu.memory_space<vmem>>, vector<56x32xf32>
    %49 = arith.addf %47, %48 : vector<56x32xf32>
    %c0_27 = arith.constant 0 : index
    %c0_28 = arith.constant 0 : index
    %50 = vector.load %arg10[%c0_27, %c0_28] : memref<56x32xf32, #tpu.memory_space<vmem>>, vector<56x32xf32>
    tpu.vector_store %arg10[%c0_27, %c0_28], %49 {strides = array<i32>} : memref<56x32xf32, #tpu.memory_space<vmem>>, vector<56x32xf32>,
    return
  }
  func.func @transform_0(%arg0: i32) -> (i32, i32) {
    %c0_i32 = arith.constant 0 : i32
    %c0_i32_0 = arith.constant 0 : i32
    return %arg0, %c0_i32 : i32, i32
  }
  func.func @transform_1(%arg0: i32) -> (i32, i32) {
    %c0_i32 = arith.constant 0 : i32
    %c0_i32_0 = arith.constant 0 : i32
    return %arg0, %c0_i32 : i32, i32
  }
  func.func @transform_2(%arg0: i32) -> (i32, i32) {
    %c0_i32 = arith.constant 0 : i32
    %c0_i32_0 = arith.constant 0 : i32
    %c0_i32_1 = arith.constant 0 : i32
    return %c0_i32, %c0_i32_0 : i32, i32
  }
  func.func @transform_3(%arg0: i32) -> (i32, i32) {
    %c0_i32 = arith.constant 0 : i32
    %c0_i32_0 = arith.constant 0 : i32
    %c0_i32_1 = arith.constant 0 : i32
    return %c0_i32, %c0_i32_0 : i32, i32
  }
  func.func @transform_4(%arg0: i32) -> (i32, i32) {
    %c0_i32 = arith.constant 0 : i32
    %c0_i32_0 = arith.constant 0 : i32
    %c0_i32_1 = arith.constant 0 : i32
    return %c0_i32, %c0_i32_0 : i32, i32
  }
  func.func @transform_5(%arg0: i32) -> (i32, i32) {
    %c0_i32 = arith.constant 0 : i32
    %c0_i32_0 = arith.constant 0 : i32
    %c0_i32_1 = arith.constant 0 : i32
    return %c0_i32, %c0_i32_0 : i32, i32
  }
  func.func @transform_6(%arg0: i32) -> (i32, i32) {
    %c0_i32 = arith.constant 0 : i32
    %c0_i32_0 = arith.constant 0 : i32
    %c0_i32_1 = arith.constant 0 : i32
    return %c0_i32, %c0_i32_0 : i32, i32
  }
  func.func @transform_7(%arg0: i32) -> (i32, i32) {
    %c0_i32 = arith.constant 0 : i32
    %c0_i32_0 = arith.constant 0 : i32
    %c0_i32_1 = arith.constant 0 : i32
    return %c0_i32, %c0_i32_0 : i32, i32
  }
  func.func @transform_8(%arg0: i32) -> (i32, i32) {
    %c0_i32 = arith.constant 0 : i32
    %c0_i32_0 = arith.constant 0 : i32
    %c0_i32_1 = arith.constant 0 : i32
    return %c0_i32, %c0_i32_0 : i32, i32
  }
  func.func @transform_9(%arg0: i32) -> (i32, i32) {
    %c0_i32 = arith.constant 0 : i32
    %c0_i32_0 = arith.constant 0 : i32
    return %arg0, %c0_i32 : i32, i32
  }
}

</mosaic_0001>

<bundles_post_ra>
// kernel: mesh_processor_block_forward.3
= control target key start
LH: loop header
LB: loop body
LE: loop exit
PB: predicated region body
PF: predicated region fallthrough
CT: control target
= control target key end

     0   :  { %vm75_vm0 = vcmask 261120   ;;  %vm346_vm1 = vcmask 523264   ;;  %s943_s3 = inlined_call_operand.vmem [shape: bf16[32,64], index: 3, kind: input, shape index: {}]   ;;  %s944_s1 = inlined_call_operand.vmem [shape: f32[56,32], index: 1, kind: input, shape index: {}]   ;;  %s945_s2 = inlined_call_operand.vmem [shape: bf16[32,64], index: 2, kind: input, shape index: {}]   ;;  %s946_s0 = inlined_call_operand.vmem [shape: f32[56,32], index: 0, kind: input, shape index: {}]   ;;  %s947_s5 = inlined_call_operand.vmem [shape: bf16[64,32], index: 5, kind: input, shape index: {}]   ;;  %s948_s4 = inlined_call_operand.vmem [shape: f32[1,64], index: 4, kind: input, shape index: {}]   ;;  %s949_s6 = inlined_call_operand.vmem [shape: f32[1,32], index: 6, kind: input, shape index: {}]   ;;  %s950_s7 = inlined_call_operand.vmem [shape: f32[1,32], index: 7, kind: input, shape index: {}]   ;;  %s951_s8 = inlined_call_operand.vmem [shape: f32[1,32], index: 8, kind: input, shape index: {}]   ;;  %s952_s9 = inlined_call_operand.vmem [shape: f32[56,32], index: 9, kind: output, shape index: {}]  }
   0x1   :  { %v656_v0 = vld [vmem:[%s943_s3] sm:$0xff]   ;;  %v657_v1 = vld [vmem:[%s943_s3 + $0x8] sm:$0xff]   ;;  %v775_v4 = vld [vmem:[%s944_s1 + $0x10] sm:$0xff] }
   0x2   :  { %612 = vmatprep.subr.bf16.mxu0 %v656_v0  ;;  %v765_v2 = vld [vmem:[%s944_s1] sm:$0xff]  ;;  %v770_v3 = vld [vmem:[%s944_s1 + $0x8] sm:$0xff]  ;;  %v782_v6 = vld [vmem:[%s944_s1 + $0x18] sm:$0xff] }
   0x3   :  { %613 = vmatpush3.bf16.msra.mxu0 %v656_v0  ;;  %v55_v5 = vpack.c.bf16 %v770_v3, %v765_v2  ;;  %v658_v7 = vld [vmem:[%s945_s2] sm:$0xff]   ;;  %v795_v9 = vld [vmem:[%s944_s1 + $0x28] sm:$0xff]  ;;  %v56_v10 = vpack.c.bf16 %v782_v6, %v775_v4  ;;  %v810_v13 = vld [vmem:[%s944_s1 + $0x30] sm:$0xff] }
   0x4   :  { %614 = vmatprep.subr.bf16.mxu0 %v657_v1  ;;  %v790_v8 = vld [vmem:[%s944_s1 + $0x20] sm:$0xff]  ;;  %v659_v12 = vld [vmem:[%s945_s2 + $0x8] sm:$0xff]   ;;  %v58_v16 = vpack.c.bf16 %v810_v13, %v810_v13  ;;  %v35_v18 = vld [vmem:[%s946_s0 + $0x10] sm:$0xff] }
   0x5   :  { %616 = vmatprep.mubr.msk.bf16.mxu0 %vm75_vm0, %v55_v5  ;;  %v57_v11 = vpack.c.bf16 %v795_v9, %v790_v8  ;;  %v33_v14 = vld [vmem:[%s946_s0] sm:$0xff]  ;;  %v34_v15 = vld [vmem:[%s946_s0 + $0x8] sm:$0xff]  ;;  %v36_v19 = vld [vmem:[%s946_s0 + $0x18] sm:$0xff] }
   0x6   :  { %v40_v17 = vpack.c.bf16 %v34_v15, %v33_v14  ;;  %v37_v20 = vld [vmem:[%s946_s0 + $0x20] sm:$0xff]  ;;  %v38_v21 = vld [vmem:[%s946_s0 + $0x28] sm:$0xff]  ;;  %v41_v22 = vpack.c.bf16 %v36_v19, %v35_v18  ;;  %v39_v24 = vld [vmem:[%s946_s0 + $0x30] sm:$0xff] }
   0x7   :  { %615 = vmatpush3.bf16.msra.mxu0 %v657_v1  ;;  %v42_v23 = vpack.c.bf16 %v38_v21, %v37_v20  ;;  %v43_v25 = vpack.c.bf16 %v39_v24, %v39_v24  ;;  %v660_v26 = vld [vmem:[%s947_s5] sm:$0xff]   ;;  %v661_v27 = vld [vmem:[%s947_s5 + $0x8] sm:$0xff]   ;;  %v662_v28 = vld [vmem:[%s947_s5 + $0x10] sm:$0xff]  }
   0x8   :  { %624 = vmatprep.subr.bf16.mxu0 %v658_v7  ;;  %636 = vmatprep.subr.bf16.mxu1 %v660_v26  ;;  %v663_v29 = vld [vmem:[%s947_s5 + $0x18] sm:$0xff]   ;;  %v573_v34 = vld [vmem:[%s948_s4] ss:$0 sm:$0xff] }
   0x9   :  { %637 = vmatpush3.bf16.msra.mxu1 %v660_v26 }
   0xa   :  { %617 = vmatmul.mubr.msk.bf16.vlgmr.msra.gmra.mrb[0].mxu0 %vm75_vm0, %v56_v10  ;;  %638 = vmatprep.subr.bf16.mxu1 %v661_v27 }
   0xb   :  { %625 = vmatpush3.bf16.msra.mxu0 %v658_v7  ;;  %620 = vmatprep.mubr.msk.bf16.mxu0 %vm75_vm0, %v57_v11 }
   0xc   :  { %626 = vmatprep.subr.bf16.mxu0 %v659_v12 }
   0xd   :  { %639 = vmatpush3.bf16.msra.mxu1 %v661_v27 }
   0xe   :  { %640 = vmatprep.subr.bf16.mxu1 %v662_v28 }
   0xf   :  { %627 = vmatpush3.bf16.msra.mxu0 %v659_v12 }
  0x11   :  { %641 = vmatpush3.bf16.msra.mxu1 %v662_v28 }
  0x12   :  { %621 = vmatmul.mubr.msk.bf16.gmra.mrb[4].mxu0 %vm75_vm0, %v58_v16  ;;  %642 = vmatprep.subr.bf16.mxu1 %v663_v29 }
  0x13   :  { %628 = vmatprep.mubr.msk.bf16.mxu0 %vm75_vm0, %v40_v17 }
  0x15   :  { %643 = vmatpush3.bf16.msra.mxu1 %v663_v29 }
  0x1a   :  { %629 = vmatmul.mubr.msk.bf16.vlgmr.msra.gmra.mrb[0].mxu0 %vm75_vm0, %v41_v22 }
  0x1b   :  { %632 = vmatprep.mubr.msk.bf16.mxu0 %vm75_vm0, %v42_v23 }
  0x22   :  { %633 = vmatmul.mubr.msk.bf16.gmra.mrb[8].mxu0 %vm75_vm0, %v43_v25 }
  0xe5   :  { %v622_v30 = vpop.f32.mrb[4].mxu0 }
  0xe6   :  { %v138_v31 = vpop.f32.mrb[5].mxu0 }
  0xe7   :  { %v623_v32 = vpop.f32.mrb[6].mxu0 }
  0xe8   :  { %v141_v33 = vpop.f32.mrb[7].mxu0 }
  0xed   :  { %v630_v35 = vpop.f32.mrb[0].mxu0 }
  0xee   :  { %v249_v36 = vadd.f32 %v630_v35, %v573_v34  ;;  %v210_v37 = vpop.f32.mrb[1].mxu0  ;;  %v581_v35 = vld [vmem:[%s949_s6] ss:$0 sm:$0xff] }
  0xef   :  { %v247_v38 = vadd.f32 %v573_v34, %v210_v37  ;;  %v631_v39 = vpop.f32.mrb[2].mxu0 }
  0xf0   :  { %v576_v40 = vmul.f32 -1.442695, %v249_v36  ;;  %v250_v41 = vadd.f32 %v631_v39, %v573_v34  ;;  %v213_v42 = vpop.f32.mrb[3].mxu0 }
  0xf1   :  { %v574_v43 = vmul.f32 -1.442695, %v247_v38  ;;  %v248_v44 = vadd.f32 %v573_v34, %v213_v42 }
  0xf2   :  { %664 = vpow2.f32 %v576_v40  ;;  %v577_v45 = vmul.f32 -1.442695, %v250_v41 }
  0xf3   :  { %666 = vpow2.f32 %v574_v43  ;;  %v575_v46 = vmul.f32 -1.442695, %v248_v44 }
  0xf4   :  { %668 = vpow2.f32 %v577_v45 }
  0xf5   :  { %670 = vpow2.f32 %v575_v46  ;;  %v634_v47 = vpop.f32.mrb[8].mxu0 }
  0xf6   :  { %v235_v48 = vadd.f32 %v634_v47, %v622_v30  ;;  %v226_v49 = vpop.f32.mrb[9].mxu0 }
  0xf7   :  { %v227_v50 = vadd.f32 %v226_v49, %v138_v31  ;;  %v635_v51 = vpop.f32.mrb[10].mxu0 }
  0xf8   :  { %v253_v52 = vadd.f32 %v573_v34, %v235_v48  ;;  %v229_v53 = vpop.f32.mrb[11].mxu0 }
  0xf9   :  { %v251_v54 = vadd.f32 %v573_v34, %v227_v50  ;;  %v230_v55 = vadd.f32 %v229_v53, %v141_v33 }
  0xfa   :  { %v580_v56 = vmul.f32 -1.442695, %v253_v52 }
  0xfb   :  { %v578_v57 = vmul.f32 -1.442695, %v251_v54  ;;  %v252_v58 = vadd.f32 %v573_v34, %v230_v55 }
  0xfc   :  { %v665_v59 = vpop.eup %664  ;;  %672 = vpow2.f32 %v580_v56 }
  0xfd   :  { %v667_v60 = vpop.eup %666  ;;  %v277_v61 = vadd.f32 1.0, %v665_v59  ;;  %674 = vpow2.f32 %v578_v57  ;;  %v579_v5 = vmul.f32 -1.442695, %v252_v58 }
  0xfe   :  { %v669_v62 = vpop.eup %668  ;;  %v275_v63 = vadd.f32 1.0, %v667_v60 }
  0xff   :  { %v671_v0 = vpop.eup %670  ;;  %676 = vrcp.f32 %v277_v61  ;;  %v278_v1 = vadd.f32 1.0, %v669_v62 }
 0x100   :  { %678 = vrcp.f32 %v275_v63  ;;  %v276_v7 = vadd.f32 1.0, %v671_v0 }
 0x101   :  { %680 = vrcp.f32 %v278_v1 }
 0x102   :  { %682 = vrcp.f32 %v276_v7 }
 0x103   :  { %684 = vpow2.f32 %v579_v5 }
 0x106   :  { %v673_v10 = vpop.eup %672 }
 0x107   :  { %v675_v11 = vpop.eup %674  ;;  %v281_v14 = vadd.f32 1.0, %v673_v10 }
 0x108   :  { %v279_v16 = vadd.f32 1.0, %v675_v11 }
 0x109   :  { %v677_v12 = vpop.eup %676  ;;  %686 = vrcp.f32 %v281_v14 }
 0x10a   :  { %v679_v15 = vpop.eup %678  ;;  %v298_v19 = vmul.f32 %v677_v12, %v249_v36  ;;  %688 = vrcp.f32 %v279_v16 }
 0x10b   :  { %v681_v17 = vpop.eup %680  ;;  %v296_v22 = vmul.f32 %v679_v15, %v247_v38 }
 0x10c   :  { %v683_v18 = vpop.eup %682  ;;  %v299_v20 = vmul.f32 %v681_v17, %v250_v41 }
 0x10d   :  { %v685_v21 = vpop.eup %684  ;;  %v297_v23 = vmul.f32 %v683_v18, %v248_v44 }
 0x10e   :  { %v304_v24 = vpack.c.bf16 %v299_v20, %v298_v19  ;;  %v280_v25 = vadd.f32 1.0, %v685_v21 }
 0x10f   :  { %v303_v26 = vpack.c.bf16 %v297_v23, %v296_v22 }
 0x110   :  { %690 = vrcp.f32 %v280_v25 }
 0x111   :  { %644 = vmatprep.mubr.msk.bf16.mxu1 %vm346_vm1, %v303_v26 }
 0x112   :  { %645 = vmatmul.mubr.msk.bf16.vlgmr.msra.gmra.mrb[0].mxu1 %vm346_vm1, %v304_v24 }
 0x113   :  { %v687_v27 = vpop.eup %686 }
 0x114   :  { %v689_v28 = vpop.eup %688  ;;  %v302_v30 = vmul.f32 %v687_v27, %v253_v52 }
 0x115   :  { %v300_v31 = vmul.f32 %v689_v28, %v251_v54 }
 0x116   :  { %v306_v34 = vpack.c.bf16 %v302_v30, %v302_v30 }
 0x11a   :  { %v691_v29 = vpop.eup %690 }
 0x11b   :  { %v301_v32 = vmul.f32 %v691_v29, %v252_v58 }
 0x11d   :  { %v305_v33 = vpack.c.bf16 %v301_v32, %v300_v31 }
 0x11f   :  { %648 = vmatprep.mubr.msk.bf16.mxu1 %vm346_vm1, %v305_v33 }
 0x120   :  { %649 = vmatmul.mubr.msk.bf16.gmra.mrb[4].mxu1 %vm346_vm1, %v306_v34 }
 0x1e5   :  { %v646_v36 = vpop.f32.mrb[0].mxu1 }
 0x1e6   :  { %v402_v37 = vadd.f32 %v646_v36, %v581_v35  ;;  %v393_v38 = vpop.f32.mrb[1].mxu1 }
 0x1e7   :  { %v394_v39 = vadd.f32 %v581_v35, %v393_v38  ;;  %v647_v40 = vpop.f32.mrb[2].mxu1 }
 0x1e8   :  { %v405_v41 = vadd.f32 %v647_v40, %v581_v35  ;;  %v396_v42 = vpop.f32.mrb[3].mxu1  ;;  %v429_v43 = vsel %vm75_vm0, %v402_v37, 0.0 }
 0x1e9   :  { %v397_v44 = vadd.f32 %v581_v35, %v396_v42  ;;  %430 = vadd.xlane.f32.xlu1 %v429_v43  ;;  %v423_v45 = vsel %vm75_vm0, %v394_v39, 0.0 }
 0x1ea   :  { %424 = vadd.xlane.f32.xlu0 %v423_v45  ;;  %v432_v46 = vsel %vm75_vm0, %v405_v41, 0.0 }
 0x1eb   :  { %v426_v47 = vsel %vm75_vm0, %v397_v44, 0.0 }
 0x1ed   :  { %433 = vadd.xlane.f32.xlu1 %v432_v46 }
 0x1ee   :  { %427 = vadd.xlane.f32.xlu0 %v426_v47 }
 0x1f3   :  { %v650_v48 = vpop.f32.mrb[4].mxu1 }
 0x1f4   :  { %v409_v49 = vpop.f32.mrb[5].mxu1  ;;  %v418_v53 = vadd.f32 %v650_v48, %v581_v35 }
 0x1f5   :  { %v410_v50 = vadd.f32 %v581_v35, %v409_v49  ;;  %v651_v51 = vpop.f32.mrb[6].mxu1  ;;  %v590_v49 = vld [vmem:[%s950_s7] ss:$0 sm:$0xff] }
 0x1f6   :  { %v412_v52 = vpop.f32.mrb[7].mxu1  ;;  %v441_v57 = vsel %vm75_vm0, %v418_v53, 0.0 }
 0x1f7   :  { %v413_v54 = vadd.f32 %v581_v35, %v412_v52  ;;  %v435_v55 = vsel %vm75_vm0, %v410_v50, 0.0 }
 0x1f8   :  { %436 = vadd.xlane.f32.xlu0 %v435_v55 }
 0x1f9   :  { %v438_v56 = vsel %vm75_vm0, %v413_v54, 0.0 }
 0x1fa   :  { %439 = vadd.xlane.f32.xlu1 %v438_v56 }
 0x1fc   :  { %442 = vadd.xlane.f32.xlu0 %v441_v57 }
 0x276   :  { %v431_v58 = vpop.xlane.xlu1 %430 }
 0x277   :  { %v447_v59 = vmul.f32 0.03125, %v431_v58  ;;  %v425_v60 = vpop.xlane.xlu0 %424 }
 0x278   :  { %v445_v61 = vmul.f32 0.03125, %v425_v60 }
 0x279   :  { %v454_v62 = vsub.f32 %v402_v37, %v447_v59 }
 0x27a   :  { %v865_v63 = vsub.f32 %v394_v39, %v445_v61  ;;  %v434_v0 = vpop.xlane.xlu1 %433 }
 0x27b   :  { %v448_v1 = vmul.f32 0.03125, %v434_v0  ;;  %v428_v5 = vpop.xlane.xlu0 %427  ;;  %v461_v7 = vmul.f32 %v454_v62, %v454_v62 }
 0x27c   :  { %v446_v10 = vmul.f32 0.03125, %v428_v5  ;;  %v459_v14 = vmul.f32 %v865_v63, %v865_v63 }
 0x27d   :  { %v867_v11 = vsub.f32 %v405_v41, %v448_v1  ;;  %v472_v12 = vsel %vm75_vm0, %v461_v7, 0.0 }
 0x27e   :  { %v872_v15 = vsub.f32 %v397_v44, %v446_v10  ;;  %473 = vadd.xlane.f32.xlu1 %v472_v12  ;;  %v466_v17 = vsel %vm75_vm0, %v459_v14, 0.0 }
 0x27f   :  { %v462_v16 = vmul.f32 %v867_v11, %v867_v11 }
 0x280   :  { %v460_v19 = vmul.f32 %v872_v15, %v872_v15 }
 0x281   :  { %v475_v18 = vsel %vm75_vm0, %v462_v16, 0.0 }
 0x282   :  { %467 = vadd.xlane.f32.xlu1 %v466_v17  ;;  %476 = vadd.xlane.f32.xlu0 %v475_v18  ;;  %v469_v21 = vsel %vm75_vm0, %v460_v19, 0.0 }
 0x285   :  { %v437_v20 = vpop.xlane.xlu0 %436 }
 0x286   :  { %v449_v22 = vmul.f32 0.03125, %v437_v20  ;;  %470 = vadd.xlane.f32.xlu0 %v469_v21 }
 0x287   :  { %v440_v23 = vpop.xlane.xlu1 %439 }
 0x288   :  { %v881_v24 = vsub.f32 %v410_v50, %v449_v22  ;;  %v450_v25 = vmul.f32 0.03125, %v440_v23 }
 0x289   :  { %v443_v26 = vpop.xlane.xlu0 %442 }
 0x28a   :  { %v883_v27 = vsub.f32 %v413_v54, %v450_v25  ;;  %v451_v28 = vmul.f32 0.03125, %v443_v26  ;;  %v463_v29 = vmul.f32 %v881_v24, %v881_v24 }
 0x28c   :  { %v887_v30 = vsub.f32 %v418_v53, %v451_v28  ;;  %v478_v31 = vsel %vm75_vm0, %v463_v29, 0.0  ;;  %v464_v32 = vmul.f32 %v883_v27, %v883_v27  ;;  %v591_v53 = vld [vmem:[%s951_s8] ss:$0 sm:$0xff] }
 0x28d   :  { %479 = vadd.xlane.f32.xlu1 %v478_v31 }
 0x28e   :  { %v481_v33 = vsel %vm75_vm0, %v464_v32, 0.0  ;;  %v465_v34 = vmul.f32 %v887_v30, %v887_v30 }
 0x28f   :  { %482 = vadd.xlane.f32.xlu0 %v481_v33 }
 0x290   :  { %v484_v35 = vsel %vm75_vm0, %v465_v34, 0.0 }
 0x291   :  { %485 = vadd.xlane.f32.xlu1 %v484_v35 }
 0x30b   :  { %v474_v36 = vpop.xlane.xlu1 %473 }
 0x30c   :  { %v489_v37 = vmul.f32 0.03125, %v474_v36 }
 0x30e   :  { %v496_v38 = vadd.f32 1e-05, %v489_v37 }
 0x30f   :  { %v468_v39 = vpop.xlane.xlu1 %467  ;;  %v477_v40 = vpop.xlane.xlu0 %476 }
 0x310   :  { %692 = vrsqrt.f32 %v496_v38  ;;  %v487_v41 = vmul.f32 0.03125, %v468_v39  ;;  %v490_v42 = vmul.f32 0.03125, %v477_v40 }
 0x312   :  { %v494_v43 = vadd.f32 1e-05, %v487_v41  ;;  %v497_v44 = vadd.f32 1e-05, %v490_v42 }
 0x313   :  { %v471_v45 = vpop.xlane.xlu0 %470 }
 0x314   :  { %694 = vrsqrt.f32 %v494_v43  ;;  %v488_v46 = vmul.f32 0.03125, %v471_v45 }
 0x315   :  { %696 = vrsqrt.f32 %v497_v44 }
 0x316   :  { %v495_v47 = vadd.f32 1e-05, %v488_v46 }
 0x318   :  { %698 = vrsqrt.f32 %v495_v47 }
 0x31a   :  { %v693_v48 = vpop.eup %692  ;;  %v480_v50 = vpop.xlane.xlu1 %479 }
 0x31b   :  { %v510_v51 = vmul.f32 %v693_v48, %v454_v62  ;;  %v491_v52 = vmul.f32 0.03125, %v480_v50 }
 0x31c   :  { %v483_v54 = vpop.xlane.xlu0 %482 }
 0x31d   :  { %v524_v55 = vmul.f32 %v590_v49, %v510_v51  ;;  %v498_v56 = vadd.f32 1e-05, %v491_v52  ;;  %v492_v57 = vmul.f32 0.03125, %v483_v54 }
 0x31e   :  { %v695_v58 = vpop.eup %694  ;;  %v486_v59 = vpop.xlane.xlu1 %485 }
 0x31f   :  { %v697_v60 = vpop.eup %696  ;;  %v538_v61 = vadd.f32 %v591_v53, %v524_v55  ;;  %v508_v0 = vmul.f32 %v695_v58, %v865_v63  ;;  %700 = vrsqrt.f32 %v498_v56  ;;  %v499_v1 = vadd.f32 1e-05, %v492_v57 }
 0x320   :  { %v511_v5 = vmul.f32 %v697_v60, %v867_v11  ;;  %v493_v62 = vmul.f32 0.03125, %v486_v59 }
 0x321   :  { %v545_v7 = vadd.f32 %v538_v61, %v775_v4  ;;  %v522_v10 = vmul.f32 %v590_v49, %v508_v0  ;;  %702 = vrsqrt.f32 %v499_v1 }
 0x322   :  { %v699_v12 = vpop.eup %698  ;;  %v525_v14 = vmul.f32 %v590_v49, %v511_v5  ;;  %v500_v16 = vadd.f32 1e-05, %v493_v62 }
 0x323   :  { %552 = vst.msk [vmem:[%s952_s9 + $0x10] sm:$0xff] %vm75_vm0, %v545_v7  ;;  %v536_v17 = vadd.f32 %v591_v53, %v522_v10  ;;  %v509_v63 = vmul.f32 %v699_v12, %v872_v15 }
 0x324   :  { %v539_v18 = vadd.f32 %v591_v53, %v525_v14  ;;  %704 = vrsqrt.f32 %v500_v16 }
 0x325   :  { %v543_v11 = vadd.f32 %v536_v17, %v765_v2  ;;  %v523_v19 = vmul.f32 %v590_v49, %v509_v63 }
 0x326   :  { %v546_v4 = vadd.f32 %v539_v18, %v782_v6 }
 0x327   :  { %550 = vst.msk [vmem:[%s952_s9] sm:$0xff] %vm75_vm0, %v543_v11  ;;  %v537_v20 = vadd.f32 %v591_v53, %v523_v19 }
 0x328   :  { %553 = vst.msk [vmem:[%s952_s9 + $0x18] sm:$0xff] %vm75_vm0, %v546_v4 }
 0x329   :  { %v701_v21 = vpop.eup %700  ;;  %v544_v15 = vadd.f32 %v537_v20, %v770_v3 }
 0x32a   :  { %v512_v22 = vmul.f32 %v701_v21, %v881_v24 }
 0x32b   :  { %v703_v2 = vpop.eup %702  ;;  %551 = vst.msk [vmem:[%s952_s9 + $0x8] sm:$0xff] %vm75_vm0, %v544_v15 }
 0x32c   :  { %v526_v6 = vmul.f32 %v590_v49, %v512_v22  ;;  %v513_v23 = vmul.f32 %v703_v2, %v883_v27 }
 0x32e   :  { %v705_v25 = vpop.eup %704  ;;  %v540_v26 = vadd.f32 %v591_v53, %v526_v6  ;;  %v527_v28 = vmul.f32 %v590_v49, %v513_v23 }
 0x32f   :  { %v514_v29 = vmul.f32 %v705_v25, %v887_v30 }
 0x330   :  { %v547_v31 = vadd.f32 %v540_v26, %v790_v8  ;;  %v541_v32 = vadd.f32 %v591_v53, %v527_v28 }
 0x331   :  { %v528_v3 = vmul.f32 %v590_v49, %v514_v29 }
 0x332   :  { %554 = vst.msk [vmem:[%s952_s9 + $0x20] sm:$0xff] %vm75_vm0, %v547_v31  ;;  %v548_v24 = vadd.f32 %v541_v32, %v795_v9 }
 0x333   :  { %v542_v33 = vadd.f32 %v591_v53, %v528_v3 }
 0x334   :  { %555 = vst.msk [vmem:[%s952_s9 + $0x28] sm:$0xff] %vm75_vm0, %v548_v24 }
 0x335   :  { %v549_v27 = vadd.f32 %v542_v33, %v810_v13 }
 0x337   :  { %556 = vst.msk [vmem:[%s952_s9 + $0x30] sm:$0xff] %vm75_vm0, %v549_v27 }

// kernel: mesh_processor_block_forward.2
= control target key start
LH: loop header
LB: loop body
LE: loop exit
PB: predicated region body
PF: predicated region fallthrough
CT: control target
= control target key end

     0   :  { %v3116_v0 = vmov 0.0   ;;  %vm3117_vm0 = vmmov 0   ;;  %vm173_vm1 = vcmask 261120   ;;  %vm1392_vm2 = vcmask 523264   ;;  %s4890_s4 = inlined_call_operand.vmem [shape: bf16[32,64], index: 4, kind: input, shape index: {}]   ;;  %s4891_s3 = inlined_call_operand.vmem [shape: bf16[32,64], index: 3, kind: input, shape index: {}]   ;;  %s4892_s1 = inlined_call_operand.vmem [shape: f32[304,32], index: 1, kind: input, shape index: {}]   ;;  %s4893_s0 = inlined_call_operand.vmem [shape: f32[304,32], index: 0, kind: input, shape index: {}]   ;;  %s4894_s5 = inlined_call_operand.vmem [shape: bf16[32,64], index: 5, kind: input, shape index: {}]   ;;  %s4895_s7 = inlined_call_operand.vmem [shape: bf16[64,32], index: 7, kind: input, shape index: {}]   ;;  %s4896_s2 = inlined_call_operand.vmem [shape: f32[304,32], index: 2, kind: input, shape index: {}]   ;;  %s4897_s6 = inlined_call_operand.vmem [shape: f32[1,64], index: 6, kind: input, shape index: {}]   ;;  %s4898_s8 = inlined_call_operand.vmem [shape: f32[1,32], index: 8, kind: input, shape index: {}]   ;;  %s4899_s9 = inlined_call_operand.vmem [shape: f32[1,32], index: 9, kind: input, shape index: {}]   ;;  %s4900_s10 = inlined_call_operand.vmem [shape: f32[1,32], index: 10, kind: input, shape index: {}]   ;;  %s4901_s11 = inlined_call_operand.vmem [shape: f32[304,32], index: 11, kind: output, shape index: {}]  }
   0x1   :  { %2514 = vmatprep.subr.bf16.mxu0 %v3116_v0  ;;  %2594 = vmatprep.subr.bf16.mxu1 %v3116_v0  ;;  %v2840_v1 = vld [vmem:[%s4890_s4] sm:$0xff]   ;;  %v2842_v3 = vld [vmem:[%s4890_s4 + $0x8] sm:$0xff]   ;;  %v102_v12 = vld [vmem:[%s4892_s1 + $0x10] sm:$0xff] }
   0x2   :  { %v2841_v2 = vld [vmem:[%s4891_s3] sm:$0xff]   ;;  %2518 = vmatprep.mubr.msk.bf16.mxu0 %vm3117_vm0, %v3116_v0  ;;  %2598 = vmatprep.mubr.msk.bf16.mxu1 %vm3117_vm0, %v3116_v0  ;;  %v2843_v4 = vld [vmem:[%s4891_s3 + $0x8] sm:$0xff]   ;;  %v103_v13 = vld [vmem:[%s4892_s1 + $0x18] sm:$0xff] }
   0x3   :  { %2515 = vmatpush3.bf16.msra.mxu0 %v2840_v1  ;;  %2595 = vmatpush3.bf16.msra.mxu1 %v2841_v2  ;;  %v100_v5 = vld [vmem:[%s4892_s1] sm:$0xff]  ;;  %v101_v6 = vld [vmem:[%s4892_s1 + $0x8] sm:$0xff]  ;;  %v41_v14 = vld [vmem:[%s4893_s0 + $0x10] sm:$0xff]  ;;  %v139_v16 = vpack.c.bf16 %v103_v13, %v102_v12 }
   0x4   :  { %2516 = vmatprep.subr.bf16.mxu0 %v3116_v0  ;;  %2596 = vmatprep.subr.bf16.mxu1 %v3116_v0  ;;  %v39_v7 = vld [vmem:[%s4893_s0] sm:$0xff]  ;;  %v138_v8 = vpack.c.bf16 %v101_v6, %v100_v5  ;;  %v40_v9 = vld [vmem:[%s4893_s0 + $0x8] sm:$0xff]  ;;  %v42_v15 = vld [vmem:[%s4893_s0 + $0x18] sm:$0xff] }
   0x5   :  { %v77_v10 = vpack.c.bf16 %v40_v9, %v39_v7  ;;  %v2844_v11 = vld [vmem:[%s4894_s5] sm:$0xff]   ;;  %v78_v17 = vpack.c.bf16 %v42_v15, %v41_v14  ;;  %v105_v19 = vld [vmem:[%s4892_s1 + $0x28] sm:$0xff]  ;;  %v106_v25 = vld [vmem:[%s4892_s1 + $0x30] sm:$0xff] }
   0x6   :  { %v104_v18 = vld [vmem:[%s4892_s1 + $0x20] sm:$0xff]  ;;  %v44_v21 = vld [vmem:[%s4893_s0 + $0x28] sm:$0xff]  ;;  %v107_v26 = vld [vmem:[%s4892_s1 + $0x38] sm:$0xff] }
   0x7   :  { %2517 = vmatpush3.bf16.msra.mxu0 %v2842_v3  ;;  %2597 = vmatpush3.bf16.msra.mxu1 %v2843_v4  ;;  %v43_v20 = vld [vmem:[%s4893_s0 + $0x20] sm:$0xff]  ;;  %v2845_v22 = vld [vmem:[%s4894_s5 + $0x8] sm:$0xff]   ;;  %v140_v23 = vpack.c.bf16 %v105_v19, %v104_v18  ;;  %v45_v27 = vld [vmem:[%s4893_s0 + $0x30] sm:$0xff]  ;;  %v141_v29 = vpack.c.bf16 %v107_v26, %v106_v25 }
   0x8   :  { %2674 = vmatprep.subr.bf16.mxu0 %v3116_v0  ;;  %2754 = vmatprep.subr.bf16.mxu1 %v3116_v0  ;;  %v79_v24 = vpack.c.bf16 %v44_v21, %v43_v20  ;;  %v46_v28 = vld [vmem:[%s4893_s0 + $0x38] sm:$0xff]  ;;  %v108_v31 = vld [vmem:[%s4892_s1 + $0x40] sm:$0xff]  ;;  %v109_v32 = vld [vmem:[%s4892_s1 + $0x48] sm:$0xff] }
   0x9   :  { %v80_v30 = vpack.c.bf16 %v46_v28, %v45_v27  ;;  %v47_v33 = vld [vmem:[%s4893_s0 + $0x40] sm:$0xff]  ;;  %v48_v34 = vld [vmem:[%s4893_s0 + $0x48] sm:$0xff]  ;;  %v142_v35 = vpack.c.bf16 %v109_v32, %v108_v31  ;;  %v110_v37 = vld [vmem:[%s4892_s1 + $0x50] sm:$0xff] }
   0xa   :  { %2519 = vmatmul.mubr.msk.bf16.vlgmr.msra.gmra.mrb[0].mxu0 %vm173_vm1, %v138_v8  ;;  %2599 = vmatmul.mubr.msk.bf16.vlgmr.msra.gmra.mrb[0].mxu1 %vm173_vm1, %v77_v10  ;;  %v81_v36 = vpack.c.bf16 %v48_v34, %v47_v33  ;;  %v111_v38 = vld [vmem:[%s4892_s1 + $0x58] sm:$0xff]  ;;  %v49_v39 = vld [vmem:[%s4893_s0 + $0x50] sm:$0xff]  ;;  %v112_v43 = vld [vmem:[%s4892_s1 + $0x60] sm:$0xff] }
   0xb   :  { %2675 = vmatpush3.bf16.msra.mxu0 %v2844_v11  ;;  %2522 = vmatprep.mubr.msk.bf16.mxu0 %vm3117_vm0, %v3116_v0  ;;  %v50_v40 = vld [vmem:[%s4893_s0 + $0x58] sm:$0xff]  ;;  %v143_v41 = vpack.c.bf16 %v111_v38, %v110_v37  ;;  %v113_v44 = vld [vmem:[%s4892_s1 + $0x68] sm:$0xff]  ;;  %v51_v45 = vld [vmem:[%s4893_s0 + $0x60] sm:$0xff] }
   0xc   :  { %2602 = vmatprep.mubr.msk.bf16.mxu1 %vm3117_vm0, %v3116_v0  ;;  %2676 = vmatprep.subr.bf16.mxu0 %v3116_v0  ;;  %v82_v42 = vpack.c.bf16 %v50_v40, %v49_v39  ;;  %v52_v46 = vld [vmem:[%s4893_s0 + $0x68] sm:$0xff]  ;;  %v144_v47 = vpack.c.bf16 %v113_v44, %v112_v43  ;;  %v114_v49 = vld [vmem:[%s4892_s1 + $0x70] sm:$0xff]  ;;  %v115_v50 = vld [vmem:[%s4892_s1 + $0x78] sm:$0xff] }
   0xd   :  { %v83_v48 = vpack.c.bf16 %v52_v46, %v51_v45  ;;  %v53_v51 = vld [vmem:[%s4893_s0 + $0x70] sm:$0xff]  ;;  %v54_v52 = vld [vmem:[%s4893_s0 + $0x78] sm:$0xff]  ;;  %v145_v53 = vpack.c.bf16 %v115_v50, %v114_v49  ;;  %v116_v55 = vld [vmem:[%s4892_s1 + $0x80] sm:$0xff] }
   0xe   :  { %v84_v54 = vpack.c.bf16 %v54_v52, %v53_v51  ;;  %v117_v56 = vld [vmem:[%s4892_s1 + $0x88] sm:$0xff]  ;;  %v55_v57 = vld [vmem:[%s4893_s0 + $0x80] sm:$0xff]  ;;  %v118_v61 = vld [vmem:[%s4892_s1 + $0x90] sm:$0xff] }
   0xf   :  { %2677 = vmatpush3.bf16.msra.mxu0 %v2845_v22  ;;  %v56_v58 = vld [vmem:[%s4893_s0 + $0x88] sm:$0xff]  ;;  %v146_v59 = vpack.c.bf16 %v117_v56, %v116_v55  ;;  %v119_v62 = vld [vmem:[%s4892_s1 + $0x98] sm:$0xff]  ;;  %v57_v63 = vld [vmem:[%s4893_s0 + $0x90] sm:$0xff] }
  0x10   :  { %v85_v60 = vpack.c.bf16 %v56_v58, %v55_v57  ;;  %v58_v1 = vld [vmem:[%s4893_s0 + $0x98] sm:$0xff]  ;;  %v147_v2 = vpack.c.bf16 %v119_v62, %v118_v61  ;;  %v120_v4 = vld [vmem:[%s4892_s1 + $0xa0] sm:$0xff]  ;;  %v121_v5 = vld [vmem:[%s4892_s1 + $0xa8] sm:$0xff] }
  0x11   :  { %v86_v3 = vpack.c.bf16 %v58_v1, %v57_v63  ;;  %v59_v6 = vld [vmem:[%s4893_s0 + $0xa0] sm:$0xff]  ;;  %v60_v7 = vld [vmem:[%s4893_s0 + $0xa8] sm:$0xff]  ;;  %v148_v8 = vpack.c.bf16 %v121_v5, %v120_v4  ;;  %v122_v10 = vld [vmem:[%s4892_s1 + $0xb0] sm:$0xff] }
  0x12   :  { %2523 = vmatmul.mubr.msk.bf16.gmra.mrb[4].mxu0 %vm173_vm1, %v139_v16  ;;  %2603 = vmatmul.mubr.msk.bf16.gmra.mrb[4].mxu1 %vm173_vm1, %v78_v17  ;;  %v87_v9 = vpack.c.bf16 %v60_v7, %v59_v6  ;;  %v123_v11 = vld [vmem:[%s4892_s1 + $0xb8] sm:$0xff]  ;;  %v61_v12 = vld [vmem:[%s4893_s0 + $0xb0] sm:$0xff]  ;;  %v124_v16 = vld [vmem:[%s4892_s1 + $0xc0] sm:$0xff] }
  0x13   :  { %2526 = vmatprep.mubr.msk.bf16.mxu0 %vm3117_vm0, %v3116_v0  ;;  %2606 = vmatprep.mubr.msk.bf16.mxu1 %vm3117_vm0, %v3116_v0  ;;  %v62_v13 = vld [vmem:[%s4893_s0 + $0xb8] sm:$0xff]  ;;  %v149_v14 = vpack.c.bf16 %v123_v11, %v122_v10  ;;  %v125_v17 = vld [vmem:[%s4892_s1 + $0xc8] sm:$0xff]  ;;  %v63_v18 = vld [vmem:[%s4893_s0 + $0xc0] sm:$0xff] }
  0x14   :  { %v88_v15 = vpack.c.bf16 %v62_v13, %v61_v12  ;;  %v64_v19 = vld [vmem:[%s4893_s0 + $0xc8] sm:$0xff]  ;;  %v150_v20 = vpack.c.bf16 %v125_v17, %v124_v16  ;;  %v126_v22 = vld [vmem:[%s4892_s1 + $0xd0] sm:$0xff]  ;;  %v66_v25 = vld [vmem:[%s4893_s0 + $0xd8] sm:$0xff] }
  0x15   :  { %v89_v21 = vpack.c.bf16 %v64_v19, %v63_v18  ;;  %v128_v28 = vld [vmem:[%s4892_s1 + $0xe0] sm:$0xff]  ;;  %v68_v31 = vld [vmem:[%s4893_s0 + $0xe8] sm:$0xff]  ;;  %v130_v34 = vld [vmem:[%s4892_s1 + $0xf0] sm:$0xff] }
  0x16   :  { %v70_v37 = vld [vmem:[%s4893_s0 + $0xf8] sm:$0xff]  ;;  %v132_v40 = vld [vmem:[%s4892_s1 + $0x100] sm:$0xff]  ;;  %v72_v43 = vld [vmem:[%s4893_s0 + $0x108] sm:$0xff] }
  0x17   :  { %v2846_v44 = vld [vmem:[%s4895_s7] sm:$0xff]   ;;  %v73_v49 = vld [vmem:[%s4893_s0 + $0x110] sm:$0xff]  ;;  %v74_v50 = vld [vmem:[%s4893_s0 + $0x118] sm:$0xff] }
  0x18   :  { %2755 = vmatpush3.bf16.msra.mxu1 %v2846_v44  ;;  %v94_v52 = vpack.c.bf16 %v74_v50, %v73_v49  ;;  %v75_v55 = vld [vmem:[%s4893_s0 + $0x120] sm:$0xff]  ;;  %v76_v56 = vld [vmem:[%s4893_s0 + $0x128] sm:$0xff]  ;;  %v672_v62 = vld [vmem:[%s4896_s2 + $0x10] sm:$0xff] }
  0x19   :  { %2756 = vmatprep.subr.bf16.mxu1 %v3116_v0  ;;  %v95_v58 = vpack.c.bf16 %v76_v56, %v75_v55  ;;  %v673_v63 = vld [vmem:[%s4896_s2 + $0x18] sm:$0xff]  ;;  %v675_v4 = vld [vmem:[%s4896_s2 + $0x28] sm:$0xff]  ;;  %v676_v6 = vld [vmem:[%s4896_s2 + $0x30] sm:$0xff] }
  0x1a   :  { %2527 = vmatmul.mubr.msk.bf16.gmra.mrb[8].mxu0 %vm173_vm1, %v140_v23  ;;  %2607 = vmatmul.mubr.msk.bf16.gmra.mrb[8].mxu1 %vm173_vm1, %v79_v24  ;;  %v127_v23 = vld [vmem:[%s4892_s1 + $0xd8] sm:$0xff]  ;;  %v65_v24 = vld [vmem:[%s4893_s0 + $0xd0] sm:$0xff]  ;;  %v709_v1 = vpack.c.bf16 %v673_v63, %v672_v62  ;;  %v679_v10 = vld [vmem:[%s4896_s2 + $0x48] sm:$0xff] }
  0x1b   :  { %2530 = vmatprep.mubr.msk.bf16.mxu0 %vm3117_vm0, %v3116_v0  ;;  %2610 = vmatprep.mubr.msk.bf16.mxu1 %vm3117_vm0, %v3116_v0  ;;  %v151_v26 = vpack.c.bf16 %v127_v23, %v126_v22  ;;  %v90_v27 = vpack.c.bf16 %v66_v25, %v65_v24  ;;  %v677_v7 = vld [vmem:[%s4896_s2 + $0x38] sm:$0xff]  ;;  %v680_v12 = vld [vmem:[%s4896_s2 + $0x50] sm:$0xff]  ;;  %v683_v16 = vld [vmem:[%s4896_s2 + $0x68] sm:$0xff] }
  0x1c   :  { %v681_v13 = vld [vmem:[%s4896_s2 + $0x58] sm:$0xff]  ;;  %v2848_v18 = vld [vmem:[%s4895_s7 + $0x10] sm:$0xff]   ;;  %v686_v22 = vld [vmem:[%s4896_s2 + $0x80] sm:$0xff] }
  0x1d   :  { %v684_v19 = vld [vmem:[%s4896_s2 + $0x70] sm:$0xff]  ;;  %v687_v23 = vld [vmem:[%s4896_s2 + $0x88] sm:$0xff]  ;;  %v693_v62 = vld [vmem:[%s4896_s2 + $0xb8] sm:$0xff] }
  0x1e   :  { %v691_v49 = vld [vmem:[%s4896_s2 + $0xa8] sm:$0xff] }
  0x22   :  { %2531 = vmatmul.mubr.msk.bf16.gmra.mrb[12].mxu0 %vm173_vm1, %v141_v29  ;;  %2611 = vmatmul.mubr.msk.bf16.gmra.mrb[12].mxu1 %vm173_vm1, %v80_v30  ;;  %v129_v29 = vld [vmem:[%s4892_s1 + $0xe8] sm:$0xff]  ;;  %v67_v30 = vld [vmem:[%s4893_s0 + $0xe0] sm:$0xff] }
  0x23   :  { %2534 = vmatprep.mubr.msk.bf16.mxu0 %vm3117_vm0, %v3116_v0  ;;  %2614 = vmatprep.mubr.msk.bf16.mxu1 %vm3117_vm0, %v3116_v0  ;;  %v152_v32 = vpack.c.bf16 %v129_v29, %v128_v28  ;;  %v91_v33 = vpack.c.bf16 %v68_v31, %v67_v30 }
  0x2a   :  { %2535 = vmatmul.mubr.msk.bf16.gmra.mrb[16].mxu0 %vm173_vm1, %v142_v35  ;;  %2615 = vmatmul.mubr.msk.bf16.gmra.mrb[16].mxu1 %vm173_vm1, %v81_v36  ;;  %v131_v35 = vld [vmem:[%s4892_s1 + $0xf8] sm:$0xff]  ;;  %v69_v36 = vld [vmem:[%s4893_s0 + $0xf0] sm:$0xff] }
  0x2b   :  { %2538 = vmatprep.mubr.msk.bf16.mxu0 %vm3117_vm0, %v3116_v0  ;;  %2618 = vmatprep.mubr.msk.bf16.mxu1 %vm3117_vm0, %v3116_v0  ;;  %v153_v38 = vpack.c.bf16 %v131_v35, %v130_v34  ;;  %v92_v39 = vpack.c.bf16 %v70_v37, %v69_v36  ;;  %v688_v35 = vld [vmem:[%s4896_s2 + $0x90] sm:$0xff]  ;;  %v689_v36 = vld [vmem:[%s4896_s2 + $0x98] sm:$0xff] }
  0x32   :  { %2539 = vmatmul.mubr.msk.bf16.gmra.mrb[20].mxu0 %vm173_vm1, %v143_v41  ;;  %2619 = vmatmul.mubr.msk.bf16.gmra.mrb[20].mxu1 %vm173_vm1, %v82_v42  ;;  %v133_v41 = vld [vmem:[%s4892_s1 + $0x108] sm:$0xff]  ;;  %v71_v42 = vld [vmem:[%s4893_s0 + $0x100] sm:$0xff] }
  0x33   :  { %2542 = vmatprep.mubr.msk.bf16.mxu0 %vm3117_vm0, %v3116_v0  ;;  %2622 = vmatprep.mubr.msk.bf16.mxu1 %vm3117_vm0, %v3116_v0  ;;  %v154_v45 = vpack.c.bf16 %v133_v41, %v132_v40  ;;  %v93_v46 = vpack.c.bf16 %v72_v43, %v71_v42  ;;  %v717_v40 = vpack.c.bf16 %v689_v36, %v688_v35 }
  0x3a   :  { %2543 = vmatmul.mubr.msk.bf16.gmra.mrb[24].mxu0 %vm173_vm1, %v144_v47  ;;  %2623 = vmatmul.mubr.msk.bf16.gmra.mrb[24].mxu1 %vm173_vm1, %v83_v48  ;;  %v134_v47 = vld [vmem:[%s4892_s1 + $0x110] sm:$0xff]  ;;  %v135_v48 = vld [vmem:[%s4892_s1 + $0x118] sm:$0xff] }
  0x3b   :  { %2546 = vmatprep.mubr.msk.bf16.mxu0 %vm3117_vm0, %v3116_v0  ;;  %2626 = vmatprep.mubr.msk.bf16.mxu1 %vm3117_vm0, %v3116_v0  ;;  %v155_v51 = vpack.c.bf16 %v135_v48, %v134_v47  ;;  %v690_v48 = vld [vmem:[%s4896_s2 + $0xa0] sm:$0xff] }
  0x42   :  { %2547 = vmatmul.mubr.msk.bf16.gmra.mrb[28].mxu0 %vm173_vm1, %v145_v53  ;;  %2627 = vmatmul.mubr.msk.bf16.gmra.mrb[28].mxu1 %vm173_vm1, %v84_v54  ;;  %v136_v53 = vld [vmem:[%s4892_s1 + $0x120] sm:$0xff]  ;;  %v137_v54 = vld [vmem:[%s4892_s1 + $0x128] sm:$0xff] }
  0x43   :  { %2550 = vmatprep.mubr.msk.bf16.mxu0 %vm3117_vm0, %v3116_v0  ;;  %2630 = vmatprep.mubr.msk.bf16.mxu1 %vm3117_vm0, %v3116_v0  ;;  %v156_v57 = vpack.c.bf16 %v137_v54, %v136_v53  ;;  %v718_v53 = vpack.c.bf16 %v691_v49, %v690_v48 }
  0x4a   :  { %2551 = vmatmul.mubr.msk.bf16.gmra.mrb[32].mxu0 %vm173_vm1, %v146_v59  ;;  %2631 = vmatmul.mubr.msk.bf16.gmra.mrb[32].mxu1 %vm173_vm1, %v85_v60  ;;  %v670_v59 = vld [vmem:[%s4896_s2] sm:$0xff]  ;;  %v671_v60 = vld [vmem:[%s4896_s2 + $0x8] sm:$0xff] }
  0x4b   :  { %2554 = vmatprep.mubr.msk.bf16.mxu0 %vm3117_vm0, %v3116_v0  ;;  %2634 = vmatprep.mubr.msk.bf16.mxu1 %vm3117_vm0, %v3116_v0  ;;  %v708_v61 = vpack.c.bf16 %v671_v60, %v670_v59 }
  0x52   :  { %2555 = vmatmul.mubr.msk.bf16.gmra.mrb[36].mxu0 %vm173_vm1, %v147_v2  ;;  %2635 = vmatmul.mubr.msk.bf16.gmra.mrb[36].mxu1 %vm173_vm1, %v86_v3  ;;  %v2847_v2 = vld [vmem:[%s4895_s7 + $0x8] sm:$0xff]   ;;  %v674_v3 = vld [vmem:[%s4896_s2 + $0x20] sm:$0xff] }
  0x53   :  { %2558 = vmatprep.mubr.msk.bf16.mxu0 %vm3117_vm0, %v3116_v0  ;;  %2638 = vmatprep.mubr.msk.bf16.mxu1 %vm3117_vm0, %v3116_v0  ;;  %v710_v5 = vpack.c.bf16 %v675_v4, %v674_v3 }
  0x54   :  { %2757 = vmatpush3.bf16.msra.mxu1 %v2847_v2 }
  0x55   :  { %2758 = vmatprep.subr.bf16.mxu1 %v3116_v0 }
  0x58   :  { %2759 = vmatpush3.bf16.msra.mxu1 %v2848_v18 }
  0x59   :  { %2760 = vmatprep.subr.bf16.mxu1 %v3116_v0 }
  0x5a   :  { %2559 = vmatmul.mubr.msk.bf16.gmra.mrb[40].mxu0 %vm173_vm1, %v148_v8  ;;  %2639 = vmatmul.mubr.msk.bf16.gmra.mrb[40].mxu1 %vm173_vm1, %v87_v9  ;;  %v711_v8 = vpack.c.bf16 %v677_v7, %v676_v6  ;;  %v678_v9 = vld [vmem:[%s4896_s2 + $0x40] sm:$0xff] }
  0x5b   :  { %2562 = vmatprep.mubr.msk.bf16.mxu0 %vm3117_vm0, %v3116_v0  ;;  %2642 = vmatprep.mubr.msk.bf16.mxu1 %vm3117_vm0, %v3116_v0  ;;  %v712_v11 = vpack.c.bf16 %v679_v10, %v678_v9 }
  0x62   :  { %2563 = vmatmul.mubr.msk.bf16.gmra.mrb[44].mxu0 %vm173_vm1, %v149_v14  ;;  %2643 = vmatmul.mubr.msk.bf16.gmra.mrb[44].mxu1 %vm173_vm1, %v88_v15  ;;  %v713_v14 = vpack.c.bf16 %v681_v13, %v680_v12  ;;  %v682_v15 = vld [vmem:[%s4896_s2 + $0x60] sm:$0xff]  ;;  %v695_v12 = vld [vmem:[%s4896_s2 + $0xc8] sm:$0xff] }
  0x63   :  { %2566 = vmatprep.mubr.msk.bf16.mxu0 %vm3117_vm0, %v3116_v0  ;;  %2646 = vmatprep.mubr.msk.bf16.mxu1 %vm3117_vm0, %v3116_v0  ;;  %v714_v17 = vpack.c.bf16 %v683_v16, %v682_v15 }
  0x6a   :  { %2567 = vmatmul.mubr.msk.bf16.gmra.mrb[48].mxu0 %vm173_vm1, %v150_v20  ;;  %2647 = vmatmul.mubr.msk.bf16.gmra.mrb[48].mxu1 %vm173_vm1, %v89_v21  ;;  %v685_v20 = vld [vmem:[%s4896_s2 + $0x78] sm:$0xff] }
  0x6b   :  { %2570 = vmatprep.mubr.msk.bf16.mxu0 %vm3117_vm0, %v3116_v0  ;;  %2650 = vmatprep.mubr.msk.bf16.mxu1 %vm3117_vm0, %v3116_v0  ;;  %v715_v21 = vpack.c.bf16 %v685_v20, %v684_v19 }
  0x72   :  { %2571 = vmatmul.mubr.msk.bf16.gmra.mrb[52].mxu0 %vm173_vm1, %v151_v26  ;;  %2651 = vmatmul.mubr.msk.bf16.gmra.mrb[52].mxu1 %vm173_vm1, %v90_v27  ;;  %v716_v27 = vpack.c.bf16 %v687_v23, %v686_v22 }
  0x73   :  { %2574 = vmatprep.mubr.msk.bf16.mxu0 %vm3117_vm0, %v3116_v0  ;;  %2654 = vmatprep.mubr.msk.bf16.mxu1 %vm3117_vm0, %v3116_v0 }
  0x7a   :  { %2575 = vmatmul.mubr.msk.bf16.gmra.mrb[56].mxu0 %vm173_vm1, %v152_v32  ;;  %2655 = vmatmul.mubr.msk.bf16.gmra.mrb[56].mxu1 %vm173_vm1, %v91_v33 }
  0x7b   :  { %2578 = vmatprep.mubr.msk.bf16.mxu0 %vm3117_vm0, %v3116_v0  ;;  %2658 = vmatprep.mubr.msk.bf16.mxu1 %vm3117_vm0, %v3116_v0 }
  0x82   :  { %2579 = vmatmul.mubr.msk.bf16.gmra.mrb[60].mxu0 %vm173_vm1, %v153_v38  ;;  %2659 = vmatmul.mubr.msk.bf16.gmra.mrb[60].mxu1 %vm173_vm1, %v92_v39 }
  0x83   :  { %2582 = vmatprep.mubr.msk.bf16.mxu0 %vm3117_vm0, %v3116_v0  ;;  %2662 = vmatprep.mubr.msk.bf16.mxu1 %vm3117_vm0, %v3116_v0 }
  0x8a   :  { %2583 = vmatmul.mubr.msk.bf16.gmra.mrb[64].mxu0 %vm173_vm1, %v154_v45  ;;  %2663 = vmatmul.mubr.msk.bf16.gmra.mrb[64].mxu1 %vm173_vm1, %v93_v46 }
  0x8b   :  { %2586 = vmatprep.mubr.msk.bf16.mxu0 %vm3117_vm0, %v3116_v0  ;;  %2666 = vmatprep.mubr.msk.bf16.mxu1 %vm3117_vm0, %v3116_v0 }
  0x92   :  { %2587 = vmatmul.mubr.msk.bf16.gmra.mrb[68].mxu0 %vm173_vm1, %v155_v51  ;;  %2667 = vmatmul.mubr.msk.bf16.gmra.mrb[68].mxu1 %vm173_vm1, %v94_v52 }
  0x93   :  { %2590 = vmatprep.mubr.msk.bf16.mxu0 %vm3117_vm0, %v3116_v0  ;;  %2670 = vmatprep.mubr.msk.bf16.mxu1 %vm3117_vm0, %v3116_v0 }
  0x9a   :  { %2591 = vmatmul.mubr.msk.bf16.gmra.mrb[72].mxu0 %vm173_vm1, %v156_v57  ;;  %2671 = vmatmul.mubr.msk.bf16.gmra.mrb[72].mxu1 %vm173_vm1, %v95_v58 }
  0x9b   :  { %2678 = vmatprep.mubr.msk.bf16.mxu0 %vm3117_vm0, %v3116_v0  ;;  %2762 = vmatprep.mubr.msk.bf16.mxu1 %vm3117_vm0, %v3116_v0 }
  0xa2   :  { %2679 = vmatmul.mubr.msk.bf16.vlgmr.msra.gmra.mrb[76].mxu0 %vm173_vm1, %v708_v61  ;;  %v692_v61 = vld [vmem:[%s4896_s2 + $0xb0] sm:$0xff] }
  0xa3   :  { %2682 = vmatprep.mubr.msk.bf16.mxu0 %vm3117_vm0, %v3116_v0  ;;  %v719_v3 = vpack.c.bf16 %v693_v62, %v692_v61 }
  0xaa   :  { %2683 = vmatmul.mubr.msk.bf16.gmra.mrb[80].mxu0 %vm173_vm1, %v709_v1 }
  0xab   :  { %2686 = vmatprep.mubr.msk.bf16.mxu0 %vm3117_vm0, %v3116_v0 }
  0xb2   :  { %2687 = vmatmul.mubr.msk.bf16.gmra.mrb[84].mxu0 %vm173_vm1, %v710_v5 }
  0xb3   :  { %2690 = vmatprep.mubr.msk.bf16.mxu0 %vm3117_vm0, %v3116_v0 }
  0xba   :  { %2691 = vmatmul.mubr.msk.bf16.gmra.mrb[88].mxu0 %vm173_vm1, %v711_v8 }
  0xbb   :  { %2694 = vmatprep.mubr.msk.bf16.mxu0 %vm3117_vm0, %v3116_v0 }
  0xc2   :  { %2695 = vmatmul.mubr.msk.bf16.gmra.mrb[92].mxu0 %vm173_vm1, %v712_v11  ;;  %v694_v11 = vld [vmem:[%s4896_s2 + $0xc0] sm:$0xff] }
  0xc3   :  { %2698 = vmatprep.mubr.msk.bf16.mxu0 %vm3117_vm0, %v3116_v0  ;;  %v720_v16 = vpack.c.bf16 %v695_v12, %v694_v11 }
  0xca   :  { %2699 = vmatmul.mubr.msk.bf16.gmra.mrb[96].mxu0 %vm173_vm1, %v713_v14 }
  0xcb   :  { %2702 = vmatprep.mubr.msk.bf16.mxu0 %vm3117_vm0, %v3116_v0 }
  0xd2   :  { %2703 = vmatmul.mubr.msk.bf16.gmra.mrb[100].mxu0 %vm173_vm1, %v714_v17 }
  0xd3   :  { %2706 = vmatprep.mubr.msk.bf16.mxu0 %vm3117_vm0, %v3116_v0 }
  0xda   :  { %2707 = vmatmul.mubr.msk.bf16.gmra.mrb[104].mxu0 %vm173_vm1, %v715_v21 }
  0xdb   :  { %2710 = vmatprep.mubr.msk.bf16.mxu0 %vm3117_vm0, %v3116_v0 }
  0xdd   :  { %v265_v24 = vpop.f32.mrb[0].mxu0  ;;  %v519_v25 = vpop.f32.mrb[0].mxu1 }
  0xde   :  { %v2520_v26 = vpop.f32.mrb[1].mxu0  ;;  %v3639_v28 = vadd.f32 %v519_v25, %v265_v24  ;;  %v2600_v29 = vpop.f32.mrb[1].mxu1  ;;  %v696_v24 = vld [vmem:[%s4896_s2 + $0xd0] sm:$0xff]  ;;  %v697_v25 = vld [vmem:[%s4896_s2 + $0xd8] sm:$0xff] }
  0xdf   :  { %v268_v30 = vpop.f32.mrb[2].mxu0  ;;  %v522_v31 = vpop.f32.mrb[2].mxu1 }
  0xe0   :  { %v2521_v32 = vpop.f32.mrb[3].mxu0  ;;  %v3641_v33 = vadd.f32 %v522_v31, %v268_v30  ;;  %v2601_v34 = vpop.f32.mrb[3].mxu1  ;;  %v721_v30 = vpack.c.bf16 %v697_v25, %v696_v24  ;;  %v704_v24 = vld [vmem:[%s4896_s2 + $0x110] sm:$0xff]  ;;  %v705_v25 = vld [vmem:[%s4896_s2 + $0x118] sm:$0xff] }
  0xe2   :  { %2711 = vmatmul.mubr.msk.bf16.gmra.mrb[108].mxu0 %vm173_vm1, %v716_v27 }
  0xe3   :  { %2714 = vmatprep.mubr.msk.bf16.mxu0 %vm3117_vm0, %v3116_v0 }
  0xe5   :  { %v273_v37 = vpop.f32.mrb[4].mxu0  ;;  %v527_v38 = vpop.f32.mrb[4].mxu1 }
  0xe6   :  { %v2524_v39 = vpop.f32.mrb[5].mxu0  ;;  %v3652_v41 = vadd.f32 %v527_v38, %v273_v37  ;;  %v2604_v42 = vpop.f32.mrb[5].mxu1 }
  0xe7   :  { %v276_v43 = vpop.f32.mrb[6].mxu0  ;;  %v530_v44 = vpop.f32.mrb[6].mxu1  ;;  %v698_v39 = vld [vmem:[%s4896_s2 + $0xe0] sm:$0xff] }
  0xe8   :  { %v2525_v45 = vpop.f32.mrb[7].mxu0  ;;  %v3654_v46 = vadd.f32 %v530_v44, %v276_v43  ;;  %v2605_v47 = vpop.f32.mrb[7].mxu1 }
  0xea   :  { %2715 = vmatmul.mubr.msk.bf16.gmra.mrb[112].mxu0 %vm173_vm1, %v717_v40  ;;  %v699_v40 = vld [vmem:[%s4896_s2 + $0xe8] sm:$0xff] }
  0xeb   :  { %2718 = vmatprep.mubr.msk.bf16.mxu0 %vm3117_vm0, %v3116_v0  ;;  %v722_v45 = vpack.c.bf16 %v699_v40, %v698_v39 }
  0xed   :  { %v281_v50 = vpop.f32.mrb[8].mxu0  ;;  %v535_v51 = vpop.f32.mrb[8].mxu1 }
  0xee   :  { %v2528_v52 = vpop.f32.mrb[9].mxu0  ;;  %v3665_v54 = vadd.f32 %v535_v51, %v281_v50  ;;  %v2608_v55 = vpop.f32.mrb[9].mxu1 }
  0xef   :  { %v284_v56 = vpop.f32.mrb[10].mxu0  ;;  %v538_v57 = vpop.f32.mrb[10].mxu1  ;;  %v700_v55 = vld [vmem:[%s4896_s2 + $0xf0] sm:$0xff] }
  0xf0   :  { %v2529_v58 = vpop.f32.mrb[11].mxu0  ;;  %v3667_v59 = vadd.f32 %v538_v57, %v284_v56  ;;  %v2609_v60 = vpop.f32.mrb[11].mxu1  ;;  %v701_v56 = vld [vmem:[%s4896_s2 + $0xf8] sm:$0xff] }
  0xf1   :  { %v2849_v57 = vld [vmem:[%s4895_s7 + $0x18] sm:$0xff]   ;;  %v723_v62 = vpack.c.bf16 %v701_v56, %v700_v55 }
  0xf2   :  { %2719 = vmatmul.mubr.msk.bf16.gmra.mrb[116].mxu0 %vm173_vm1, %v718_v53  ;;  %2761 = vmatpush3.bf16.msra.mxu1 %v2849_v57 }
  0xf3   :  { %2722 = vmatprep.mubr.msk.bf16.mxu0 %vm3117_vm0, %v3116_v0 }
  0xf5   :  { %v289_v63 = vpop.f32.mrb[12].mxu0  ;;  %v543_v1 = vpop.f32.mrb[12].mxu1 }
  0xf6   :  { %v2532_v2 = vpop.f32.mrb[13].mxu0  ;;  %v3678_v4 = vadd.f32 %v543_v1, %v289_v63  ;;  %v2612_v5 = vpop.f32.mrb[13].mxu1 }
  0xf7   :  { %v292_v6 = vpop.f32.mrb[14].mxu0  ;;  %v546_v7 = vpop.f32.mrb[14].mxu1 }
  0xf8   :  { %v2533_v8 = vpop.f32.mrb[15].mxu0  ;;  %v3680_v9 = vadd.f32 %v546_v7, %v292_v6  ;;  %v2613_v10 = vpop.f32.mrb[15].mxu1 }
  0xf9   :  { %v702_v8 = vld [vmem:[%s4896_s2 + $0x100] sm:$0xff]  ;;  %v703_v10 = vld [vmem:[%s4896_s2 + $0x108] sm:$0xff] }
  0xfa   :  { %2723 = vmatmul.mubr.msk.bf16.gmra.mrb[120].mxu0 %vm173_vm1, %v719_v3 }
  0xfb   :  { %2726 = vmatprep.mubr.msk.bf16.mxu0 %vm3117_vm0, %v3116_v0 }
  0xfd   :  { %v297_v13 = vpop.f32.mrb[16].mxu0  ;;  %v551_v14 = vpop.f32.mrb[16].mxu1 }
  0xfe   :  { %v2536_v15 = vpop.f32.mrb[17].mxu0  ;;  %v3691_v17 = vadd.f32 %v551_v14, %v297_v13  ;;  %v2616_v18 = vpop.f32.mrb[17].mxu1  ;;  %v724_v14 = vpack.c.bf16 %v703_v10, %v702_v8 }
  0xff   :  { %v300_v19 = vpop.f32.mrb[18].mxu0  ;;  %v554_v20 = vpop.f32.mrb[18].mxu1 }
 0x100   :  { %v2537_v21 = vpop.f32.mrb[19].mxu0  ;;  %v3693_v22 = vadd.f32 %v554_v20, %v300_v19  ;;  %v2617_v23 = vpop.f32.mrb[19].mxu1 }
 0x102   :  { %2727 = vmatmul.mubr.msk.bf16.gmra.mrb[124].mxu0 %vm173_vm1, %v720_v16 }
 0x103   :  { %2730 = vmatprep.mubr.msk.bf16.mxu0 %vm3117_vm0, %v3116_v0 }
 0x105   :  { %v305_v26 = vpop.f32.mrb[20].mxu0  ;;  %v559_v27 = vpop.f32.mrb[20].mxu1 }
 0x106   :  { %v2540_v29 = vpop.f32.mrb[21].mxu0  ;;  %v3704_v31 = vadd.f32 %v559_v27, %v305_v26  ;;  %v2620_v32 = vpop.f32.mrb[21].mxu1 }
 0x107   :  { %v308_v34 = vpop.f32.mrb[22].mxu0  ;;  %v562_v35 = vpop.f32.mrb[22].mxu1 }
 0x108   :  { %v2541_v36 = vpop.f32.mrb[23].mxu0  ;;  %v3706_v37 = vadd.f32 %v562_v35, %v308_v34  ;;  %v2621_v38 = vpop.f32.mrb[23].mxu1 }
 0x10a   :  { %2731 = vmatmul.mubr.msk.bf16.gmra.mrb[128].mxu0 %vm173_vm1, %v721_v30  ;;  %v725_v30 = vpack.c.bf16 %v705_v25, %v704_v24 }
 0x10b   :  { %2734 = vmatprep.mubr.msk.bf16.mxu0 %vm3117_vm0, %v3116_v0 }
 0x10d   :  { %v313_v42 = vpop.f32.mrb[24].mxu0  ;;  %v567_v43 = vpop.f32.mrb[24].mxu1 }
 0x10e   :  { %v2544_v44 = vpop.f32.mrb[25].mxu0  ;;  %v3717_v47 = vadd.f32 %v567_v43, %v313_v42  ;;  %v2624_v48 = vpop.f32.mrb[25].mxu1  ;;  %v706_v42 = vld [vmem:[%s4896_s2 + $0x120] sm:$0xff]  ;;  %v707_v43 = vld [vmem:[%s4896_s2 + $0x128] sm:$0xff] }
 0x10f   :  { %v316_v49 = vpop.f32.mrb[26].mxu0  ;;  %v570_v50 = vpop.f32.mrb[26].mxu1 }
 0x110   :  { %v2545_v51 = vpop.f32.mrb[27].mxu0  ;;  %v3719_v52 = vadd.f32 %v570_v50, %v316_v49  ;;  %v2625_v53 = vpop.f32.mrb[27].mxu1  ;;  %v726_v49 = vpack.c.bf16 %v707_v43, %v706_v42 }
 0x112   :  { %2735 = vmatmul.mubr.msk.bf16.gmra.mrb[132].mxu0 %vm173_vm1, %v722_v45 }
 0x113   :  { %2738 = vmatprep.mubr.msk.bf16.mxu0 %vm3117_vm0, %v3116_v0 }
 0x115   :  { %v321_v58 = vpop.f32.mrb[28].mxu0  ;;  %v575_v60 = vpop.f32.mrb[28].mxu1 }
 0x116   :  { %v2548_v61 = vpop.f32.mrb[29].mxu0  ;;  %v3733_v63 = vadd.f32 %v575_v60, %v321_v58  ;;  %v2628_v1 = vpop.f32.mrb[29].mxu1 }
 0x117   :  { %v324_v2 = vpop.f32.mrb[30].mxu0  ;;  %v578_v3 = vpop.f32.mrb[30].mxu1 }
 0x118   :  { %v2549_v5 = vpop.f32.mrb[31].mxu0  ;;  %v3735_v6 = vadd.f32 %v578_v3, %v324_v2  ;;  %v2629_v7 = vpop.f32.mrb[31].mxu1 }
 0x11a   :  { %2739 = vmatmul.mubr.msk.bf16.gmra.mrb[136].mxu0 %vm173_vm1, %v723_v62 }
 0x11b   :  { %2742 = vmatprep.mubr.msk.bf16.mxu0 %vm3117_vm0, %v3116_v0 }
 0x11d   :  { %v329_v11 = vpop.f32.mrb[32].mxu0  ;;  %v583_v12 = vpop.f32.mrb[32].mxu1 }
 0x11e   :  { %v2552_v13 = vpop.f32.mrb[33].mxu0  ;;  %v3746_v15 = vadd.f32 %v583_v12, %v329_v11  ;;  %v2632_v16 = vpop.f32.mrb[33].mxu1 }
 0x11f   :  { %v332_v18 = vpop.f32.mrb[34].mxu0  ;;  %v586_v19 = vpop.f32.mrb[34].mxu1 }
 0x120   :  { %v2553_v20 = vpop.f32.mrb[35].mxu0  ;;  %v3748_v21 = vadd.f32 %v586_v19, %v332_v18  ;;  %v2633_v23 = vpop.f32.mrb[35].mxu1 }
 0x122   :  { %2743 = vmatmul.mubr.msk.bf16.gmra.mrb[140].mxu0 %vm173_vm1, %v724_v14 }
 0x123   :  { %2746 = vmatprep.mubr.msk.bf16.mxu0 %vm3117_vm0, %v3116_v0 }
 0x125   :  { %v337_v26 = vpop.f32.mrb[36].mxu0  ;;  %v591_v27 = vpop.f32.mrb[36].mxu1 }
 0x126   :  { %v2556_v29 = vpop.f32.mrb[37].mxu0  ;;  %v3759_v32 = vadd.f32 %v591_v27, %v337_v26  ;;  %v2636_v34 = vpop.f32.mrb[37].mxu1 }
 0x127   :  { %v340_v35 = vpop.f32.mrb[38].mxu0  ;;  %v594_v36 = vpop.f32.mrb[38].mxu1 }
 0x128   :  { %v2557_v38 = vpop.f32.mrb[39].mxu0  ;;  %v3761_v39 = vadd.f32 %v594_v36, %v340_v35  ;;  %v2637_v40 = vpop.f32.mrb[39].mxu1 }
 0x12a   :  { %2747 = vmatmul.mubr.msk.bf16.gmra.mrb[144].mxu0 %vm173_vm1, %v725_v30 }
 0x12b   :  { %2750 = vmatprep.mubr.msk.bf16.mxu0 %vm3117_vm0, %v3116_v0 }
 0x12d   :  { %v345_v44 = vpop.f32.mrb[40].mxu0  ;;  %v599_v45 = vpop.f32.mrb[40].mxu1 }
 0x12e   :  { %v2560_v48 = vpop.f32.mrb[41].mxu0  ;;  %v3772_v50 = vadd.f32 %v599_v45, %v345_v44  ;;  %v2640_v51 = vpop.f32.mrb[41].mxu1 }
 0x12f   :  { %v348_v53 = vpop.f32.mrb[42].mxu0  ;;  %v602_v55 = vpop.f32.mrb[42].mxu1 }
 0x130   :  { %v2561_v56 = vpop.f32.mrb[43].mxu0  ;;  %v3774_v57 = vadd.f32 %v602_v55, %v348_v53  ;;  %v2641_v58 = vpop.f32.mrb[43].mxu1 }
 0x132   :  { %2751 = vmatmul.mubr.msk.bf16.gmra.mrb[148].mxu0 %vm173_vm1, %v726_v49 }
 0x135   :  { %v353_v60 = vpop.f32.mrb[44].mxu0  ;;  %v607_v61 = vpop.f32.mrb[44].mxu1 }
 0x136   :  { %v2564_v62 = vpop.f32.mrb[45].mxu0  ;;  %v3777_v1 = vadd.f32 %v607_v61, %v353_v60  ;;  %v2644_v2 = vpop.f32.mrb[45].mxu1 }
 0x137   :  { %v356_v3 = vpop.f32.mrb[46].mxu0  ;;  %v610_v5 = vpop.f32.mrb[46].mxu1 }
 0x138   :  { %v2565_v7 = vpop.f32.mrb[47].mxu0  ;;  %v3779_v8 = vadd.f32 %v610_v5, %v356_v3  ;;  %v2645_v10 = vpop.f32.mrb[47].mxu1 }
 0x13d   :  { %v361_v11 = vpop.f32.mrb[48].mxu0  ;;  %v615_v12 = vpop.f32.mrb[48].mxu1 }
 0x13e   :  { %v2568_v13 = vpop.f32.mrb[49].mxu0  ;;  %v3781_v14 = vadd.f32 %v615_v12, %v361_v11  ;;  %v2648_v16 = vpop.f32.mrb[49].mxu1 }
 0x13f   :  { %v364_v18 = vpop.f32.mrb[50].mxu0  ;;  %v618_v19 = vpop.f32.mrb[50].mxu1 }
 0x140   :  { %v2569_v20 = vpop.f32.mrb[51].mxu0  ;;  %v3783_v23 = vadd.f32 %v618_v19, %v364_v18  ;;  %v2649_v24 = vpop.f32.mrb[51].mxu1 }
 0x145   :  { %v369_v25 = vpop.f32.mrb[52].mxu0  ;;  %v623_v26 = vpop.f32.mrb[52].mxu1 }
 0x146   :  { %v2572_v27 = vpop.f32.mrb[53].mxu0  ;;  %v3785_v29 = vadd.f32 %v623_v26, %v369_v25  ;;  %v2652_v30 = vpop.f32.mrb[53].mxu1 }
 0x147   :  { %v372_v34 = vpop.f32.mrb[54].mxu0  ;;  %v626_v35 = vpop.f32.mrb[54].mxu1 }
 0x148   :  { %v2573_v36 = vpop.f32.mrb[55].mxu0  ;;  %v3787_v38 = vadd.f32 %v626_v35, %v372_v34  ;;  %v2653_v40 = vpop.f32.mrb[55].mxu1 }
 0x14d   :  { %v377_v42 = vpop.f32.mrb[56].mxu0  ;;  %v631_v43 = vpop.f32.mrb[56].mxu1 }
 0x14e   :  { %v2576_v44 = vpop.f32.mrb[57].mxu0  ;;  %v3789_v45 = vadd.f32 %v631_v43, %v377_v42  ;;  %v2656_v48 = vpop.f32.mrb[57].mxu1 }
 0x14f   :  { %v380_v49 = vpop.f32.mrb[58].mxu0  ;;  %v634_v51 = vpop.f32.mrb[58].mxu1 }
 0x150   :  { %v2577_v53 = vpop.f32.mrb[59].mxu0  ;;  %v3791_v55 = vadd.f32 %v634_v51, %v380_v49  ;;  %v2657_v56 = vpop.f32.mrb[59].mxu1 }
 0x155   :  { %v385_v58 = vpop.f32.mrb[60].mxu0  ;;  %v639_v60 = vpop.f32.mrb[60].mxu1 }
 0x156   :  { %v2580_v61 = vpop.f32.mrb[61].mxu0  ;;  %v3793_v62 = vadd.f32 %v639_v60, %v385_v58  ;;  %v2660_v2 = vpop.f32.mrb[61].mxu1 }
 0x157   :  { %v388_v3 = vpop.f32.mrb[62].mxu0  ;;  %v642_v5 = vpop.f32.mrb[62].mxu1 }
 0x158   :  { %v2581_v7 = vpop.f32.mrb[63].mxu0  ;;  %v3795_v10 = vadd.f32 %v642_v5, %v388_v3  ;;  %v2661_v11 = vpop.f32.mrb[63].mxu1 }
 0x15d   :  { %v393_v12 = vpop.f32.mrb[64].mxu0  ;;  %v647_v13 = vpop.f32.mrb[64].mxu1 }
 0x15e   :  { %v2584_v16 = vpop.f32.mrb[65].mxu0  ;;  %v3797_v18 = vadd.f32 %v647_v13, %v393_v12  ;;  %v2664_v19 = vpop.f32.mrb[65].mxu1  ;;  %v3812_v12 = vld [vmem:[%s4897_s6] ss:$0 sm:$0xff] }
 0x15f   :  { %v396_v20 = vpop.f32.mrb[66].mxu0  ;;  %v650_v24 = vpop.f32.mrb[66].mxu1 }
 0x160   :  { %v2585_v25 = vpop.f32.mrb[67].mxu0  ;;  %v3799_v26 = vadd.f32 %v650_v24, %v396_v20  ;;  %v2665_v27 = vpop.f32.mrb[67].mxu1 }
 0x165   :  { %v401_v30 = vpop.f32.mrb[68].mxu0  ;;  %v655_v34 = vpop.f32.mrb[68].mxu1 }
 0x166   :  { %v2588_v35 = vpop.f32.mrb[69].mxu0  ;;  %v3801_v36 = vadd.f32 %v655_v34, %v401_v30  ;;  %v2668_v40 = vpop.f32.mrb[69].mxu1 }
 0x167   :  { %v404_v42 = vpop.f32.mrb[70].mxu0  ;;  %v658_v43 = vpop.f32.mrb[70].mxu1 }
 0x168   :  { %v2589_v44 = vpop.f32.mrb[71].mxu0  ;;  %v3803_v48 = vadd.f32 %v658_v43, %v404_v42  ;;  %v2669_v49 = vpop.f32.mrb[71].mxu1 }
 0x16d   :  { %v409_v51 = vpop.f32.mrb[72].mxu0  ;;  %v663_v53 = vpop.f32.mrb[72].mxu1 }
 0x16e   :  { %v2592_v56 = vpop.f32.mrb[73].mxu0  ;;  %v3805_v58 = vadd.f32 %v663_v53, %v409_v51  ;;  %v2672_v60 = vpop.f32.mrb[73].mxu1 }
 0x16f   :  { %v412_v61 = vpop.f32.mrb[74].mxu0  ;;  %v666_v2 = vpop.f32.mrb[74].mxu1 }
 0x170   :  { %v2593_v3 = vpop.f32.mrb[75].mxu0  ;;  %v3807_v5 = vadd.f32 %v666_v2, %v412_v61  ;;  %v2673_v7 = vpop.f32.mrb[75].mxu1 }
 0x175   :  { %v834_v11 = vpop.f32.mrb[76].mxu0 }
 0x176   :  { %v985_v13 = vadd.f32 %v834_v11, %v3639_v28  ;;  %v2680_v16 = vpop.f32.mrb[77].mxu0 }
 0x177   :  { %v837_v19 = vpop.f32.mrb[78].mxu0 }
 0x178   :  { %v1030_v20 = vadd.f32 %v3812_v12, %v985_v13  ;;  %v986_v24 = vadd.f32 %v837_v19, %v3641_v33  ;;  %v2681_v25 = vpop.f32.mrb[79].mxu0 }
 0x17a   :  { %v2364_v27 = vmul.f32 -1.442695, %v1030_v20  ;;  %v1031_v30 = vadd.f32 %v3812_v12, %v986_v24 }
 0x17c   :  { %2850 = vpow2.f32 %v2364_v27  ;;  %v2365_v34 = vmul.f32 -1.442695, %v1031_v30 }
 0x17d   :  { %v842_v35 = vpop.f32.mrb[80].mxu0 }
 0x17e   :  { %2852 = vpow2.f32 %v2365_v34  ;;  %v987_v40 = vadd.f32 %v842_v35, %v3652_v41  ;;  %v2684_v42 = vpop.f32.mrb[81].mxu0 }
 0x17f   :  { %v845_v43 = vpop.f32.mrb[82].mxu0 }
 0x180   :  { %v3820_v28 = vadd.f32 %v3812_v12, %v987_v40  ;;  %v988_v44 = vadd.f32 %v845_v43, %v3654_v46  ;;  %v2685_v49 = vpop.f32.mrb[83].mxu0 }
 0x182   :  { %v2366_v33 = vmul.f32 -1.442695, %v3820_v28  ;;  %v3825_v51 = vadd.f32 %v3812_v12, %v988_v44 }
 0x184   :  { %2854 = vpow2.f32 %v2366_v33  ;;  %v2367_v53 = vmul.f32 -1.442695, %v3825_v51 }
 0x185   :  { %v850_v56 = vpop.f32.mrb[84].mxu0 }
 0x186   :  { %v2851_v60 = vpop.eup %2850  ;;  %2856 = vpow2.f32 %v2367_v53  ;;  %v989_v41 = vadd.f32 %v850_v56, %v3665_v54  ;;  %v2688_v61 = vpop.f32.mrb[85].mxu0 }
 0x187   :  { %v1182_v2 = vadd.f32 1.0, %v2851_v60  ;;  %v853_v3 = vpop.f32.mrb[86].mxu0 }
 0x188   :  { %v2853_v7 = vpop.eup %2852  ;;  %v3830_v46 = vadd.f32 %v3812_v12, %v989_v41  ;;  %v990_v11 = vadd.f32 %v853_v3, %v3667_v59  ;;  %v2689_v13 = vpop.f32.mrb[87].mxu0 }
 0x189   :  { %2858 = vrcp.f32 %v1182_v2  ;;  %v1183_v16 = vadd.f32 1.0, %v2853_v7 }
 0x18a   :  { %v2368_v19 = vmul.f32 -1.442695, %v3830_v46  ;;  %v3835_v24 = vadd.f32 %v3812_v12, %v990_v11 }
 0x18b   :  { %2860 = vrcp.f32 %v1183_v16 }
 0x18c   :  { %2862 = vpow2.f32 %v2368_v19  ;;  %v2369_v54 = vmul.f32 -1.442695, %v3835_v24 }
 0x18d   :  { %v858_v25 = vpop.f32.mrb[88].mxu0 }
 0x18e   :  { %v2855_v27 = vpop.eup %2854  ;;  %2864 = vpow2.f32 %v2369_v54  ;;  %v991_v34 = vadd.f32 %v858_v25, %v3678_v4  ;;  %v2692_v35 = vpop.f32.mrb[89].mxu0 }
 0x18f   :  { %v1184_v40 = vadd.f32 1.0, %v2855_v27  ;;  %v861_v59 = vpop.f32.mrb[90].mxu0 }
 0x190   :  { %v2857_v42 = vpop.eup %2856  ;;  %v3840_v43 = vadd.f32 %v3812_v12, %v991_v34  ;;  %v992_v44 = vadd.f32 %v861_v59, %v3680_v9  ;;  %v2693_v49 = vpop.f32.mrb[91].mxu0 }
 0x191   :  { %2866 = vrcp.f32 %v1184_v40  ;;  %v1185_v33 = vadd.f32 1.0, %v2857_v42 }
 0x192   :  { %v2370_v53 = vmul.f32 -1.442695, %v3840_v43  ;;  %v3845_v56 = vadd.f32 %v3812_v12, %v992_v44 }
 0x193   :  { %v2859_v60 = vpop.eup %2858  ;;  %2868 = vrcp.f32 %v1185_v33 }
 0x194   :  { %2870 = vpow2.f32 %v2370_v53  ;;  %v2371_v4 = vmul.f32 -1.442695, %v3845_v56  ;;  %v1296_v3 = vmul.f32 %v2859_v60, %v1030_v20 }
 0x195   :  { %v2861_v41 = vpop.eup %2860  ;;  %v866_v61 = vpop.f32.mrb[92].mxu0 }
 0x196   :  { %v2863_v2 = vpop.eup %2862  ;;  %v1297_v7 = vmul.f32 %v2861_v41, %v1031_v30  ;;  %2872 = vpow2.f32 %v2371_v4  ;;  %v993_v9 = vadd.f32 %v866_v61, %v3691_v17  ;;  %v2696_v11 = vpop.f32.mrb[93].mxu0 }
 0x197   :  { %v1186_v13 = vadd.f32 1.0, %v2863_v2  ;;  %v869_v16 = vpop.f32.mrb[94].mxu0 }
 0x198   :  { %v2865_v19 = vpop.eup %2864  ;;  %v1334_v54 = vpack.c.bf16 %v1297_v7, %v1296_v3  ;;  %v3850_v25 = vadd.f32 %v3812_v12, %v993_v9  ;;  %v994_v27 = vadd.f32 %v869_v16, %v3693_v22  ;;  %v2697_v34 = vpop.f32.mrb[95].mxu0 }
 0x199   :  { %2874 = vrcp.f32 %v1186_v13  ;;  %v1187_v35 = vadd.f32 1.0, %v2865_v19 }
 0x19a   :  { %v2372_v20 = vmul.f32 -1.442695, %v3850_v25  ;;  %v3855_v30 = vadd.f32 %v3812_v12, %v994_v27  ;;  %2763 = vmatmul.mubr.msk.bf16.vlgmr.msra.gmra.mrb[76].mxu1 %vm1392_vm2, %v1334_v54 }
 0x19b   :  { %v2867_v17 = vpop.eup %2866  ;;  %2876 = vrcp.f32 %v1187_v35  ;;  %2766 = vmatprep.mubr.msk.bf16.mxu1 %vm3117_vm0, %v3116_v0 }
 0x19c   :  { %2878 = vpow2.f32 %v2372_v20  ;;  %v2373_v40 = vmul.f32 -1.442695, %v3855_v30  ;;  %v1298_v44 = vmul.f32 %v2867_v17, %v3820_v28 }
 0x19d   :  { %v2869_v59 = vpop.eup %2868  ;;  %v874_v22 = vpop.f32.mrb[96].mxu0 }
 0x19e   :  { %v2871_v42 = vpop.eup %2870  ;;  %v1299_v49 = vmul.f32 %v2869_v59, %v3825_v51  ;;  %2880 = vpow2.f32 %v2373_v40  ;;  %v995_v33 = vadd.f32 %v874_v22, %v3704_v31  ;;  %v2700_v53 = vpop.f32.mrb[97].mxu0 }
 0x19f   :  { %v1188_v60 = vadd.f32 1.0, %v2871_v42  ;;  %v877_v4 = vpop.f32.mrb[98].mxu0 }
 0x1a0   :  { %v2873_v41 = vpop.eup %2872  ;;  %v1335_v61 = vpack.c.bf16 %v1299_v49, %v1298_v44  ;;  %v3865_v2 = vadd.f32 %v3812_v12, %v995_v33  ;;  %v996_v3 = vadd.f32 %v877_v4, %v3706_v37  ;;  %v2701_v7 = vpop.f32.mrb[99].mxu0 }
 0x1a1   :  { %2882 = vrcp.f32 %v1188_v60  ;;  %v1189_v9 = vadd.f32 1.0, %v2873_v41 }
 0x1a2   :  { %v2374_v28 = vmul.f32 -1.442695, %v3865_v2  ;;  %v3870_v51 = vadd.f32 %v3812_v12, %v996_v3  ;;  %2767 = vmatmul.mubr.msk.bf16.gmra.mrb[80].mxu1 %vm1392_vm2, %v1335_v61 }
 0x1a3   :  { %v2875_v31 = vpop.eup %2874  ;;  %2884 = vrcp.f32 %v1189_v9  ;;  %2770 = vmatprep.mubr.msk.bf16.mxu1 %vm3117_vm0, %v3116_v0 }
 0x1a4   :  { %2886 = vpow2.f32 %v2374_v28  ;;  %v2375_v11 = vmul.f32 -1.442695, %v3870_v51  ;;  %v1300_v19 = vmul.f32 %v2875_v31, %v3830_v46 }
 0x1a5   :  { %v2877_v13 = vpop.eup %2876  ;;  %v882_v37 = vpop.f32.mrb[100].mxu0 }
 0x1a6   :  { %v2879_v16 = vpop.eup %2878  ;;  %v1301_v54 = vmul.f32 %v2877_v13, %v3835_v24  ;;  %2888 = vpow2.f32 %v2375_v11  ;;  %v997_v27 = vadd.f32 %v882_v37, %v3717_v47  ;;  %v2704_v34 = vpop.f32.mrb[101].mxu0 }
 0x1a7   :  { %v1190_v35 = vadd.f32 1.0, %v2879_v16  ;;  %v885_v20 = vpop.f32.mrb[102].mxu0 }
 0x1a8   :  { %v2881_v17 = vpop.eup %2880  ;;  %v1336_v40 = vpack.c.bf16 %v1301_v54, %v1300_v19  ;;  %v3880_v59 = vadd.f32 %v3812_v12, %v997_v27  ;;  %v998_v22 = vadd.f32 %v885_v20, %v3719_v52  ;;  %v2705_v42 = vpop.f32.mrb[103].mxu0 }
 0x1a9   :  { %2890 = vrcp.f32 %v1190_v35  ;;  %v1191_v44 = vadd.f32 1.0, %v2881_v17 }
 0x1aa   :  { %v2376_v46 = vmul.f32 -1.442695, %v3880_v59  ;;  %v3885_v24 = vadd.f32 %v3812_v12, %v998_v22  ;;  %2771 = vmatmul.mubr.msk.bf16.gmra.mrb[84].mxu1 %vm1392_vm2, %v1336_v40 }
 0x1ab   :  { %v2883_v47 = vpop.eup %2882  ;;  %2892 = vrcp.f32 %v1191_v44  ;;  %2774 = vmatprep.mubr.msk.bf16.mxu1 %vm3117_vm0, %v3116_v0 }
 0x1ac   :  { %2894 = vpow2.f32 %v2376_v46  ;;  %v2377_v49 = vmul.f32 -1.442695, %v3885_v24  ;;  %v1302_v60 = vmul.f32 %v2883_v47, %v3840_v43 }
 0x1ad   :  { %v2885_v33 = vpop.eup %2884  ;;  %v890_v52 = vpop.f32.mrb[104].mxu0 }
 0x1ae   :  { %v2887_v53 = vpop.eup %2886  ;;  %v1303_v4 = vmul.f32 %v2885_v33, %v3845_v56  ;;  %2896 = vpow2.f32 %v2377_v49  ;;  %v999_v41 = vadd.f32 %v890_v52, %v3733_v63  ;;  %v2708_v61 = vpop.f32.mrb[105].mxu0 }
 0x1af   :  { %v1192_v3 = vadd.f32 1.0, %v2887_v53  ;;  %v893_v7 = vpop.f32.mrb[106].mxu0 }
 0x1b0   :  { %v2889_v9 = vpop.eup %2888  ;;  %v1337_v28 = vpack.c.bf16 %v1303_v4, %v1302_v60  ;;  %v3895_v31 = vadd.f32 %v3812_v12, %v999_v41  ;;  %v1000_v11 = vadd.f32 %v893_v7, %v3735_v6  ;;  %v2709_v13 = vpop.f32.mrb[107].mxu0 }
 0x1b1   :  { %2898 = vrcp.f32 %v1192_v3  ;;  %v1193_v37 = vadd.f32 1.0, %v2889_v9 }
 0x1b2   :  { %v2378_v43 = vmul.f32 -1.442695, %v3895_v31  ;;  %v3900_v56 = vadd.f32 %v3812_v12, %v1000_v11  ;;  %2775 = vmatmul.mubr.msk.bf16.gmra.mrb[88].mxu1 %vm1392_vm2, %v1337_v28 }
 0x1b3   :  { %v2891_v63 = vpop.eup %2890  ;;  %2900 = vrcp.f32 %v1193_v37  ;;  %2778 = vmatprep.mubr.msk.bf16.mxu1 %vm3117_vm0, %v3116_v0 }
 0x1b4   :  { %2902 = vpow2.f32 %v2378_v43  ;;  %v2379_v16 = vmul.f32 -1.442695, %v3900_v56  ;;  %v1304_v27 = vmul.f32 %v2891_v63, %v3850_v25 }
 0x1b5   :  { %v2893_v19 = vpop.eup %2892  ;;  %v898_v6 = vpop.f32.mrb[108].mxu0 }
 0x1b6   :  { %v2895_v54 = vpop.eup %2894  ;;  %v1305_v34 = vmul.f32 %v2893_v19, %v3855_v30  ;;  %2904 = vpow2.f32 %v2379_v16  ;;  %v1001_v35 = vadd.f32 %v898_v6, %v3746_v15  ;;  %v2712_v20 = vpop.f32.mrb[109].mxu0 }
 0x1b7   :  { %v1194_v17 = vadd.f32 1.0, %v2895_v54  ;;  %v901_v40 = vpop.f32.mrb[110].mxu0 }
 0x1b8   :  { %v2897_v22 = vpop.eup %2896  ;;  %v1338_v42 = vpack.c.bf16 %v1305_v34, %v1304_v27  ;;  %v3910_v44 = vadd.f32 %v3812_v12, %v1001_v35  ;;  %v1002_v46 = vadd.f32 %v901_v40, %v3748_v21  ;;  %v2713_v47 = vpop.f32.mrb[111].mxu0 }
 0x1b9   :  { %2906 = vrcp.f32 %v1194_v17  ;;  %v1195_v49 = vadd.f32 1.0, %v2897_v22 }
 0x1ba   :  { %v2380_v25 = vmul.f32 -1.442695, %v3910_v44  ;;  %v3915_v30 = vadd.f32 %v3812_v12, %v1002_v46  ;;  %2779 = vmatmul.mubr.msk.bf16.gmra.mrb[92].mxu1 %vm1392_vm2, %v1338_v42 }
 0x1bb   :  { %v2899_v15 = vpop.eup %2898  ;;  %2908 = vrcp.f32 %v1195_v49  ;;  %2782 = vmatprep.mubr.msk.bf16.mxu1 %vm3117_vm0, %v3116_v0 }
 0x1bc   :  { %2910 = vpow2.f32 %v2380_v25  ;;  %v2381_v33 = vmul.f32 -1.442695, %v3915_v30  ;;  %v1306_v60 = vmul.f32 %v2899_v15, %v3865_v2 }
 0x1bd   :  { %v2901_v52 = vpop.eup %2900  ;;  %v906_v21 = vpop.f32.mrb[112].mxu0 }
 0x1be   :  { %v2903_v53 = vpop.eup %2902  ;;  %v1307_v4 = vmul.f32 %v2901_v52, %v3870_v51  ;;  %2912 = vpow2.f32 %v2381_v33  ;;  %v1003_v41 = vadd.f32 %v906_v21, %v3759_v32  ;;  %v2716_v61 = vpop.f32.mrb[113].mxu0 }
 0x1bf   :  { %v1196_v3 = vadd.f32 1.0, %v2903_v53  ;;  %v909_v7 = vpop.f32.mrb[114].mxu0 }
 0x1c0   :  { %v2905_v9 = vpop.eup %2904  ;;  %v1339_v28 = vpack.c.bf16 %v1307_v4, %v1306_v60  ;;  %v3925_v11 = vadd.f32 %v3812_v12, %v1003_v41  ;;  %v1004_v13 = vadd.f32 %v909_v7, %v3761_v39  ;;  %v2717_v37 = vpop.f32.mrb[115].mxu0 }
 0x1c1   :  { %2914 = vrcp.f32 %v1196_v3  ;;  %v1197_v43 = vadd.f32 1.0, %v2905_v9 }
 0x1c2   :  { %v2382_v2 = vmul.f32 -1.442695, %v3925_v11  ;;  %v3930_v51 = vadd.f32 %v3812_v12, %v1004_v13  ;;  %2783 = vmatmul.mubr.msk.bf16.gmra.mrb[96].mxu1 %vm1392_vm2, %v1339_v28 }
 0x1c3   :  { %v2907_v32 = vpop.eup %2906  ;;  %2916 = vrcp.f32 %v1197_v43  ;;  %2786 = vmatprep.mubr.msk.bf16.mxu1 %vm3117_vm0, %v3116_v0 }
 0x1c4   :  { %2918 = vpow2.f32 %v2382_v2  ;;  %v2383_v63 = vmul.f32 -1.442695, %v3930_v51  ;;  %v1308_v6 = vmul.f32 %v2907_v32, %v3880_v59 }
 0x1c5   :  { %v2909_v16 = vpop.eup %2908  ;;  %v914_v39 = vpop.f32.mrb[116].mxu0 }
 0x1c6   :  { %v2911_v19 = vpop.eup %2910  ;;  %v1309_v54 = vmul.f32 %v2909_v16, %v3885_v24  ;;  %2920 = vpow2.f32 %v2383_v63  ;;  %v1005_v27 = vadd.f32 %v914_v39, %v3772_v50  ;;  %v2720_v34 = vpop.f32.mrb[117].mxu0 }
 0x1c7   :  { %v1198_v35 = vadd.f32 1.0, %v2911_v19  ;;  %v917_v20 = vpop.f32.mrb[118].mxu0 }
 0x1c8   :  { %v2913_v17 = vpop.eup %2912  ;;  %v1340_v40 = vpack.c.bf16 %v1309_v54, %v1308_v6  ;;  %v3940_v22 = vadd.f32 %v3812_v12, %v1005_v27  ;;  %v1006_v42 = vadd.f32 %v917_v20, %v3774_v57  ;;  %v2721_v46 = vpop.f32.mrb[119].mxu0 }
 0x1c9   :  { %2922 = vrcp.f32 %v1198_v35  ;;  %v1199_v47 = vadd.f32 1.0, %v2913_v17 }
 0x1ca   :  { %v2384_v59 = vmul.f32 -1.442695, %v3940_v22  ;;  %v3945_v24 = vadd.f32 %v3812_v12, %v1006_v42  ;;  %2787 = vmatmul.mubr.msk.bf16.gmra.mrb[100].mxu1 %vm1392_vm2, %v1340_v40 }
 0x1cb   :  { %v2915_v50 = vpop.eup %2914  ;;  %2924 = vrcp.f32 %v1199_v47  ;;  %2790 = vmatprep.mubr.msk.bf16.mxu1 %vm3117_vm0, %v3116_v0 }
 0x1cc   :  { %2926 = vpow2.f32 %v2384_v59  ;;  %v2385_v49 = vmul.f32 -1.442695, %v3945_v24  ;;  %v1310_v33 = vmul.f32 %v2915_v50, %v3895_v31 }
 0x1cd   :  { %v2917_v25 = vpop.eup %2916  ;;  %v922_v57 = vpop.f32.mrb[120].mxu0 }
 0x1ce   :  { %v2919_v15 = vpop.eup %2918  ;;  %v1311_v52 = vmul.f32 %v2917_v25, %v3900_v56  ;;  %2928 = vpow2.f32 %v2385_v49  ;;  %v1007_v21 = vadd.f32 %v922_v57, %v3777_v1  ;;  %v2724_v53 = vpop.f32.mrb[121].mxu0 }
 0x1cf   :  { %v1200_v60 = vadd.f32 1.0, %v2919_v15  ;;  %v925_v4 = vpop.f32.mrb[122].mxu0 }
 0x1d0   :  { %v2921_v41 = vpop.eup %2920  ;;  %v1341_v61 = vpack.c.bf16 %v1311_v52, %v1310_v33  ;;  %v3955_v3 = vadd.f32 %v3812_v12, %v1007_v21  ;;  %v1008_v7 = vadd.f32 %v925_v4, %v3779_v8  ;;  %v2725_v9 = vpop.f32.mrb[123].mxu0 }
 0x1d1   :  { %2930 = vrcp.f32 %v1200_v60  ;;  %v1201_v28 = vadd.f32 1.0, %v2921_v41 }
 0x1d2   :  { %v2386_v31 = vmul.f32 -1.442695, %v3955_v3  ;;  %v3960_v56 = vadd.f32 %v3812_v12, %v1008_v7  ;;  %2791 = vmatmul.mubr.msk.bf16.gmra.mrb[104].mxu1 %vm1392_vm2, %v1341_v61 }
 0x1d3   :  { %v2923_v1 = vpop.eup %2922  ;;  %2932 = vrcp.f32 %v1201_v28  ;;  %2794 = vmatprep.mubr.msk.bf16.mxu1 %vm3117_vm0, %v3116_v0 }
 0x1d4   :  { %2934 = vpow2.f32 %v2386_v31  ;;  %v2387_v13 = vmul.f32 -1.442695, %v3960_v56  ;;  %v1312_v2 = vmul.f32 %v2923_v1, %v3910_v44 }
 0x1d5   :  { %v2925_v37 = vpop.eup %2924  ;;  %v930_v8 = vpop.f32.mrb[124].mxu0 }
 0x1d6   :  { %v2927_v43 = vpop.eup %2926  ;;  %v1313_v32 = vmul.f32 %v2925_v37, %v3915_v30  ;;  %2936 = vpow2.f32 %v2387_v13  ;;  %v1009_v63 = vadd.f32 %v930_v8, %v3781_v14  ;;  %v2728_v16 = vpop.f32.mrb[125].mxu0 }
 0x1d7   :  { %v1202_v39 = vadd.f32 1.0, %v2927_v43  ;;  %v933_v19 = vpop.f32.mrb[126].mxu0 }
 0x1d8   :  { %v2929_v6 = vpop.eup %2928  ;;  %v1342_v54 = vpack.c.bf16 %v1313_v32, %v1312_v2  ;;  %v3970_v27 = vadd.f32 %v3812_v12, %v1009_v63  ;;  %v1010_v34 = vadd.f32 %v933_v19, %v3783_v23  ;;  %v2729_v35 = vpop.f32.mrb[127].mxu0 }
 0x1d9   :  { %2938 = vrcp.f32 %v1202_v39  ;;  %v1203_v20 = vadd.f32 1.0, %v2929_v6 }
 0x1da   :  { %v2388_v44 = vmul.f32 -1.442695, %v3970_v27  ;;  %v3975_v30 = vadd.f32 %v3812_v12, %v1010_v34  ;;  %2795 = vmatmul.mubr.msk.bf16.gmra.mrb[108].mxu1 %vm1392_vm2, %v1342_v54 }
 0x1db   :  { %v2931_v14 = vpop.eup %2930  ;;  %2940 = vrcp.f32 %v1203_v20  ;;  %2798 = vmatprep.mubr.msk.bf16.mxu1 %vm3117_vm0, %v3116_v0 }
 0x1dc   :  { %2942 = vpow2.f32 %v2388_v44  ;;  %v2389_v17 = vmul.f32 -1.442695, %v3975_v30  ;;  %v1314_v46 = vmul.f32 %v2931_v14, %v3925_v11 }
 0x1dd   :  { %v2933_v40 = vpop.eup %2932  ;;  %v938_v23 = vpop.f32.mrb[128].mxu0 }
 0x1de   :  { %v2935_v42 = vpop.eup %2934  ;;  %v1315_v47 = vmul.f32 %v2933_v40, %v3930_v51  ;;  %2944 = vpow2.f32 %v2389_v17  ;;  %v1011_v59 = vadd.f32 %v938_v23, %v3785_v29  ;;  %v2732_v50 = vpop.f32.mrb[129].mxu0 }
 0x1df   :  { %v1204_v49 = vadd.f32 1.0, %v2935_v42  ;;  %v941_v25 = vpop.f32.mrb[130].mxu0 }
 0x1e0   :  { %v2937_v57 = vpop.eup %2936  ;;  %v1343_v15 = vpack.c.bf16 %v1315_v47, %v1314_v46  ;;  %v3985_v33 = vadd.f32 %v3812_v12, %v1011_v59  ;;  %v1012_v52 = vadd.f32 %v941_v25, %v3787_v38  ;;  %v2733_v21 = vpop.f32.mrb[131].mxu0 }
 0x1e1   :  { %2946 = vrcp.f32 %v1204_v49  ;;  %v1205_v53 = vadd.f32 1.0, %v2937_v57 }
 0x1e2   :  { %v2390_v11 = vmul.f32 -1.442695, %v3985_v33  ;;  %v3990_v51 = vadd.f32 %v3812_v12, %v1012_v52  ;;  %2799 = vmatmul.mubr.msk.bf16.gmra.mrb[112].mxu1 %vm1392_vm2, %v1343_v15 }
 0x1e3   :  { %v2939_v29 = vpop.eup %2938  ;;  %2948 = vrcp.f32 %v1205_v53  ;;  %2802 = vmatprep.mubr.msk.bf16.mxu1 %vm3117_vm0, %v3116_v0 }
 0x1e4   :  { %2950 = vpow2.f32 %v2390_v11  ;;  %v2391_v60 = vmul.f32 -1.442695, %v3990_v51  ;;  %v1316_v61 = vmul.f32 %v2939_v29, %v3940_v22 }
 0x1e5   :  { %v2941_v4 = vpop.eup %2940  ;;  %v946_v38 = vpop.f32.mrb[132].mxu0 }
 0x1e6   :  { %v2943_v41 = vpop.eup %2942  ;;  %v1317_v7 = vmul.f32 %v2941_v4, %v3945_v24  ;;  %2952 = vpow2.f32 %v2391_v60  ;;  %v1013_v9 = vadd.f32 %v946_v38, %v3789_v45  ;;  %v2736_v28 = vpop.f32.mrb[133].mxu0 }
 0x1e7   :  { %v1206_v31 = vadd.f32 1.0, %v2943_v41  ;;  %v949_v1 = vpop.f32.mrb[134].mxu0 }
 0x1e8   :  { %v2945_v13 = vpop.eup %2944  ;;  %v1344_v37 = vpack.c.bf16 %v1317_v7, %v1316_v61  ;;  %v4000_v8 = vadd.f32 %v3812_v12, %v1013_v9  ;;  %v1014_v43 = vadd.f32 %v949_v1, %v3791_v55  ;;  %v2737_v2 = vpop.f32.mrb[135].mxu0 }
 0x1e9   :  { %2954 = vrcp.f32 %v1206_v31  ;;  %v1207_v32 = vadd.f32 1.0, %v2945_v13 }
 0x1ea   :  { %v2392_v22 = vmul.f32 -1.442695, %v4000_v8  ;;  %v4005_v24 = vadd.f32 %v3812_v12, %v1014_v43  ;;  %2803 = vmatmul.mubr.msk.bf16.gmra.mrb[116].mxu1 %vm1392_vm2, %v1344_v37 }
 0x1eb   :  { %v2947_v45 = vpop.eup %2946  ;;  %2956 = vrcp.f32 %v1207_v32  ;;  %2806 = vmatprep.mubr.msk.bf16.mxu1 %vm3117_vm0, %v3116_v0 }
 0x1ec   :  { %2958 = vpow2.f32 %v2392_v22  ;;  %v2393_v63 = vmul.f32 -1.442695, %v4005_v24  ;;  %v1318_v19 = vmul.f32 %v2947_v45, %v3955_v3 }
 0x1ed   :  { %v2949_v16 = vpop.eup %2948  ;;  %v954_v55 = vpop.f32.mrb[136].mxu0 }
 0x1ee   :  { %v2951_v39 = vpop.eup %2950  ;;  %v1319_v6 = vmul.f32 %v2949_v16, %v3960_v56  ;;  %2960 = vpow2.f32 %v2393_v63  ;;  %v1015_v54 = vadd.f32 %v954_v55, %v3793_v62  ;;  %v2740_v34 = vpop.f32.mrb[137].mxu0 }
 0x1ef   :  { %v1208_v35 = vadd.f32 1.0, %v2951_v39  ;;  %v957_v20 = vpop.f32.mrb[138].mxu0 }
 0x1f0   :  { %v2953_v44 = vpop.eup %2952  ;;  %v1345_v14 = vpack.c.bf16 %v1319_v6, %v1318_v19  ;;  %v4015_v17 = vadd.f32 %v3812_v12, %v1015_v54  ;;  %v1016_v40 = vadd.f32 %v957_v20, %v3795_v10  ;;  %v2741_v23 = vpop.f32.mrb[139].mxu0 }
 0x1f1   :  { %2962 = vrcp.f32 %v1208_v35  ;;  %v1209_v42 = vadd.f32 1.0, %v2953_v44 }
 0x1f2   :  { %v2394_v3 = vmul.f32 -1.442695, %v4015_v17  ;;  %v4020_v56 = vadd.f32 %v3812_v12, %v1016_v40  ;;  %2807 = vmatmul.mubr.msk.bf16.gmra.mrb[120].mxu1 %vm1392_vm2, %v1345_v14 }
 0x1f3   :  { %v2955_v62 = vpop.eup %2954  ;;  %2964 = vrcp.f32 %v1209_v42  ;;  %2810 = vmatprep.mubr.msk.bf16.mxu1 %vm3117_vm0, %v3116_v0 }
 0x1f4   :  { %2966 = vpow2.f32 %v2394_v3  ;;  %v2395_v46 = vmul.f32 -1.442695, %v4020_v56  ;;  %v1320_v50 = vmul.f32 %v2955_v62, %v3970_v27 }
 0x1f5   :  { %v2957_v47 = vpop.eup %2956  ;;  %v962_v10 = vpop.f32.mrb[140].mxu0 }
 0x1f6   :  { %v2959_v59 = vpop.eup %2958  ;;  %v1321_v49 = vmul.f32 %v2957_v47, %v3975_v30  ;;  %2968 = vpow2.f32 %v2395_v46  ;;  %v1017_v25 = vadd.f32 %v962_v10, %v3797_v18  ;;  %v2744_v57 = vpop.f32.mrb[141].mxu0 }
 0x1f7   :  { %v1210_v15 = vadd.f32 1.0, %v2959_v59  ;;  %v965_v52 = vpop.f32.mrb[142].mxu0 }
 0x1f8   :  { %v2961_v21 = vpop.eup %2960  ;;  %v1346_v53 = vpack.c.bf16 %v1321_v49, %v1320_v50  ;;  %v4030_v11 = vadd.f32 %v3812_v12, %v1017_v25  ;;  %v1018_v29 = vadd.f32 %v965_v52, %v3799_v26  ;;  %v2745_v60 = vpop.f32.mrb[143].mxu0 }
 0x1f9   :  { %2970 = vrcp.f32 %v1210_v15  ;;  %v1211_v4 = vadd.f32 1.0, %v2961_v21 }
 0x1fa   :  { %v2396_v27 = vmul.f32 -1.442695, %v4030_v11  ;;  %v4035_v30 = vadd.f32 %v3812_v12, %v1018_v29  ;;  %2811 = vmatmul.mubr.msk.bf16.gmra.mrb[124].mxu1 %vm1392_vm2, %v1346_v53 }
 0x1fb   :  { %v2963_v18 = vpop.eup %2962  ;;  %2972 = vrcp.f32 %v1211_v4  ;;  %2814 = vmatprep.mubr.msk.bf16.mxu1 %vm3117_vm0, %v3116_v0 }
 0x1fc   :  { %2974 = vpow2.f32 %v2396_v27  ;;  %v2397_v38 = vmul.f32 -1.442695, %v4035_v30  ;;  %v1322_v7 = vmul.f32 %v2963_v18, %v3985_v33 }
 0x1fd   :  { %v2965_v41 = vpop.eup %2964  ;;  %v970_v26 = vpop.f32.mrb[144].mxu0 }
 0x1fe   :  { %v2967_v61 = vpop.eup %2966  ;;  %v1323_v9 = vmul.f32 %v2965_v41, %v3990_v51  ;;  %2976 = vpow2.f32 %v2397_v38  ;;  %v1019_v28 = vadd.f32 %v970_v26, %v3801_v36  ;;  %v2748_v31 = vpop.f32.mrb[145].mxu0 }
 0x1ff   :  { %v1212_v1 = vadd.f32 1.0, %v2967_v61  ;;  %v973_v13 = vpop.f32.mrb[146].mxu0  ;;  %v4080_v61 = vld [vmem:[%s4898_s8] ss:$0 sm:$0xff] }
 0x200   :  { %v2969_v37 = vpop.eup %2968  ;;  %v1347_v43 = vpack.c.bf16 %v1323_v9, %v1322_v7  ;;  %v4045_v2 = vadd.f32 %v3812_v12, %v1019_v28  ;;  %v1020_v32 = vadd.f32 %v973_v13, %v3803_v48  ;;  %v2749_v22 = vpop.f32.mrb[147].mxu0 }
 0x201   :  { %2978 = vrcp.f32 %v1212_v1  ;;  %v1213_v45 = vadd.f32 1.0, %v2969_v37 }
 0x202   :  { %v2398_v33 = vmul.f32 -1.442695, %v4045_v2  ;;  %v1065_v51 = vadd.f32 %v3812_v12, %v1020_v32  ;;  %2815 = vmatmul.mubr.msk.bf16.gmra.mrb[128].mxu1 %vm1392_vm2, %v1347_v43 }
 0x203   :  { %v2971_v36 = vpop.eup %2970  ;;  %2980 = vrcp.f32 %v1213_v45  ;;  %2818 = vmatprep.mubr.msk.bf16.mxu1 %vm3117_vm0, %v3116_v0 }
 0x204   :  { %2982 = vpow2.f32 %v2398_v33  ;;  %v2399_v63 = vmul.f32 -1.442695, %v1065_v51  ;;  %v1324_v48 = vmul.f32 %v2971_v36, %v4000_v8 }
 0x205   :  { %v2973_v16 = vpop.eup %2972  ;;  %v978_v55 = vpop.f32.mrb[148].mxu0 }
 0x206   :  { %v2975_v39 = vpop.eup %2974  ;;  %v1325_v19 = vmul.f32 %v2973_v16, %v4005_v24  ;;  %2984 = vpow2.f32 %v2399_v63  ;;  %v1021_v6 = vadd.f32 %v978_v55, %v3805_v58  ;;  %v2752_v54 = vpop.f32.mrb[149].mxu0 }
 0x207   :  { %v1214_v34 = vadd.f32 1.0, %v2975_v39  ;;  %v981_v35 = vpop.f32.mrb[150].mxu0 }
 0x208   :  { %v2977_v20 = vpop.eup %2976  ;;  %v1348_v44 = vpack.c.bf16 %v1325_v19, %v1324_v48  ;;  %v1066_v14 = vadd.f32 %v3812_v12, %v1021_v6  ;;  %v1022_v40 = vadd.f32 %v981_v35, %v3807_v5  ;;  %v2753_v23 = vpop.f32.mrb[151].mxu0 }
 0x209   :  { %2986 = vrcp.f32 %v1214_v34  ;;  %v1215_v42 = vadd.f32 1.0, %v2977_v20 }
 0x20a   :  { %v2400_v3 = vmul.f32 -1.442695, %v1066_v14  ;;  %v1067_v8 = vadd.f32 %v3812_v12, %v1022_v40  ;;  %2819 = vmatmul.mubr.msk.bf16.gmra.mrb[132].mxu1 %vm1392_vm2, %v1348_v44 }
 0x20b   :  { %v2979_v24 = vpop.eup %2978  ;;  %2988 = vrcp.f32 %v1215_v42  ;;  %2822 = vmatprep.mubr.msk.bf16.mxu1 %vm3117_vm0, %v3116_v0 }
 0x20c   :  { %2990 = vpow2.f32 %v2400_v3  ;;  %v2401_v58 = vmul.f32 -1.442695, %v1067_v8  ;;  %v1326_v47 = vmul.f32 %v2979_v24, %v4015_v17 }
 0x20d   :  { %v2981_v62 = vpop.eup %2980 }
 0x20e   :  { %v2983_v46 = vpop.eup %2982  ;;  %v1327_v5 = vmul.f32 %v2981_v62, %v4020_v56  ;;  %2992 = vpow2.f32 %v2401_v58 }
 0x20f   :  { %v1216_v10 = vadd.f32 1.0, %v2983_v46 }
 0x210   :  { %v2985_v59 = vpop.eup %2984  ;;  %v1349_v50 = vpack.c.bf16 %v1327_v5, %v1326_v47 }
 0x211   :  { %2994 = vrcp.f32 %v1216_v10  ;;  %v1217_v12 = vadd.f32 1.0, %v2985_v59 }
 0x212   :  { %2823 = vmatmul.mubr.msk.bf16.gmra.mrb[136].mxu1 %vm1392_vm2, %v1349_v50 }
 0x213   :  { %v2987_v49 = vpop.eup %2986  ;;  %2996 = vrcp.f32 %v1217_v12  ;;  %2826 = vmatprep.mubr.msk.bf16.mxu1 %vm3117_vm0, %v3116_v0 }
 0x214   :  { %v1328_v15 = vmul.f32 %v2987_v49, %v4030_v11 }
 0x215   :  { %v2989_v25 = vpop.eup %2988 }
 0x216   :  { %v2991_v57 = vpop.eup %2990  ;;  %v1329_v17 = vmul.f32 %v2989_v25, %v4035_v30 }
 0x217   :  { %v1218_v56 = vadd.f32 1.0, %v2991_v57 }
 0x218   :  { %v2993_v52 = vpop.eup %2992  ;;  %v1350_v21 = vpack.c.bf16 %v1329_v17, %v1328_v15 }
 0x219   :  { %2998 = vrcp.f32 %v1218_v56  ;;  %v1219_v53 = vadd.f32 1.0, %v2993_v52 }
 0x21a   :  { %2827 = vmatmul.mubr.msk.bf16.gmra.mrb[140].mxu1 %vm1392_vm2, %v1350_v21 }
 0x21b   :  { %v2995_v29 = vpop.eup %2994  ;;  %3000 = vrcp.f32 %v1219_v53  ;;  %2830 = vmatprep.mubr.msk.bf16.mxu1 %vm3117_vm0, %v3116_v0 }
 0x21c   :  { %v1330_v4 = vmul.f32 %v2995_v29, %v4045_v2 }
 0x21d   :  { %v2997_v60 = vpop.eup %2996 }
 0x21e   :  { %v1331_v27 = vmul.f32 %v2997_v60, %v1065_v51 }
 0x220   :  { %v1351_v18 = vpack.c.bf16 %v1331_v27, %v1330_v4 }
 0x222   :  { %2831 = vmatmul.mubr.msk.bf16.gmra.mrb[144].mxu1 %vm1392_vm2, %v1351_v18 }
 0x223   :  { %v2999_v11 = vpop.eup %2998  ;;  %2834 = vmatprep.mubr.msk.bf16.mxu1 %vm3117_vm0, %v3116_v0 }
 0x224   :  { %v1332_v38 = vmul.f32 %v2999_v11, %v1066_v14 }
 0x225   :  { %v3001_v30 = vpop.eup %3000 }
 0x226   :  { %v1333_v41 = vmul.f32 %v3001_v30, %v1067_v8 }
 0x228   :  { %v1352_v26 = vpack.c.bf16 %v1333_v41, %v1332_v38 }
 0x22a   :  { %2835 = vmatmul.mubr.msk.bf16.gmra.mrb[148].mxu1 %vm1392_vm2, %v1352_v26 }
 0x26d   :  { %v1484_v7 = vpop.f32.mrb[76].mxu1 }
 0x26e   :  { %v4083_v9 = vadd.f32 %v4080_v61, %v1484_v7  ;;  %v2764_v28 = vpop.f32.mrb[77].mxu1 }
 0x26f   :  { %v1487_v31 = vpop.f32.mrb[78].mxu1 }
 0x270   :  { %v4086_v1 = vadd.f32 %v4080_v61, %v1487_v31  ;;  %v2765_v0 = vpop.f32.mrb[79].mxu1  ;;  %v1635_v13 = vsel %vm173_vm1, %v4083_v9, 0.0 }
 0x271   :  { %1636 = vadd.xlane.f32.xlu0 %v1635_v13 }
 0x272   :  { %v1638_v37 = vsel %vm173_vm1, %v4086_v1, 0.0 }
 0x275   :  { %1639 = vadd.xlane.f32.xlu0 %v1638_v37  ;;  %v1492_v43 = vpop.f32.mrb[80].mxu1 }
 0x276   :  { %v4093_v2 = vadd.f32 %v4080_v61, %v1492_v43  ;;  %v2768_v32 = vpop.f32.mrb[81].mxu1 }
 0x277   :  { %v1495_v22 = vpop.f32.mrb[82].mxu1 }
 0x278   :  { %v4096_v45 = vadd.f32 %v4080_v61, %v1495_v22  ;;  %v2769_v33 = vpop.f32.mrb[83].mxu1  ;;  %v1641_v51 = vsel %vm173_vm1, %v4093_v2, 0.0 }
 0x279   :  { %1642 = vadd.xlane.f32.xlu1 %v1641_v51 }
 0x27a   :  { %v1644_v36 = vsel %vm173_vm1, %v4096_v45, 0.0 }
 0x27d   :  { %1645 = vadd.xlane.f32.xlu1 %v1644_v36  ;;  %v1500_v63 = vpop.f32.mrb[84].mxu1 }
 0x27e   :  { %v4103_v16 = vadd.f32 %v4080_v61, %v1500_v63  ;;  %v2772_v55 = vpop.f32.mrb[85].mxu1 }
 0x27f   :  { %v1503_v39 = vpop.f32.mrb[86].mxu1 }
 0x280   :  { %v4106_v48 = vadd.f32 %v4080_v61, %v1503_v39  ;;  %v2773_v19 = vpop.f32.mrb[87].mxu1  ;;  %v1647_v6 = vsel %vm173_vm1, %v4103_v16, 0.0 }
 0x281   :  { %1648 = vadd.xlane.f32.xlu0 %v1647_v6 }
 0x282   :  { %v1650_v54 = vsel %vm173_vm1, %v4106_v48, 0.0 }
 0x283   :  { %1651 = vadd.xlane.f32.xlu1 %v1650_v54 }
 0x285   :  { %v1508_v34 = vpop.f32.mrb[88].mxu1 }
 0x286   :  { %v4113_v35 = vadd.f32 %v4080_v61, %v1508_v34  ;;  %v2776_v20 = vpop.f32.mrb[89].mxu1 }
 0x287   :  { %v1511_v44 = vpop.f32.mrb[90].mxu1 }
 0x288   :  { %v4116_v14 = vadd.f32 %v4080_v61, %v1511_v44  ;;  %v2777_v40 = vpop.f32.mrb[91].mxu1  ;;  %v1653_v23 = vsel %vm173_vm1, %v4113_v35, 0.0 }
 0x289   :  { %1654 = vadd.xlane.f32.xlu0 %v1653_v23 }
 0x28a   :  { %v1656_v42 = vsel %vm173_vm1, %v4116_v14, 0.0 }
 0x28b   :  { %1657 = vadd.xlane.f32.xlu1 %v1656_v42 }
 0x28d   :  { %v1516_v3 = vpop.f32.mrb[92].mxu1 }
 0x28e   :  { %v4123_v8 = vadd.f32 %v4080_v61, %v1516_v3  ;;  %v2780_v24 = vpop.f32.mrb[93].mxu1 }
 0x28f   :  { %v1519_v58 = vpop.f32.mrb[94].mxu1 }
 0x290   :  { %v4126_v62 = vadd.f32 %v4080_v61, %v1519_v58  ;;  %v2781_v46 = vpop.f32.mrb[95].mxu1  ;;  %v1659_v47 = vsel %vm173_vm1, %v4123_v8, 0.0 }
 0x291   :  { %1660 = vadd.xlane.f32.xlu0 %v1659_v47 }
 0x292   :  { %v1662_v5 = vsel %vm173_vm1, %v4126_v62, 0.0 }
 0x293   :  { %1663 = vadd.xlane.f32.xlu1 %v1662_v5 }
 0x295   :  { %v1524_v10 = vpop.f32.mrb[96].mxu1 }
 0x296   :  { %v4133_v59 = vadd.f32 %v4080_v61, %v1524_v10  ;;  %v2784_v50 = vpop.f32.mrb[97].mxu1 }
 0x297   :  { %v1527_v12 = vpop.f32.mrb[98].mxu1 }
 0x298   :  { %v4136_v49 = vadd.f32 %v4080_v61, %v1527_v12  ;;  %v2785_v25 = vpop.f32.mrb[99].mxu1  ;;  %v1665_v57 = vsel %vm173_vm1, %v4133_v59, 0.0 }
 0x299   :  { %1666 = vadd.xlane.f32.xlu0 %v1665_v57 }
 0x29a   :  { %v1668_v15 = vsel %vm173_vm1, %v4136_v49, 0.0 }
 0x29b   :  { %1669 = vadd.xlane.f32.xlu1 %v1668_v15 }
 0x29d   :  { %v1532_v17 = vpop.f32.mrb[100].mxu1 }
 0x29e   :  { %v4143_v56 = vadd.f32 %v4080_v61, %v1532_v17  ;;  %v2788_v52 = vpop.f32.mrb[101].mxu1 }
 0x29f   :  { %v1535_v21 = vpop.f32.mrb[102].mxu1 }
 0x2a0   :  { %v4146_v53 = vadd.f32 %v4080_v61, %v1535_v21  ;;  %v2789_v29 = vpop.f32.mrb[103].mxu1  ;;  %v1671_v60 = vsel %vm173_vm1, %v4143_v56, 0.0 }
 0x2a1   :  { %1672 = vadd.xlane.f32.xlu0 %v1671_v60 }
 0x2a2   :  { %v1674_v4 = vsel %vm173_vm1, %v4146_v53, 0.0 }
 0x2a3   :  { %1675 = vadd.xlane.f32.xlu1 %v1674_v4 }
 0x2a5   :  { %v1540_v27 = vpop.f32.mrb[104].mxu1 }
 0x2a6   :  { %v4153_v18 = vadd.f32 %v4080_v61, %v1540_v27  ;;  %v2792_v11 = vpop.f32.mrb[105].mxu1 }
 0x2a7   :  { %v1543_v30 = vpop.f32.mrb[106].mxu1 }
 0x2a8   :  { %v4156_v38 = vadd.f32 %v4080_v61, %v1543_v30  ;;  %v2793_v41 = vpop.f32.mrb[107].mxu1  ;;  %v1677_v26 = vsel %vm173_vm1, %v4153_v18, 0.0 }
 0x2a9   :  { %1678 = vadd.xlane.f32.xlu0 %v1677_v26 }
 0x2aa   :  { %v1680_v7 = vsel %vm173_vm1, %v4156_v38, 0.0 }
 0x2ab   :  { %1681 = vadd.xlane.f32.xlu1 %v1680_v7 }
 0x2ad   :  { %v1548_v28 = vpop.f32.mrb[108].mxu1 }
 0x2ae   :  { %v4163_v31 = vadd.f32 %v4080_v61, %v1548_v28  ;;  %v2796_v0 = vpop.f32.mrb[109].mxu1 }
 0x2af   :  { %v1551_v13 = vpop.f32.mrb[110].mxu1 }
 0x2b0   :  { %v4166_v37 = vadd.f32 %v4080_v61, %v1551_v13  ;;  %v2797_v43 = vpop.f32.mrb[111].mxu1  ;;  %v1683_v32 = vsel %vm173_vm1, %v4163_v31, 0.0 }
 0x2b1   :  { %1684 = vadd.xlane.f32.xlu0 %v1683_v32 }
 0x2b2   :  { %v1686_v22 = vsel %vm173_vm1, %v4166_v37, 0.0 }
 0x2b3   :  { %1687 = vadd.xlane.f32.xlu1 %v1686_v22 }
 0x2b5   :  { %v1556_v33 = vpop.f32.mrb[112].mxu1 }
 0x2b6   :  { %v4173_v51 = vadd.f32 %v4080_v61, %v1556_v33  ;;  %v2800_v36 = vpop.f32.mrb[113].mxu1 }
 0x2b7   :  { %v1559_v63 = vpop.f32.mrb[114].mxu1 }
 0x2b8   :  { %v4176_v55 = vadd.f32 %v4080_v61, %v1559_v63  ;;  %v2801_v39 = vpop.f32.mrb[115].mxu1  ;;  %v1689_v19 = vsel %vm173_vm1, %v4173_v51, 0.0 }
 0x2b9   :  { %1690 = vadd.xlane.f32.xlu0 %v1689_v19 }
 0x2ba   :  { %v1692_v6 = vsel %vm173_vm1, %v4176_v55, 0.0 }
 0x2bb   :  { %1693 = vadd.xlane.f32.xlu1 %v1692_v6 }
 0x2bd   :  { %v1564_v54 = vpop.f32.mrb[116].mxu1 }
 0x2be   :  { %v4183_v34 = vadd.f32 %v4080_v61, %v1564_v54  ;;  %v2804_v20 = vpop.f32.mrb[117].mxu1 }
 0x2bf   :  { %v1567_v44 = vpop.f32.mrb[118].mxu1 }
 0x2c0   :  { %v4186_v40 = vadd.f32 %v4080_v61, %v1567_v44  ;;  %v2805_v23 = vpop.f32.mrb[119].mxu1  ;;  %v1695_v42 = vsel %vm173_vm1, %v4183_v34, 0.0 }
 0x2c1   :  { %1696 = vadd.xlane.f32.xlu0 %v1695_v42 }
 0x2c2   :  { %v1698_v3 = vsel %vm173_vm1, %v4186_v40, 0.0 }
 0x2c3   :  { %1699 = vadd.xlane.f32.xlu1 %v1698_v3 }
 0x2c5   :  { %v1572_v24 = vpop.f32.mrb[120].mxu1 }
 0x2c6   :  { %v4193_v58 = vadd.f32 %v4080_v61, %v1572_v24  ;;  %v2808_v46 = vpop.f32.mrb[121].mxu1 }
 0x2c7   :  { %v1575_v47 = vpop.f32.mrb[122].mxu1 }
 0x2c8   :  { %v4196_v5 = vadd.f32 %v4080_v61, %v1575_v47  ;;  %v2809_v10 = vpop.f32.mrb[123].mxu1  ;;  %v1701_v50 = vsel %vm173_vm1, %v4193_v58, 0.0 }
 0x2c9   :  { %1702 = vadd.xlane.f32.xlu0 %v1701_v50 }
 0x2ca   :  { %v1704_v12 = vsel %vm173_vm1, %v4196_v5, 0.0 }
 0x2cb   :  { %1705 = vadd.xlane.f32.xlu1 %v1704_v12 }
 0x2cd   :  { %v1580_v25 = vpop.f32.mrb[124].mxu1 }
 0x2ce   :  { %v4203_v57 = vadd.f32 %v4080_v61, %v1580_v25  ;;  %v2812_v15 = vpop.f32.mrb[125].mxu1 }
 0x2cf   :  { %v1583_v17 = vpop.f32.mrb[126].mxu1 }
 0x2d0   :  { %v4206_v52 = vadd.f32 %v4080_v61, %v1583_v17  ;;  %v2813_v21 = vpop.f32.mrb[127].mxu1  ;;  %v1707_v29 = vsel %vm173_vm1, %v4203_v57, 0.0 }
 0x2d1   :  { %1708 = vadd.xlane.f32.xlu0 %v1707_v29 }
 0x2d2   :  { %v1710_v60 = vsel %vm173_vm1, %v4206_v52, 0.0 }
 0x2d3   :  { %1711 = vadd.xlane.f32.xlu1 %v1710_v60 }
 0x2d5   :  { %v1588_v4 = vpop.f32.mrb[128].mxu1 }
 0x2d6   :  { %v4213_v27 = vadd.f32 %v4080_v61, %v1588_v4  ;;  %v2816_v11 = vpop.f32.mrb[129].mxu1 }
 0x2d7   :  { %v1591_v30 = vpop.f32.mrb[130].mxu1 }
 0x2d8   :  { %v4216_v41 = vadd.f32 %v4080_v61, %v1591_v30  ;;  %v2817_v26 = vpop.f32.mrb[131].mxu1  ;;  %v1713_v7 = vsel %vm173_vm1, %v4213_v27, 0.0 }
 0x2d9   :  { %1714 = vadd.xlane.f32.xlu0 %v1713_v7 }
 0x2da   :  { %v1716_v28 = vsel %vm173_vm1, %v4216_v41, 0.0 }
 0x2db   :  { %1717 = vadd.xlane.f32.xlu1 %v1716_v28 }
 0x2dd   :  { %v1596_v0 = vpop.f32.mrb[132].mxu1 }
 0x2de   :  { %v4223_v13 = vadd.f32 %v4080_v61, %v1596_v0  ;;  %v2820_v43 = vpop.f32.mrb[133].mxu1 }
 0x2df   :  { %v1599_v32 = vpop.f32.mrb[134].mxu1 }
 0x2e0   :  { %v4226_v22 = vadd.f32 %v4080_v61, %v1599_v32  ;;  %v2821_v33 = vpop.f32.mrb[135].mxu1  ;;  %v1719_v36 = vsel %vm173_vm1, %v4223_v13, 0.0 }
 0x2e1   :  { %1720 = vadd.xlane.f32.xlu0 %v1719_v36 }
 0x2e2   :  { %v1722_v63 = vsel %vm173_vm1, %v4226_v22, 0.0 }
 0x2e3   :  { %1723 = vadd.xlane.f32.xlu1 %v1722_v63 }
 0x2e5   :  { %v1604_v39 = vpop.f32.mrb[136].mxu1 }
 0x2e6   :  { %v4233_v19 = vadd.f32 %v4080_v61, %v1604_v39  ;;  %v2824_v6 = vpop.f32.mrb[137].mxu1 }
 0x2e7   :  { %v1607_v54 = vpop.f32.mrb[138].mxu1 }
 0x2e8   :  { %v4236_v20 = vadd.f32 %v4080_v61, %v1607_v54  ;;  %v2825_v44 = vpop.f32.mrb[139].mxu1  ;;  %v1725_v23 = vsel %vm173_vm1, %v4233_v19, 0.0 }
 0x2e9   :  { %1726 = vadd.xlane.f32.xlu0 %v1725_v23 }
 0x2ea   :  { %v1728_v42 = vsel %vm173_vm1, %v4236_v20, 0.0 }
 0x2eb   :  { %1729 = vadd.xlane.f32.xlu1 %v1728_v42 }
 0x2ed   :  { %v1612_v3 = vpop.f32.mrb[140].mxu1 }
 0x2ee   :  { %v4243_v24 = vadd.f32 %v4080_v61, %v1612_v3  ;;  %v2828_v46 = vpop.f32.mrb[141].mxu1 }
 0x2ef   :  { %v1615_v47 = vpop.f32.mrb[142].mxu1 }
 0x2f0   :  { %v4246_v10 = vadd.f32 %v4080_v61, %v1615_v47  ;;  %v2829_v50 = vpop.f32.mrb[143].mxu1  ;;  %v1731_v12 = vsel %vm173_vm1, %v4243_v24, 0.0 }
 0x2f1   :  { %1732 = vadd.xlane.f32.xlu0 %v1731_v12 }
 0x2f2   :  { %v1734_v25 = vsel %vm173_vm1, %v4246_v10, 0.0 }
 0x2f3   :  { %1735 = vadd.xlane.f32.xlu1 %v1734_v25 }
 0x2f5   :  { %v1620_v15 = vpop.f32.mrb[144].mxu1 }
 0x2f6   :  { %v4253_v17 = vadd.f32 %v4080_v61, %v1620_v15  ;;  %v2832_v21 = vpop.f32.mrb[145].mxu1 }
 0x2f7   :  { %v1623_v29 = vpop.f32.mrb[146].mxu1 }
 0x2f8   :  { %v4256_v60 = vadd.f32 %v4080_v61, %v1623_v29  ;;  %v2833_v4 = vpop.f32.mrb[147].mxu1  ;;  %v1737_v11 = vsel %vm173_vm1, %v4253_v17, 0.0 }
 0x2f9   :  { %1738 = vadd.xlane.f32.xlu0 %v1737_v11 }
 0x2fa   :  { %v1740_v30 = vsel %vm173_vm1, %v4256_v60, 0.0 }
 0x2fb   :  { %1741 = vadd.xlane.f32.xlu1 %v1740_v30 }
 0x2fd   :  { %v1628_v26 = vpop.f32.mrb[148].mxu1 }
 0x2fe   :  { %v4263_v7 = vadd.f32 %v4080_v61, %v1628_v26  ;;  %v1637_v28 = vpop.xlane.xlu0 %1636  ;;  %v2836_v0 = vpop.f32.mrb[149].mxu1 }
 0x2ff   :  { %v1750_v43 = vmul.f32 0.03125, %v1637_v28  ;;  %v1631_v32 = vpop.f32.mrb[150].mxu1 }
 0x300   :  { %v4266_v33 = vadd.f32 %v4080_v61, %v1631_v32  ;;  %v2837_v36 = vpop.f32.mrb[151].mxu1  ;;  %v1743_v63 = vsel %vm173_vm1, %v4263_v7, 0.0 }
 0x301   :  { %v4271_v39 = vsub.f32 %v4083_v9, %v1750_v43  ;;  %1744 = vadd.xlane.f32.xlu0 %v1743_v63 }
 0x302   :  { %v1640_v6 = vpop.xlane.xlu0 %1639  ;;  %v1746_v54 = vsel %vm173_vm1, %v4266_v33, 0.0 }
 0x303   :  { %v1751_v44 = vmul.f32 0.03125, %v1640_v6  ;;  %1747 = vadd.xlane.f32.xlu1 %v1746_v54  ;;  %v1826_v23 = vmul.f32 %v4271_v39, %v4271_v39 }
 0x305   :  { %v4278_v61 = vsub.f32 %v4086_v1, %v1751_v44  ;;  %v1864_v42 = vsel %vm173_vm1, %v1826_v23, 0.0 }
 0x306   :  { %v1643_v3 = vpop.xlane.xlu1 %1642  ;;  %1865 = vadd.xlane.f32.xlu0 %v1864_v42 }
 0x307   :  { %v1752_v46 = vmul.f32 0.03125, %v1643_v3  ;;  %v1827_v9 = vmul.f32 %v4278_v61, %v4278_v61 }
 0x309   :  { %v4284_v47 = vsub.f32 %v4093_v2, %v1752_v46  ;;  %v1867_v50 = vsel %vm173_vm1, %v1827_v9, 0.0 }
 0x30a   :  { %v1646_v12 = vpop.xlane.xlu1 %1645  ;;  %1868 = vadd.xlane.f32.xlu1 %v1867_v50 }
 0x30b   :  { %v1753_v25 = vmul.f32 0.03125, %v1646_v12  ;;  %v1828_v1 = vmul.f32 %v4284_v47, %v4284_v47 }
 0x30d   :  { %v4290_v15 = vsub.f32 %v4096_v45, %v1753_v25  ;;  %v1870_v21 = vsel %vm173_vm1, %v1828_v1, 0.0 }
 0x30e   :  { %v1649_v29 = vpop.xlane.xlu0 %1648  ;;  %1871 = vadd.xlane.f32.xlu0 %v1870_v21 }
 0x30f   :  { %v1754_v4 = vmul.f32 0.03125, %v1649_v29  ;;  %v1829_v2 = vmul.f32 %v4290_v15, %v4290_v15 }
 0x310   :  { %v1652_v11 = vpop.xlane.xlu1 %1651 }
 0x311   :  { %v4296_v30 = vsub.f32 %v4103_v16, %v1754_v4  ;;  %v1755_v26 = vmul.f32 0.03125, %v1652_v11  ;;  %v1873_v28 = vsel %vm173_vm1, %v1829_v2, 0.0 }
 0x312   :  { %1874 = vadd.xlane.f32.xlu1 %v1873_v28 }
 0x313   :  { %v4300_v0 = vsub.f32 %v4106_v48, %v1755_v26  ;;  %v1830_v45 = vmul.f32 %v4296_v30, %v4296_v30 }
 0x315   :  { %v1876_v43 = vsel %vm173_vm1, %v1830_v45, 0.0  ;;  %v1831_v32 = vmul.f32 %v4300_v0, %v4300_v0 }
 0x316   :  { %v1655_v36 = vpop.xlane.xlu0 %1654  ;;  %1877 = vadd.xlane.f32.xlu0 %v1876_v43 }
 0x317   :  { %v1756_v63 = vmul.f32 0.03125, %v1655_v36  ;;  %v1879_v16 = vsel %vm173_vm1, %v1831_v32, 0.0 }
 0x318   :  { %v1658_v6 = vpop.xlane.xlu1 %1657  ;;  %1880 = vadd.xlane.f32.xlu1 %v1879_v16 }
 0x319   :  { %v4309_v54 = vsub.f32 %v4113_v35, %v1756_v63  ;;  %v1757_v48 = vmul.f32 0.03125, %v1658_v6 }
 0x31b   :  { %v4312_v44 = vsub.f32 %v4116_v14, %v1757_v48  ;;  %v1832_v23 = vmul.f32 %v4309_v54, %v4309_v54 }
 0x31d   :  { %v1882_v42 = vsel %vm173_vm1, %v1832_v23, 0.0  ;;  %v1833_v3 = vmul.f32 %v4312_v44, %v4312_v44 }
 0x31e   :  { %v1661_v46 = vpop.xlane.xlu0 %1660  ;;  %1883 = vadd.xlane.f32.xlu0 %v1882_v42 }
 0x31f   :  { %v1758_v9 = vmul.f32 0.03125, %v1661_v46  ;;  %v1885_v50 = vsel %vm173_vm1, %v1833_v3, 0.0 }
 0x320   :  { %v1664_v12 = vpop.xlane.xlu1 %1663  ;;  %1886 = vadd.xlane.f32.xlu1 %v1885_v50 }
 0x321   :  { %v4321_v35 = vsub.f32 %v4123_v8, %v1758_v9  ;;  %v1759_v14 = vmul.f32 0.03125, %v1664_v12 }
 0x323   :  { %v4324_v25 = vsub.f32 %v4126_v62, %v1759_v14  ;;  %v1834_v1 = vmul.f32 %v4321_v35, %v4321_v35 }
 0x325   :  { %v1888_v21 = vsel %vm173_vm1, %v1834_v1, 0.0  ;;  %v1835_v29 = vmul.f32 %v4324_v25, %v4324_v25 }
 0x326   :  { %v1667_v4 = vpop.xlane.xlu0 %1666  ;;  %1889 = vadd.xlane.f32.xlu0 %v1888_v21 }
 0x327   :  { %v1760_v2 = vmul.f32 0.03125, %v1667_v4  ;;  %v1891_v11 = vsel %vm173_vm1, %v1835_v29, 0.0 }
 0x328   :  { %v1670_v26 = vpop.xlane.xlu1 %1669  ;;  %1892 = vadd.xlane.f32.xlu1 %v1891_v11 }
 0x329   :  { %v4333_v8 = vsub.f32 %v4133_v59, %v1760_v2  ;;  %v1761_v62 = vmul.f32 0.03125, %v1670_v26 }
 0x32b   :  { %v4336_v28 = vsub.f32 %v4136_v49, %v1761_v62  ;;  %v1836_v45 = vmul.f32 %v4333_v8, %v4333_v8 }
 0x32d   :  { %v1894_v43 = vsel %vm173_vm1, %v1836_v45, 0.0  ;;  %v1837_v32 = vmul.f32 %v4336_v28, %v4336_v28 }
 0x32e   :  { %v1673_v36 = vpop.xlane.xlu0 %1672  ;;  %1895 = vadd.xlane.f32.xlu0 %v1894_v43 }
 0x32f   :  { %v1762_v63 = vmul.f32 0.03125, %v1673_v36  ;;  %v1897_v16 = vsel %vm173_vm1, %v1837_v32, 0.0 }
 0x330   :  { %v1676_v6 = vpop.xlane.xlu1 %1675  ;;  %1898 = vadd.xlane.f32.xlu1 %v1897_v16 }
 0x331   :  { %v4345_v59 = vsub.f32 %v4143_v56, %v1762_v63  ;;  %v1763_v49 = vmul.f32 0.03125, %v1676_v6 }
 0x333   :  { %v4348_v48 = vsub.f32 %v4146_v53, %v1763_v49  ;;  %v1838_v23 = vmul.f32 %v4345_v59, %v4345_v59 }
 0x335   :  { %v1900_v42 = vsel %vm173_vm1, %v1838_v23, 0.0  ;;  %v1839_v3 = vmul.f32 %v4348_v48, %v4348_v48 }
 0x336   :  { %v1679_v46 = vpop.xlane.xlu0 %1678  ;;  %1901 = vadd.xlane.f32.xlu0 %v1900_v42 }
 0x337   :  { %v1764_v9 = vmul.f32 0.03125, %v1679_v46  ;;  %v1903_v50 = vsel %vm173_vm1, %v1839_v3, 0.0 }
 0x338   :  { %v1682_v12 = vpop.xlane.xlu1 %1681  ;;  %1904 = vadd.xlane.f32.xlu1 %v1903_v50 }
 0x339   :  { %v4357_v56 = vsub.f32 %v4153_v18, %v1764_v9  ;;  %v1765_v53 = vmul.f32 0.03125, %v1682_v12 }
 0x33b   :  { %v4360_v14 = vsub.f32 %v4156_v38, %v1765_v53  ;;  %v1840_v1 = vmul.f32 %v4357_v56, %v4357_v56 }
 0x33d   :  { %v1906_v21 = vsel %vm173_vm1, %v1840_v1, 0.0  ;;  %v1841_v29 = vmul.f32 %v4360_v14, %v4360_v14 }
 0x33e   :  { %v1685_v4 = vpop.xlane.xlu0 %1684  ;;  %1907 = vadd.xlane.f32.xlu0 %v1906_v21 }
 0x33f   :  { %v1766_v2 = vmul.f32 0.03125, %v1685_v4  ;;  %v1909_v11 = vsel %vm173_vm1, %v1841_v29, 0.0 }
 0x340   :  { %v1688_v26 = vpop.xlane.xlu1 %1687  ;;  %1910 = vadd.xlane.f32.xlu1 %v1909_v11 }
 0x341   :  { %v4369_v18 = vsub.f32 %v4163_v31, %v1766_v2  ;;  %v1767_v38 = vmul.f32 0.03125, %v1688_v26 }
 0x343   :  { %v4372_v62 = vsub.f32 %v4166_v37, %v1767_v38  ;;  %v1842_v45 = vmul.f32 %v4369_v18, %v4369_v18 }
 0x345   :  { %v1912_v43 = vsel %vm173_vm1, %v1842_v45, 0.0  ;;  %v1843_v32 = vmul.f32 %v4372_v62, %v4372_v62 }
 0x346   :  { %v1691_v36 = vpop.xlane.xlu0 %1690  ;;  %1913 = vadd.xlane.f32.xlu0 %v1912_v43 }
 0x347   :  { %v1768_v63 = vmul.f32 0.03125, %v1691_v36  ;;  %v1915_v16 = vsel %vm173_vm1, %v1843_v32, 0.0 }
 0x348   :  { %v1694_v6 = vpop.xlane.xlu1 %1693  ;;  %1916 = vadd.xlane.f32.xlu1 %v1915_v16 }
 0x349   :  { %v4381_v31 = vsub.f32 %v4173_v51, %v1768_v63  ;;  %v1769_v37 = vmul.f32 0.03125, %v1694_v6 }
 0x34b   :  { %v4384_v49 = vsub.f32 %v4176_v55, %v1769_v37  ;;  %v1844_v23 = vmul.f32 %v4381_v31, %v4381_v31 }
 0x34d   :  { %v1918_v42 = vsel %vm173_vm1, %v1844_v23, 0.0  ;;  %v1845_v3 = vmul.f32 %v4384_v49, %v4384_v49 }
 0x34e   :  { %v1697_v46 = vpop.xlane.xlu0 %1696  ;;  %1919 = vadd.xlane.f32.xlu0 %v1918_v42 }
 0x34f   :  { %v1770_v9 = vmul.f32 0.03125, %v1697_v46  ;;  %v1921_v50 = vsel %vm173_vm1, %v1845_v3, 0.0 }
 0x350   :  { %v1700_v12 = vpop.xlane.xlu1 %1699  ;;  %1922 = vadd.xlane.f32.xlu1 %v1921_v50 }
 0x351   :  { %v4393_v51 = vsub.f32 %v4183_v34, %v1770_v9  ;;  %v1771_v55 = vmul.f32 0.03125, %v1700_v12 }
 0x353   :  { %v4396_v53 = vsub.f32 %v4186_v40, %v1771_v55  ;;  %v1846_v1 = vmul.f32 %v4393_v51, %v4393_v51 }
 0x355   :  { %v1924_v21 = vsel %vm173_vm1, %v1846_v1, 0.0  ;;  %v1847_v29 = vmul.f32 %v4396_v53, %v4396_v53 }
 0x356   :  { %v1703_v4 = vpop.xlane.xlu0 %1702  ;;  %1925 = vadd.xlane.f32.xlu0 %v1924_v21 }
 0x357   :  { %v1772_v2 = vmul.f32 0.03125, %v1703_v4  ;;  %v1927_v11 = vsel %vm173_vm1, %v1847_v29, 0.0 }
 0x358   :  { %v1706_v26 = vpop.xlane.xlu1 %1705  ;;  %1928 = vadd.xlane.f32.xlu1 %v1927_v11 }
 0x359   :  { %v4405_v34 = vsub.f32 %v4193_v58, %v1772_v2  ;;  %v1773_v40 = vmul.f32 0.03125, %v1706_v26 }
 0x35b   :  { %v4408_v38 = vsub.f32 %v4196_v5, %v1773_v40  ;;  %v1848_v45 = vmul.f32 %v4405_v34, %v4405_v34 }
 0x35d   :  { %v1930_v43 = vsel %vm173_vm1, %v1848_v45, 0.0  ;;  %v1849_v32 = vmul.f32 %v4408_v38, %v4408_v38 }
 0x35e   :  { %v1709_v36 = vpop.xlane.xlu0 %1708  ;;  %1931 = vadd.xlane.f32.xlu0 %v1930_v43 }
 0x35f   :  { %v1774_v63 = vmul.f32 0.03125, %v1709_v36  ;;  %v1933_v16 = vsel %vm173_vm1, %v1849_v32, 0.0 }
 0x360   :  { %v1712_v6 = vpop.xlane.xlu1 %1711  ;;  %1934 = vadd.xlane.f32.xlu1 %v1933_v16 }
 0x361   :  { %v4417_v58 = vsub.f32 %v4203_v57, %v1774_v63  ;;  %v1775_v5 = vmul.f32 0.03125, %v1712_v6 }
 0x363   :  { %v4420_v37 = vsub.f32 %v4206_v52, %v1775_v5  ;;  %v1850_v23 = vmul.f32 %v4417_v58, %v4417_v58 }
 0x365   :  { %v1936_v42 = vsel %vm173_vm1, %v1850_v23, 0.0  ;;  %v1851_v3 = vmul.f32 %v4420_v37, %v4420_v37 }
 0x366   :  { %v1715_v46 = vpop.xlane.xlu0 %1714  ;;  %1937 = vadd.xlane.f32.xlu0 %v1936_v42 }
 0x367   :  { %v1776_v9 = vmul.f32 0.03125, %v1715_v46  ;;  %v1939_v50 = vsel %vm173_vm1, %v1851_v3, 0.0 }
 0x368   :  { %v1718_v12 = vpop.xlane.xlu1 %1717  ;;  %1940 = vadd.xlane.f32.xlu1 %v1939_v50 }
 0x369   :  { %v4429_v57 = vsub.f32 %v4213_v27, %v1776_v9  ;;  %v1777_v52 = vmul.f32 0.03125, %v1718_v12 }
 0x36b   :  { %v4432_v55 = vsub.f32 %v4216_v41, %v1777_v52  ;;  %v1852_v1 = vmul.f32 %v4429_v57, %v4429_v57 }
 0x36d   :  { %v1942_v21 = vsel %vm173_vm1, %v1852_v1, 0.0  ;;  %v1853_v29 = vmul.f32 %v4432_v55, %v4432_v55 }
 0x36e   :  { %v1721_v4 = vpop.xlane.xlu0 %1720  ;;  %1943 = vadd.xlane.f32.xlu0 %v1942_v21 }
 0x36f   :  { %v1778_v2 = vmul.f32 0.03125, %v1721_v4  ;;  %v1945_v11 = vsel %vm173_vm1, %v1853_v29, 0.0 }
 0x370   :  { %v1724_v26 = vpop.xlane.xlu1 %1723  ;;  %1946 = vadd.xlane.f32.xlu1 %v1945_v11 }
 0x371   :  { %v4441_v27 = vsub.f32 %v4223_v13, %v1778_v2  ;;  %v1779_v41 = vmul.f32 0.03125, %v1724_v26 }
 0x373   :  { %v4444_v40 = vsub.f32 %v4226_v22, %v1779_v41  ;;  %v1854_v45 = vmul.f32 %v4441_v27, %v4441_v27 }
 0x375   :  { %v1948_v43 = vsel %vm173_vm1, %v1854_v45, 0.0  ;;  %v1855_v32 = vmul.f32 %v4444_v40, %v4444_v40 }
 0x376   :  { %v1727_v36 = vpop.xlane.xlu0 %1726  ;;  %1949 = vadd.xlane.f32.xlu0 %v1948_v43 }
 0x377   :  { %v1780_v63 = vmul.f32 0.03125, %v1727_v36  ;;  %v1951_v16 = vsel %vm173_vm1, %v1855_v32, 0.0 }
 0x378   :  { %v1730_v6 = vpop.xlane.xlu1 %1729  ;;  %1952 = vadd.xlane.f32.xlu1 %v1951_v16 }
 0x379   :  { %v4453_v13 = vsub.f32 %v4233_v19, %v1780_v63  ;;  %v1781_v22 = vmul.f32 0.03125, %v1730_v6 }
 0x37b   :  { %v4456_v5 = vsub.f32 %v4236_v20, %v1781_v22  ;;  %v1856_v23 = vmul.f32 %v4453_v13, %v4453_v13 }
 0x37d   :  { %v1954_v42 = vsel %vm173_vm1, %v1856_v23, 0.0  ;;  %v1857_v3 = vmul.f32 %v4456_v5, %v4456_v5 }
 0x37e   :  { %v1733_v46 = vpop.xlane.xlu0 %1732  ;;  %1955 = vadd.xlane.f32.xlu0 %v1954_v42 }
 0x37f   :  { %v1782_v9 = vmul.f32 0.03125, %v1733_v46  ;;  %v1957_v50 = vsel %vm173_vm1, %v1857_v3, 0.0 }
 0x380   :  { %v1736_v12 = vpop.xlane.xlu1 %1735  ;;  %1958 = vadd.xlane.f32.xlu1 %v1957_v50 }
 0x381   :  { %v4465_v19 = vsub.f32 %v4243_v24, %v1782_v9  ;;  %v1783_v20 = vmul.f32 0.03125, %v1736_v12 }
 0x383   :  { %v4468_v52 = vsub.f32 %v4246_v10, %v1783_v20  ;;  %v1858_v1 = vmul.f32 %v4465_v19, %v4465_v19 }
 0x385   :  { %v1960_v21 = vsel %vm173_vm1, %v1858_v1, 0.0  ;;  %v1859_v29 = vmul.f32 %v4468_v52, %v4468_v52 }
 0x386   :  { %v1739_v4 = vpop.xlane.xlu0 %1738  ;;  %1961 = vadd.xlane.f32.xlu0 %v1960_v21 }
 0x387   :  { %v1784_v2 = vmul.f32 0.03125, %v1739_v4  ;;  %v1963_v11 = vsel %vm173_vm1, %v1859_v29, 0.0 }
 0x388   :  { %v1742_v26 = vpop.xlane.xlu1 %1741  ;;  %1964 = vadd.xlane.f32.xlu1 %v1963_v11 }
 0x389   :  { %v4477_v24 = vsub.f32 %v4253_v17, %v1784_v2  ;;  %v1785_v10 = vmul.f32 0.03125, %v1742_v26  ;;  %v4503_v26 = vld [vmem:[%s4899_s9] ss:$0 sm:$0xff] }
 0x38b   :  { %v4480_v41 = vsub.f32 %v4256_v60, %v1785_v10  ;;  %v1860_v45 = vmul.f32 %v4477_v24, %v4477_v24 }
 0x38d   :  { %v1966_v43 = vsel %vm173_vm1, %v1860_v45, 0.0  ;;  %v1861_v32 = vmul.f32 %v4480_v41, %v4480_v41 }
 0x38e   :  { %1967 = vadd.xlane.f32.xlu0 %v1966_v43  ;;  %v1745_v36 = vpop.xlane.xlu0 %1744 }
 0x38f   :  { %v1786_v63 = vmul.f32 0.03125, %v1745_v36  ;;  %v1969_v16 = vsel %vm173_vm1, %v1861_v32, 0.0  ;;  %v4509_v32 = vld [vmem:[%s4900_s10] ss:$0 sm:$0xff] }
 0x390   :  { %1970 = vadd.xlane.f32.xlu1 %v1969_v16  ;;  %v1748_v17 = vpop.xlane.xlu1 %1747 }
 0x391   :  { %v4489_v6 = vsub.f32 %v4263_v7, %v1786_v63  ;;  %v1787_v60 = vmul.f32 0.03125, %v1748_v17 }
 0x393   :  { %v4492_v22 = vsub.f32 %v4266_v33, %v1787_v60  ;;  %v1866_v23 = vpop.xlane.xlu0 %1865  ;;  %v1862_v42 = vmul.f32 %v4489_v6, %v4489_v6 }
 0x394   :  { %v1978_v3 = vmul.f32 0.03125, %v1866_v23 }
 0x395   :  { %v1972_v46 = vsel %vm173_vm1, %v1862_v42, 0.0  ;;  %v1863_v9 = vmul.f32 %v4492_v22, %v4492_v22 }
 0x396   :  { %v2016_v50 = vadd.f32 1e-05, %v1978_v3  ;;  %1973 = vadd.xlane.f32.xlu0 %v1972_v46  ;;  %v3078_v46 = vld [vmem:[%s4893_s0] sm:$0xff] }
 0x397   :  { %v1869_v12 = vpop.xlane.xlu1 %1868  ;;  %v1975_v7 = vsel %vm173_vm1, %v1863_v9, 0.0 }
 0x398   :  { %3002 = vrsqrt.f32 %v2016_v50  ;;  %v1979_v20 = vmul.f32 0.03125, %v1869_v12  ;;  %1976 = vadd.xlane.f32.xlu1 %v1975_v7 }
 0x39a   :  { %v2017_v33 = vadd.f32 1e-05, %v1979_v20 }
 0x39b   :  { %v1872_v1 = vpop.xlane.xlu0 %1871 }
 0x39c   :  { %3004 = vrsqrt.f32 %v2017_v33  ;;  %v1980_v21 = vmul.f32 0.03125, %v1872_v1  ;;  %v3079_v1 = vld [vmem:[%s4893_s0 + $0x8] sm:$0xff] }
 0x39e   :  { %v2018_v29 = vadd.f32 1e-05, %v1980_v21 }
 0x39f   :  { %v1875_v4 = vpop.xlane.xlu1 %1874 }
 0x3a0   :  { %3006 = vrsqrt.f32 %v2018_v29  ;;  %v1981_v2 = vmul.f32 0.03125, %v1875_v4 }
 0x3a2   :  { %v3003_v11 = vpop.eup %3002  ;;  %v2019_v10 = vadd.f32 1e-05, %v1981_v2 }
 0x3a3   :  { %v2092_v45 = vmul.f32 %v3003_v11, %v4271_v39  ;;  %v1878_v43 = vpop.xlane.xlu0 %1877 }
 0x3a4   :  { %3008 = vrsqrt.f32 %v2019_v10  ;;  %v1982_v36 = vmul.f32 0.03125, %v1878_v43 }
 0x3a5   :  { %v2137_v63 = vmul.f32 %v4503_v26, %v2092_v45  ;;  %v1881_v16 = vpop.xlane.xlu1 %1880 }
 0x3a6   :  { %v3005_v17 = vpop.eup %3004  ;;  %v2020_v60 = vadd.f32 1e-05, %v1982_v36  ;;  %v1983_v23 = vmul.f32 0.03125, %v1881_v16  ;;  %v3080_v36 = vld [vmem:[%s4893_s0 + $0x10] sm:$0xff] }
 0x3a7   :  { %v2182_v42 = vadd.f32 %v4509_v32, %v2137_v63  ;;  %v2093_v3 = vmul.f32 %v3005_v17, %v4278_v61 }
 0x3a8   :  { %3010 = vrsqrt.f32 %v2020_v60  ;;  %v2021_v39 = vadd.f32 1e-05, %v1983_v23 }
 0x3a9   :  { %v2220_v9 = vadd.f32 %v3078_v46, %v2182_v42  ;;  %v2138_v50 = vmul.f32 %v4503_v26, %v2093_v3 }
 0x3aa   :  { %v3007_v12 = vpop.eup %3006  ;;  %3012 = vrsqrt.f32 %v2021_v39  ;;  %v3081_v39 = vld [vmem:[%s4893_s0 + $0x18] sm:$0xff] }
 0x3ab   :  { %2258 = vst.msk [vmem:[%s4901_s11] sm:$0xff] %vm173_vm1, %v2220_v9  ;;  %v2183_v7 = vadd.f32 %v4509_v32, %v2138_v50  ;;  %v2094_v61 = vmul.f32 %v3007_v12, %v4284_v47  ;;  %v1884_v20 = vpop.xlane.xlu0 %1883 }
 0x3ac   :  { %v1984_v33 = vmul.f32 0.03125, %v1884_v20 }
 0x3ad   :  { %v2221_v21 = vadd.f32 %v3079_v1, %v2183_v7  ;;  %v2139_v29 = vmul.f32 %v4503_v26, %v2094_v61  ;;  %v1887_v4 = vpop.xlane.xlu1 %1886  ;;  %v3082_v1 = vld [vmem:[%s4893_s0 + $0x20] sm:$0xff] }
 0x3ae   :  { %v3009_v2 = vpop.eup %3008  ;;  %v2022_v11 = vadd.f32 1e-05, %v1984_v33  ;;  %v1985_v10 = vmul.f32 0.03125, %v1887_v4  ;;  %v3083_v4 = vld [vmem:[%s4893_s0 + $0x28] sm:$0xff] }
 0x3af   :  { %2259 = vst.msk [vmem:[%s4901_s11 + $0x8] sm:$0xff] %vm173_vm1, %v2221_v21  ;;  %v2184_v47 = vadd.f32 %v4509_v32, %v2139_v29  ;;  %v2095_v45 = vmul.f32 %v3009_v2, %v4290_v15 }
 0x3b0   :  { %3014 = vrsqrt.f32 %v2022_v11  ;;  %v2023_v43 = vadd.f32 1e-05, %v1985_v10 }
 0x3b1   :  { %v2222_v63 = vadd.f32 %v3080_v36, %v2184_v47  ;;  %v2140_v16 = vmul.f32 %v4503_v26, %v2095_v45 }
 0x3b2   :  { %v3011_v17 = vpop.eup %3010  ;;  %3016 = vrsqrt.f32 %v2023_v43 }
 0x3b3   :  { %2260 = vst.msk [vmem:[%s4901_s11 + $0x10] sm:$0xff] %vm173_vm1, %v2222_v63  ;;  %v2185_v60 = vadd.f32 %v4509_v32, %v2140_v16  ;;  %v2096_v15 = vmul.f32 %v3011_v17, %v4296_v30  ;;  %v1890_v23 = vpop.xlane.xlu0 %1889 }
 0x3b4   :  { %v3013_v42 = vpop.eup %3012  ;;  %v1986_v3 = vmul.f32 0.03125, %v1890_v23  ;;  %v3084_v23 = vld [vmem:[%s4893_s0 + $0x30] sm:$0xff] }
 0x3b5   :  { %v2223_v46 = vadd.f32 %v3081_v39, %v2185_v60  ;;  %v2141_v9 = vmul.f32 %v4503_v26, %v2096_v15  ;;  %v2097_v50 = vmul.f32 %v3013_v42, %v4300_v0  ;;  %v1893_v12 = vpop.xlane.xlu1 %1892 }
 0x3b6   :  { %v2024_v7 = vadd.f32 1e-05, %v1986_v3  ;;  %v1987_v61 = vmul.f32 0.03125, %v1893_v12 }
 0x3b7   :  { %2261 = vst.msk [vmem:[%s4901_s11 + $0x18] sm:$0xff] %vm173_vm1, %v2223_v46  ;;  %v2186_v30 = vadd.f32 %v4509_v32, %v2141_v9  ;;  %v2142_v20 = vmul.f32 %v4503_v26, %v2097_v50 }
 0x3b8   :  { %3018 = vrsqrt.f32 %v2024_v7  ;;  %v2025_v33 = vadd.f32 1e-05, %v1987_v61 }
 0x3b9   :  { %v2224_v21 = vadd.f32 %v3082_v1, %v2186_v30  ;;  %v2187_v0 = vadd.f32 %v4509_v32, %v2142_v20 }
 0x3ba   :  { %v3015_v29 = vpop.eup %3014  ;;  %3020 = vrsqrt.f32 %v2025_v33 }
 0x3bb   :  { %2262 = vst.msk [vmem:[%s4901_s11 + $0x20] sm:$0xff] %vm173_vm1, %v2224_v21  ;;  %v2225_v2 = vadd.f32 %v3083_v4, %v2187_v0  ;;  %v2098_v11 = vmul.f32 %v3015_v29, %v4309_v54  ;;  %v1896_v10 = vpop.xlane.xlu0 %1895  ;;  %v3086_v29 = vld [vmem:[%s4893_s0 + $0x40] sm:$0xff] }
 0x3bc   :  { %v3017_v47 = vpop.eup %3016  ;;  %v1988_v45 = vmul.f32 0.03125, %v1896_v10 }
 0x3bd   :  { %2263 = vst.msk [vmem:[%s4901_s11 + $0x28] sm:$0xff] %vm173_vm1, %v2225_v2  ;;  %v2143_v43 = vmul.f32 %v4503_v26, %v2098_v11  ;;  %v2099_v36 = vmul.f32 %v3017_v47, %v4312_v44  ;;  %v1899_v63 = vpop.xlane.xlu1 %1898  ;;  %v3085_v44 = vld [vmem:[%s4893_s0 + $0x38] sm:$0xff] }
 0x3be   :  { %v2026_v16 = vadd.f32 1e-05, %v1988_v45  ;;  %v1989_v17 = vmul.f32 0.03125, %v1899_v63 }
 0x3bf   :  { %v2188_v60 = vadd.f32 %v4509_v32, %v2143_v43  ;;  %v2144_v15 = vmul.f32 %v4503_v26, %v2099_v36 }
 0x3c0   :  { %3022 = vrsqrt.f32 %v2026_v16  ;;  %v2027_v54 = vadd.f32 1e-05, %v1989_v17 }
 0x3c1   :  { %v2226_v42 = vadd.f32 %v3084_v23, %v2188_v60  ;;  %v2189_v3 = vadd.f32 %v4509_v32, %v2144_v15 }
 0x3c2   :  { %v3019_v39 = vpop.eup %3018  ;;  %3024 = vrsqrt.f32 %v2027_v54 }
 0x3c3   :  { %2264 = vst.msk [vmem:[%s4901_s11 + $0x30] sm:$0xff] %vm173_vm1, %v2226_v42  ;;  %v2227_v46 = vadd.f32 %v3085_v44, %v2189_v3  ;;  %v2100_v9 = vmul.f32 %v3019_v39, %v4321_v35  ;;  %v1902_v50 = vpop.xlane.xlu0 %1901  ;;  %v3088_v42 = vld [vmem:[%s4893_s0 + $0x50] sm:$0xff] }
 0x3c4   :  { %v3021_v12 = vpop.eup %3020  ;;  %v1990_v7 = vmul.f32 0.03125, %v1902_v50 }
 0x3c5   :  { %2265 = vst.msk [vmem:[%s4901_s11 + $0x38] sm:$0xff] %vm173_vm1, %v2227_v46  ;;  %v2145_v61 = vmul.f32 %v4503_v26, %v2100_v9  ;;  %v2101_v30 = vmul.f32 %v3021_v12, %v4324_v25  ;;  %v1905_v20 = vpop.xlane.xlu1 %1904  ;;  %v3087_v25 = vld [vmem:[%s4893_s0 + $0x48] sm:$0xff] }
 0x3c6   :  { %v2028_v33 = vadd.f32 1e-05, %v1990_v7  ;;  %v1991_v1 = vmul.f32 0.03125, %v1905_v20 }
 0x3c7   :  { %v2190_v21 = vadd.f32 %v4509_v32, %v2145_v61  ;;  %v2146_v0 = vmul.f32 %v4503_v26, %v2101_v30 }
 0x3c8   :  { %3026 = vrsqrt.f32 %v2028_v33  ;;  %v2029_v35 = vadd.f32 1e-05, %v1991_v1 }
 0x3c9   :  { %v2228_v4 = vadd.f32 %v3086_v29, %v2190_v21  ;;  %v2191_v2 = vadd.f32 %v4509_v32, %v2146_v0 }
 0x3ca   :  { %v3023_v11 = vpop.eup %3022  ;;  %3028 = vrsqrt.f32 %v2029_v35  ;;  %v3090_v35 = vld [vmem:[%s4893_s0 + $0x60] sm:$0xff] }
 0x3cb   :  { %2266 = vst.msk [vmem:[%s4901_s11 + $0x40] sm:$0xff] %vm173_vm1, %v2228_v4  ;;  %v2229_v10 = vadd.f32 %v3087_v25, %v2191_v2  ;;  %v2102_v47 = vmul.f32 %v3023_v11, %v4333_v8  ;;  %v1908_v45 = vpop.xlane.xlu0 %1907 }
 0x3cc   :  { %v3025_v43 = vpop.eup %3024  ;;  %v1992_v36 = vmul.f32 0.03125, %v1908_v45 }
 0x3cd   :  { %2267 = vst.msk [vmem:[%s4901_s11 + $0x48] sm:$0xff] %vm173_vm1, %v2229_v10  ;;  %v2147_v63 = vmul.f32 %v4503_v26, %v2102_v47  ;;  %v2103_v16 = vmul.f32 %v3025_v43, %v4336_v28  ;;  %v1911_v17 = vpop.xlane.xlu1 %1910  ;;  %v3089_v28 = vld [vmem:[%s4893_s0 + $0x58] sm:$0xff] }
 0x3ce   :  { %v2030_v60 = vadd.f32 1e-05, %v1992_v36  ;;  %v1993_v15 = vmul.f32 0.03125, %v1911_v17 }
 0x3cf   :  { %v2192_v54 = vadd.f32 %v4509_v32, %v2147_v63  ;;  %v2148_v23 = vmul.f32 %v4503_v26, %v2103_v16 }
 0x3d0   :  { %3030 = vrsqrt.f32 %v2030_v60  ;;  %v2031_v8 = vadd.f32 1e-05, %v1993_v15 }
 0x3d1   :  { %v2230_v3 = vadd.f32 %v3088_v42, %v2192_v54  ;;  %v2193_v39 = vadd.f32 %v4509_v32, %v2148_v23  ;;  %v3092_v54 = vld [vmem:[%s4893_s0 + $0x70] sm:$0xff] }
 0x3d2   :  { %v3027_v44 = vpop.eup %3026  ;;  %3032 = vrsqrt.f32 %v2031_v8 }
 0x3d3   :  { %2268 = vst.msk [vmem:[%s4901_s11 + $0x50] sm:$0xff] %vm173_vm1, %v2230_v3  ;;  %v2231_v46 = vadd.f32 %v3089_v28, %v2193_v39  ;;  %v2104_v9 = vmul.f32 %v3027_v44, %v4345_v59  ;;  %v1914_v50 = vpop.xlane.xlu0 %1913 }
 0x3d4   :  { %v3029_v12 = vpop.eup %3028  ;;  %v1994_v7 = vmul.f32 0.03125, %v1914_v50 }
 0x3d5   :  { %2269 = vst.msk [vmem:[%s4901_s11 + $0x58] sm:$0xff] %vm173_vm1, %v2231_v46  ;;  %v2149_v61 = vmul.f32 %v4503_v26, %v2104_v9  ;;  %v2105_v30 = vmul.f32 %v3029_v12, %v4348_v48  ;;  %v1917_v20 = vpop.xlane.xlu1 %1916  ;;  %v3091_v48 = vld [vmem:[%s4893_s0 + $0x68] sm:$0xff] }
 0x3d6   :  { %v2032_v33 = vadd.f32 1e-05, %v1994_v7  ;;  %v1995_v1 = vmul.f32 0.03125, %v1917_v20 }
 0x3d7   :  { %v2194_v21 = vadd.f32 %v4509_v32, %v2149_v61  ;;  %v2150_v0 = vmul.f32 %v4503_v26, %v2105_v30 }
 0x3d8   :  { %3034 = vrsqrt.f32 %v2032_v33  ;;  %v2033_v59 = vadd.f32 1e-05, %v1995_v1  ;;  %v3094_v33 = vld [vmem:[%s4893_s0 + $0x80] sm:$0xff] }
 0x3d9   :  { %v2232_v29 = vadd.f32 %v3090_v35, %v2194_v21  ;;  %v2195_v4 = vadd.f32 %v4509_v32, %v2150_v0 }
 0x3da   :  { %v3031_v2 = vpop.eup %3030  ;;  %3036 = vrsqrt.f32 %v2033_v59 }
 0x3db   :  { %2270 = vst.msk [vmem:[%s4901_s11 + $0x60] sm:$0xff] %vm173_vm1, %v2232_v29  ;;  %v2233_v11 = vadd.f32 %v3091_v48, %v2195_v4  ;;  %v2106_v25 = vmul.f32 %v3031_v2, %v4357_v56  ;;  %v1920_v10 = vpop.xlane.xlu0 %1919 }
 0x3dc   :  { %v3033_v47 = vpop.eup %3032  ;;  %v1996_v45 = vmul.f32 0.03125, %v1920_v10 }
 0x3dd   :  { %2271 = vst.msk [vmem:[%s4901_s11 + $0x68] sm:$0xff] %vm173_vm1, %v2233_v11  ;;  %v2151_v43 = vmul.f32 %v4503_v26, %v2106_v25  ;;  %v2107_v36 = vmul.f32 %v3033_v47, %v4360_v14  ;;  %v1923_v63 = vpop.xlane.xlu1 %1922  ;;  %v3093_v14 = vld [vmem:[%s4893_s0 + $0x78] sm:$0xff] }
 0x3de   :  { %v2034_v16 = vadd.f32 1e-05, %v1996_v45  ;;  %v1997_v17 = vmul.f32 0.03125, %v1923_v63 }
 0x3df   :  { %v2196_v60 = vadd.f32 %v4509_v32, %v2151_v43  ;;  %v2152_v15 = vmul.f32 %v4503_v26, %v2107_v36  ;;  %v3096_v36 = vld [vmem:[%s4893_s0 + $0x90] sm:$0xff] }
 0x3e0   :  { %3038 = vrsqrt.f32 %v2034_v16  ;;  %v2035_v56 = vadd.f32 1e-05, %v1997_v17 }
 0x3e1   :  { %v2234_v23 = vadd.f32 %v3092_v54, %v2196_v60  ;;  %v2197_v8 = vadd.f32 %v4509_v32, %v2152_v15 }
 0x3e2   :  { %v3035_v42 = vpop.eup %3034  ;;  %3040 = vrsqrt.f32 %v2035_v56 }
 0x3e3   :  { %2272 = vst.msk [vmem:[%s4901_s11 + $0x70] sm:$0xff] %vm173_vm1, %v2234_v23  ;;  %v2235_v3 = vadd.f32 %v3093_v14, %v2197_v8  ;;  %v2108_v39 = vmul.f32 %v3035_v42, %v4369_v18  ;;  %v1926_v44 = vpop.xlane.xlu0 %1925 }
 0x3e4   :  { %v3037_v28 = vpop.eup %3036  ;;  %v1998_v46 = vmul.f32 0.03125, %v1926_v44 }
 0x3e5   :  { %2273 = vst.msk [vmem:[%s4901_s11 + $0x78] sm:$0xff] %vm173_vm1, %v2235_v3  ;;  %v2153_v9 = vmul.f32 %v4503_v26, %v2108_v39  ;;  %v2109_v50 = vmul.f32 %v3037_v28, %v4372_v62  ;;  %v1929_v12 = vpop.xlane.xlu1 %1928  ;;  %v3095_v62 = vld [vmem:[%s4893_s0 + $0x88] sm:$0xff] }
 0x3e6   :  { %v2036_v7 = vadd.f32 1e-05, %v1998_v46  ;;  %v1999_v61 = vmul.f32 0.03125, %v1929_v12  ;;  %v3098_v46 = vld [vmem:[%s4893_s0 + $0xa0] sm:$0xff] }
 0x3e7   :  { %v2198_v30 = vadd.f32 %v4509_v32, %v2153_v9  ;;  %v2154_v20 = vmul.f32 %v4503_v26, %v2109_v50 }
 0x3e8   :  { %3042 = vrsqrt.f32 %v2036_v7  ;;  %v2037_v18 = vadd.f32 1e-05, %v1999_v61 }
 0x3e9   :  { %v2236_v1 = vadd.f32 %v3094_v33, %v2198_v30  ;;  %v2199_v21 = vadd.f32 %v4509_v32, %v2154_v20 }
 0x3ea   :  { %v3039_v0 = vpop.eup %3038  ;;  %3044 = vrsqrt.f32 %v2037_v18 }
 0x3eb   :  { %2274 = vst.msk [vmem:[%s4901_s11 + $0x80] sm:$0xff] %vm173_vm1, %v2236_v1  ;;  %v2237_v59 = vadd.f32 %v3095_v62, %v2199_v21  ;;  %v2110_v35 = vmul.f32 %v3039_v0, %v4381_v31  ;;  %v1932_v29 = vpop.xlane.xlu0 %1931 }
 0x3ec   :  { %v3041_v4 = vpop.eup %3040  ;;  %v2000_v2 = vmul.f32 0.03125, %v1932_v29  ;;  %v3100_v29 = vld [vmem:[%s4893_s0 + $0xb0] sm:$0xff] }
 0x3ed   :  { %2275 = vst.msk [vmem:[%s4901_s11 + $0x88] sm:$0xff] %vm173_vm1, %v2237_v59  ;;  %v2155_v48 = vmul.f32 %v4503_v26, %v2110_v35  ;;  %v2111_v11 = vmul.f32 %v3041_v4, %v4384_v49  ;;  %v1935_v25 = vpop.xlane.xlu1 %1934  ;;  %v3097_v49 = vld [vmem:[%s4893_s0 + $0x98] sm:$0xff] }
 0x3ee   :  { %v2038_v10 = vadd.f32 1e-05, %v2000_v2  ;;  %v2001_v47 = vmul.f32 0.03125, %v1935_v25 }
 0x3ef   :  { %v2200_v45 = vadd.f32 %v4509_v32, %v2155_v48  ;;  %v2156_v43 = vmul.f32 %v4503_v26, %v2111_v11 }
 0x3f0   :  { %3046 = vrsqrt.f32 %v2038_v10  ;;  %v2039_v31 = vadd.f32 1e-05, %v2001_v47 }
 0x3f1   :  { %v2238_v63 = vadd.f32 %v3096_v36, %v2200_v45  ;;  %v2201_v16 = vadd.f32 %v4509_v32, %v2156_v43 }
 0x3f2   :  { %v3043_v17 = vpop.eup %3042  ;;  %3048 = vrsqrt.f32 %v2039_v31 }
 0x3f3   :  { %2276 = vst.msk [vmem:[%s4901_s11 + $0x90] sm:$0xff] %vm173_vm1, %v2238_v63  ;;  %v2239_v60 = vadd.f32 %v3097_v49, %v2201_v16  ;;  %v2112_v15 = vmul.f32 %v3043_v17, %v4393_v51  ;;  %v1938_v56 = vpop.xlane.xlu0 %1937 }
 0x3f4   :  { %v3045_v54 = vpop.eup %3044  ;;  %v2002_v23 = vmul.f32 0.03125, %v1938_v56 }
 0x3f5   :  { %2277 = vst.msk [vmem:[%s4901_s11 + $0x98] sm:$0xff] %vm173_vm1, %v2239_v60  ;;  %v2157_v8 = vmul.f32 %v4503_v26, %v2112_v15  ;;  %v2113_v42 = vmul.f32 %v3045_v54, %v4396_v53  ;;  %v1941_v14 = vpop.xlane.xlu1 %1940  ;;  %v3099_v53 = vld [vmem:[%s4893_s0 + $0xa8] sm:$0xff]  ;;  %v3102_v60 = vld [vmem:[%s4893_s0 + $0xc0] sm:$0xff] }
 0x3f6   :  { %v2040_v3 = vadd.f32 1e-05, %v2002_v23  ;;  %v2003_v39 = vmul.f32 0.03125, %v1941_v14 }
 0x3f7   :  { %v2202_v44 = vadd.f32 %v4509_v32, %v2157_v8  ;;  %v2158_v28 = vmul.f32 %v4503_v26, %v2113_v42 }
 0x3f8   :  { %3050 = vrsqrt.f32 %v2040_v3  ;;  %v2041_v51 = vadd.f32 1e-05, %v2003_v39 }
 0x3f9   :  { %v2240_v9 = vadd.f32 %v3098_v46, %v2202_v44  ;;  %v2203_v50 = vadd.f32 %v4509_v32, %v2158_v28 }
 0x3fa   :  { %v3047_v12 = vpop.eup %3046  ;;  %3052 = vrsqrt.f32 %v2041_v51 }
 0x3fb   :  { %2278 = vst.msk [vmem:[%s4901_s11 + $0xa0] sm:$0xff] %vm173_vm1, %v2240_v9  ;;  %v2241_v7 = vadd.f32 %v3099_v53, %v2203_v50  ;;  %v2114_v61 = vmul.f32 %v3047_v12, %v4405_v34  ;;  %v1944_v30 = vpop.xlane.xlu0 %1943  ;;  %v3104_v12 = vld [vmem:[%s4893_s0 + $0xd0] sm:$0xff] }
 0x3fc   :  { %v3049_v20 = vpop.eup %3048  ;;  %v2004_v18 = vmul.f32 0.03125, %v1944_v30 }
 0x3fd   :  { %2279 = vst.msk [vmem:[%s4901_s11 + $0xa8] sm:$0xff] %vm173_vm1, %v2241_v7  ;;  %v2159_v33 = vmul.f32 %v4503_v26, %v2114_v61  ;;  %v2115_v1 = vmul.f32 %v3049_v20, %v4408_v38  ;;  %v1947_v21 = vpop.xlane.xlu1 %1946  ;;  %v3101_v38 = vld [vmem:[%s4893_s0 + $0xb8] sm:$0xff] }
 0x3fe   :  { %v2042_v0 = vadd.f32 1e-05, %v2004_v18  ;;  %v2005_v62 = vmul.f32 0.03125, %v1947_v21 }
 0x3ff   :  { %v2204_v59 = vadd.f32 %v4509_v32, %v2159_v33  ;;  %v2160_v35 = vmul.f32 %v4503_v26, %v2115_v1 }
 0x400   :  { %3054 = vrsqrt.f32 %v2042_v0  ;;  %v2043_v34 = vadd.f32 1e-05, %v2005_v62 }
 0x401   :  { %v2242_v4 = vadd.f32 %v3100_v29, %v2204_v59  ;;  %v2205_v2 = vadd.f32 %v4509_v32, %v2160_v35 }
 0x402   :  { %v3051_v48 = vpop.eup %3050  ;;  %3056 = vrsqrt.f32 %v2043_v34 }
 0x403   :  { %2280 = vst.msk [vmem:[%s4901_s11 + $0xb0] sm:$0xff] %vm173_vm1, %v2242_v4  ;;  %v2243_v11 = vadd.f32 %v3101_v38, %v2205_v2  ;;  %v2116_v25 = vmul.f32 %v3051_v48, %v4417_v58  ;;  %v1950_v10 = vpop.xlane.xlu0 %1949  ;;  %v3106_v4 = vld [vmem:[%s4893_s0 + $0xe0] sm:$0xff] }
 0x404   :  { %v3053_v47 = vpop.eup %3052  ;;  %v2006_v45 = vmul.f32 0.03125, %v1950_v10 }
 0x405   :  { %2281 = vst.msk [vmem:[%s4901_s11 + $0xb8] sm:$0xff] %vm173_vm1, %v2243_v11  ;;  %v2161_v43 = vmul.f32 %v4503_v26, %v2116_v25  ;;  %v2117_v31 = vmul.f32 %v3053_v47, %v4420_v37  ;;  %v1953_v36 = vpop.xlane.xlu1 %1952  ;;  %v3103_v37 = vld [vmem:[%s4893_s0 + $0xc8] sm:$0xff] }
 0x406   :  { %v2044_v63 = vadd.f32 1e-05, %v2006_v45  ;;  %v2007_v16 = vmul.f32 0.03125, %v1953_v36 }
 0x407   :  { %v2206_v17 = vadd.f32 %v4509_v32, %v2161_v43  ;;  %v2162_v49 = vmul.f32 %v4503_v26, %v2117_v31 }
 0x408   :  { %3058 = vrsqrt.f32 %v2044_v63  ;;  %v2045_v58 = vadd.f32 1e-05, %v2007_v16 }
 0x409   :  { %v2244_v15 = vadd.f32 %v3102_v60, %v2206_v17  ;;  %v2207_v56 = vadd.f32 %v4509_v32, %v2162_v49 }
 0x40a   :  { %v3055_v54 = vpop.eup %3054  ;;  %3060 = vrsqrt.f32 %v2045_v58  ;;  %v3108_v58 = vld [vmem:[%s4893_s0 + $0xf0] sm:$0xff] }
 0x40b   :  { %2282 = vst.msk [vmem:[%s4901_s11 + $0xc0] sm:$0xff] %vm173_vm1, %v2244_v15  ;;  %v2245_v23 = vadd.f32 %v3103_v37, %v2207_v56  ;;  %v2118_v8 = vmul.f32 %v3055_v54, %v4429_v57  ;;  %v1956_v42 = vpop.xlane.xlu0 %1955 }
 0x40c   :  { %v3057_v14 = vpop.eup %3056  ;;  %v2008_v3 = vmul.f32 0.03125, %v1956_v42 }
 0x40d   :  { %2283 = vst.msk [vmem:[%s4901_s11 + $0xc8] sm:$0xff] %vm173_vm1, %v2245_v23  ;;  %v2163_v39 = vmul.f32 %v4503_v26, %v2118_v8  ;;  %v2119_v44 = vmul.f32 %v3057_v14, %v4432_v55  ;;  %v1959_v28 = vpop.xlane.xlu1 %1958  ;;  %v3105_v55 = vld [vmem:[%s4893_s0 + $0xd8] sm:$0xff] }
 0x40e   :  { %v2046_v51 = vadd.f32 1e-05, %v2008_v3  ;;  %v2009_v46 = vmul.f32 0.03125, %v1959_v28 }
 0x40f   :  { %v2208_v9 = vadd.f32 %v4509_v32, %v2163_v39  ;;  %v2164_v50 = vmul.f32 %v4503_v26, %v2119_v44 }
 0x410   :  { %3062 = vrsqrt.f32 %v2046_v51  ;;  %v2047_v57 = vadd.f32 1e-05, %v2009_v46 }
 0x411   :  { %v2246_v53 = vadd.f32 %v3104_v12, %v2208_v9  ;;  %v2209_v7 = vadd.f32 %v4509_v32, %v2164_v50  ;;  %v3110_v9 = vld [vmem:[%s4893_s0 + $0x100] sm:$0xff] }
 0x412   :  { %v3059_v61 = vpop.eup %3058  ;;  %3064 = vrsqrt.f32 %v2047_v57 }
 0x413   :  { %2284 = vst.msk [vmem:[%s4901_s11 + $0xd0] sm:$0xff] %vm173_vm1, %v2246_v53  ;;  %v2247_v30 = vadd.f32 %v3105_v55, %v2209_v7  ;;  %v2120_v20 = vmul.f32 %v3059_v61, %v4441_v27  ;;  %v1962_v18 = vpop.xlane.xlu0 %1961 }
 0x414   :  { %v3061_v33 = vpop.eup %3060  ;;  %v2010_v1 = vmul.f32 0.03125, %v1962_v18 }
 0x415   :  { %2285 = vst.msk [vmem:[%s4901_s11 + $0xd8] sm:$0xff] %vm173_vm1, %v2247_v30  ;;  %v2165_v21 = vmul.f32 %v4503_v26, %v2120_v20  ;;  %v2121_v0 = vmul.f32 %v3061_v33, %v4444_v40  ;;  %v1965_v62 = vpop.xlane.xlu1 %1964  ;;  %v3107_v40 = vld [vmem:[%s4893_s0 + $0xe8] sm:$0xff]  ;;  %v3112_v33 = vld [vmem:[%s4893_s0 + $0x110] sm:$0xff] }
 0x416   :  { %v2048_v59 = vadd.f32 1e-05, %v2010_v1  ;;  %v2011_v35 = vmul.f32 0.03125, %v1965_v62 }
 0x417   :  { %v2210_v34 = vadd.f32 %v4509_v32, %v2165_v21  ;;  %v2166_v29 = vmul.f32 %v4503_v26, %v2121_v0 }
 0x418   :  { %3066 = vrsqrt.f32 %v2048_v59  ;;  %v2049_v27 = vadd.f32 1e-05, %v2011_v35 }
 0x419   :  { %v2248_v2 = vadd.f32 %v3106_v4, %v2210_v34  ;;  %v2211_v48 = vadd.f32 %v4509_v32, %v2166_v29  ;;  %v3114_v4 = vld [vmem:[%s4893_s0 + $0x120] sm:$0xff] }
 0x41a   :  { %v3063_v38 = vpop.eup %3062  ;;  %3068 = vrsqrt.f32 %v2049_v27 }
 0x41b   :  { %2286 = vst.msk [vmem:[%s4901_s11 + $0xe0] sm:$0xff] %vm173_vm1, %v2248_v2  ;;  %v2249_v11 = vadd.f32 %v3107_v40, %v2211_v48  ;;  %v2122_v25 = vmul.f32 %v3063_v38, %v4453_v13  ;;  %v1968_v10 = vpop.xlane.xlu0 %1967 }
 0x41c   :  { %v3065_v47 = vpop.eup %3064  ;;  %v2012_v45 = vmul.f32 0.03125, %v1968_v10 }
 0x41d   :  { %2287 = vst.msk [vmem:[%s4901_s11 + $0xe8] sm:$0xff] %vm173_vm1, %v2249_v11  ;;  %v2167_v43 = vmul.f32 %v4503_v26, %v2122_v25  ;;  %v2123_v31 = vmul.f32 %v3065_v47, %v4456_v5  ;;  %v1971_v36 = vpop.xlane.xlu1 %1970  ;;  %v3109_v5 = vld [vmem:[%s4893_s0 + $0xf8] sm:$0xff] }
 0x41e   :  { %v2050_v63 = vadd.f32 1e-05, %v2012_v45  ;;  %v2013_v16 = vmul.f32 0.03125, %v1971_v36 }
 0x41f   :  { %v2212_v17 = vadd.f32 %v4509_v32, %v2167_v43  ;;  %v2168_v49 = vmul.f32 %v4503_v26, %v2123_v31 }
 0x420   :  { %3070 = vrsqrt.f32 %v2050_v63  ;;  %v2051_v13 = vadd.f32 1e-05, %v2013_v16 }
 0x421   :  { %v2250_v60 = vadd.f32 %v3108_v58, %v2212_v17  ;;  %v2213_v15 = vadd.f32 %v4509_v32, %v2168_v49 }
 0x422   :  { %v3067_v56 = vpop.eup %3066  ;;  %3072 = vrsqrt.f32 %v2051_v13 }
 0x423   :  { %2288 = vst.msk [vmem:[%s4901_s11 + $0xf0] sm:$0xff] %vm173_vm1, %v2250_v60  ;;  %v2251_v54 = vadd.f32 %v3109_v5, %v2213_v15  ;;  %v2124_v37 = vmul.f32 %v3067_v56, %v4465_v19  ;;  %v1974_v23 = vpop.xlane.xlu0 %1973 }
 0x424   :  { %v3069_v8 = vpop.eup %3068  ;;  %v2014_v42 = vmul.f32 0.03125, %v1974_v23 }
 0x425   :  { %2289 = vst.msk [vmem:[%s4901_s11 + $0xf8] sm:$0xff] %vm173_vm1, %v2251_v54  ;;  %v2169_v14 = vmul.f32 %v4503_v26, %v2124_v37  ;;  %v2125_v3 = vmul.f32 %v3069_v8, %v4468_v52  ;;  %v1977_v39 = vpop.xlane.xlu1 %1976  ;;  %v3111_v52 = vld [vmem:[%s4893_s0 + $0x108] sm:$0xff] }
 0x426   :  { %v2052_v44 = vadd.f32 1e-05, %v2014_v42  ;;  %v2015_v28 = vmul.f32 0.03125, %v1977_v39 }
 0x427   :  { %v2214_v51 = vadd.f32 %v4509_v32, %v2169_v14  ;;  %v2170_v46 = vmul.f32 %v4503_v26, %v2125_v3 }
 0x428   :  { %3074 = vrsqrt.f32 %v2052_v44  ;;  %v2053_v19 = vadd.f32 1e-05, %v2015_v28 }
 0x429   :  { %v2252_v50 = vadd.f32 %v3110_v9, %v2214_v51  ;;  %v2215_v57 = vadd.f32 %v4509_v32, %v2170_v46 }
 0x42a   :  { %v3071_v12 = vpop.eup %3070  ;;  %3076 = vrsqrt.f32 %v2053_v19 }
 0x42b   :  { %2290 = vst.msk [vmem:[%s4901_s11 + $0x100] sm:$0xff] %vm173_vm1, %v2252_v50  ;;  %v2253_v53 = vadd.f32 %v3111_v52, %v2215_v57  ;;  %v2126_v7 = vmul.f32 %v3071_v12, %v4477_v24 }
 0x42c   :  { %v3073_v61 = vpop.eup %3072 }
 0x42d   :  { %2291 = vst.msk [vmem:[%s4901_s11 + $0x108] sm:$0xff] %vm173_vm1, %v2253_v53  ;;  %v2171_v55 = vmul.f32 %v4503_v26, %v2126_v7  ;;  %v2127_v30 = vmul.f32 %v3073_v61, %v4480_v41  ;;  %v3113_v41 = vld [vmem:[%s4893_s0 + $0x118] sm:$0xff] }
 0x42f   :  { %v2216_v20 = vadd.f32 %v4509_v32, %v2171_v55  ;;  %v2172_v18 = vmul.f32 %v4503_v26, %v2127_v30 }
 0x431   :  { %v2254_v1 = vadd.f32 %v3112_v33, %v2216_v20  ;;  %v2217_v24 = vadd.f32 %v4509_v32, %v2172_v18 }
 0x432   :  { %v3075_v21 = vpop.eup %3074 }
 0x433   :  { %2292 = vst.msk [vmem:[%s4901_s11 + $0x110] sm:$0xff] %vm173_vm1, %v2254_v1  ;;  %v2255_v0 = vadd.f32 %v3113_v41, %v2217_v24  ;;  %v2128_v62 = vmul.f32 %v3075_v21, %v4489_v6 }
 0x434   :  { %v3077_v59 = vpop.eup %3076 }
 0x435   :  { %2293 = vst.msk [vmem:[%s4901_s11 + $0x118] sm:$0xff] %vm173_vm1, %v2255_v0  ;;  %v2173_v35 = vmul.f32 %v4503_v26, %v2128_v62  ;;  %v2129_v34 = vmul.f32 %v3077_v59, %v4492_v22  ;;  %v3115_v22 = vld [vmem:[%s4893_s0 + $0x128] sm:$0xff] }
 0x437   :  { %v2218_v29 = vadd.f32 %v4509_v32, %v2173_v35  ;;  %v2174_v27 = vmul.f32 %v4503_v26, %v2129_v34 }
 0x439   :  { %v2256_v2 = vadd.f32 %v3114_v4, %v2218_v29  ;;  %v2219_v6 = vadd.f32 %v4509_v32, %v2174_v27 }
 0x43b   :  { %2294 = vst.msk [vmem:[%s4901_s11 + $0x120] sm:$0xff] %vm173_vm1, %v2256_v2  ;;  %v2257_v48 = vadd.f32 %v3115_v22, %v2219_v6 }
 0x43d   :  { %2295 = vst.msk [vmem:[%s4901_s11 + $0x128] sm:$0xff] %vm173_vm1, %v2257_v48 }

</bundles_post_ra>
